<compile_context>
chip_gen: v7x
topology: tpu7x:2x2x1
jax: 0.10.0
libtpu: 0.0.40
codegen_flags: <defaults>
</compile_context>

<pallas_src>
import jax
import jax.numpy as jnp
from jax import lax
from jax.experimental import pallas as pl
from jax.experimental.pallas import tpu as pltpu

# ---- geometry constants (tied together; see asserts below) -------------------
IMG = 28                 # input H = W (must be 28 so Flatten -> 64*7*7)
NP1 = IMG * IMG          # 784 conv1 output rows, r = h*28 + w
NW1 = NP1 // 2           # 392 w-pooled conv1 rows, r = h*14 + u
HP1 = IMG // 2           # 14  pool1 spatial size
PITCH = 16               # row pitch of the zero-padded pool1 buffer (14 data + ring)
C2R = 224                # conv2 output rows r = h*16 + w (28 sublane groups); rows with
                         #   w>=14 and the last 2 rows are junk, never consumed by pool2
A1P = 264                # padded pool1 buffer rows ( >= 2*PITCH + 2 + C2R, mult of 8 )
WP2 = C2R // 2           # 112 w-pooled conv2 rows, r = h*8 + j (j=7 junk)
HP2 = HP1 // 2           # 7   pool2 spatial size
FC1K = HP2 * 64          # 448 fc1 LHS lane width: (i, c) for one pooled column j
FC1N = HP2 * 128         # 896 fc1 RHS lane width: (j, n)
K1 = 16                  # conv1 im2col taps, zero-padded 9 -> 16
NUM_CLASSES = 10

assert C2R == (HP1 - 1) * PITCH + HP1 + 2 and C2R % 8 == 0
assert A1P >= 2 * PITCH + 2 + C2R and A1P % 8 == 0
assert PITCH >= HP1 + 2 and WP2 == HP1 * 8 and NUM_CLASSES <= 128


def _cnn_fused_kernel(p1_ref, wc1_ref, bc1_ref, wc2_ref, bc2_ref,
                      wf1_ref, bf1_ref, wf2_ref, bf2_ref,
                      o_ref, c1_ref, a1p_ref, c2_ref, flat_ref):
    f32, bf16 = jnp.float32, jnp.bfloat16

    # ---- conv1: one (784, 16) x (16, 32) bf16 matmul (f32 acc) + bias + ReLU ----
    c1 = jnp.dot(p1_ref[0], wc1_ref[...], preferred_element_type=f32)
    c1_ref[...] = jnp.maximum(c1 + bc1_ref[...], 0.0)            # rows = h*28 + w

    # ---- pool1 (2x2, stride 2) written into the zero-padded PITCH x PITCH buffer ----
    a1p_ref[...] = jnp.zeros((A1P, 32), f32)                     # zero ring == "same" pad
    wpool1 = jnp.maximum(c1_ref[pl.ds(0, NW1, stride=2), :],     # max over w pairs
                         c1_ref[pl.ds(1, NW1, stride=2), :])     # rows = h*14 + u
    for t in range(HP1):                                         # max over h; place at (t+1, u+1)
        prow = jnp.maximum(wpool1[(2 * t) * HP1:(2 * t) * HP1 + HP1],
                           wpool1[(2 * t + 1) * HP1:(2 * t + 1) * HP1 + HP1])
        a1p_ref[(t + 1) * PITCH + 1:(t + 1) * PITCH + 1 + HP1, :] = prow

    # ---- conv2: 9 accumulated (224, 32) x (32, 64) bf16 matmuls (f32 acc) ----
    acc2 = jnp.zeros((C2R, 64), f32)
    for t in range(9):
        dy, dx = divmod(t, 3)
        off = dy * PITCH + dx                                    # output row r reads buffer row r+off
        tap = a1p_ref[off:off + C2R, :].astype(bf16)
        acc2 = acc2 + jnp.dot(tap, wc2_ref[t], preferred_element_type=f32)
    c2_ref[...] = jnp.maximum(acc2 + bc2_ref[...], 0.0)          # rows = h*16 + w (w>=14 junk)

    # ---- pool2 (2x2, stride 2) into a lane-major bf16 activation flat[j, i*64+c] ----
    wpool2 = jnp.maximum(c2_ref[pl.ds(0, WP2, stride=2), :],     # max over w pairs
                         c2_ref[pl.ds(1, WP2, stride=2), :])     # rows = h*8 + j (j=7 junk)
    for i in range(HP2):                                         # max over h pairs (aligned 8-row slices)
        chunk = jnp.maximum(wpool2[(2 * i) * 8:(2 * i) * 8 + 8],
                            wpool2[(2 * i + 1) * 8:(2 * i + 1) * 8 + 8])   # (8, 64); row 7 junk
        flat_ref[:, i * 64:(i + 1) * 64] = chunk.astype(bf16)

    # ---- fc1: ONE (8, 448) x (448, 896) bf16 matmul; sum the 7 diagonal 128-blocks ----
    g = jnp.dot(flat_ref[...], wf1_ref[...], preferred_element_type=f32)   # (8, 896); row 7 junk, unread
    h1 = bf1_ref[...]                                            # (1, 128) start from bias
    for j in range(HP2):
        h1 = h1 + g[j:j + 1, j * 128:(j + 1) * 128]
    h1 = jnp.maximum(h1, 0.0)
    # TODO(synk): nn.Dropout(0.5) is identity in eval mode; training-mode RNG mask omitted.

    # ---- fc2 (weight/bias zero-padded to 128 lanes for a dense output store) ----
    o_ref[0] = jnp.dot(h1, wf2_ref[...], preferred_element_type=f32) + bf2_ref[...]


def cnn_forward(x_nchw, kp):
    B, C, H, W = x_nchw.shape
    assert C == 1 and H == IMG and W == IMG, "CNNModel expects 1x28x28 inputs"
    x = x_nchw.reshape(B, IMG, IMG)
    xp = jnp.pad(x, ((0, 0), (1, 1), (1, 1)))
    # conv1 im2col on the raw input (tiny; makes conv1 one M=784 MXU matmul).
    p1 = jnp.stack([xp[:, dy:dy + IMG, dx:dx + IMG].reshape(B, NP1)
                    for dy in range(3) for dx in range(3)], axis=-1)       # (B, 784, 9)
    p1 = jnp.pad(p1, ((0, 0), (0, 0), (0, K1 - 9))).astype(jnp.bfloat16)   # (B, 784, 16) bf16

    out = pl.pallas_call(
        _cnn_fused_kernel,
        out_shape=jax.ShapeDtypeStruct((B, 1, 128), jnp.float32),
        grid_spec=pltpu.PrefetchScalarGridSpec(
            num_scalar_prefetch=0,
            grid=(B,),
            in_specs=[
                pl.BlockSpec((1, NP1, K1), lambda b: (b, 0, 0)),     # conv1 im2col patches (bf16)
                pl.BlockSpec((K1, 32), lambda b: (0, 0)),            # conv1 w (bf16)
                pl.BlockSpec((1, 32), lambda b: (0, 0)),             # conv1 b
                pl.BlockSpec((9, 32, 64), lambda b: (0, 0, 0)),      # conv2 w per tap (bf16)
                pl.BlockSpec((1, 64), lambda b: (0, 0)),             # conv2 b
                pl.BlockSpec((FC1K, FC1N), lambda b: (0, 0)),        # fc1 w (bf16, permuted)
                pl.BlockSpec((1, 128), lambda b: (0, 0)),            # fc1 b
                pl.BlockSpec((128, 128), lambda b: (0, 0)),          # fc2 w (zero-padded)
                pl.BlockSpec((1, 128), lambda b: (0, 0)),            # fc2 b (zero-padded)
            ],
            out_specs=pl.BlockSpec((1, 1, 128), lambda b: (b, 0, 0)),
            scratch_shapes=[
                pltpu.VMEM((NP1, 32), jnp.float32),    # conv1 output (pre-pool)
                pltpu.VMEM((A1P, 32), jnp.float32),    # zero-padded pooled conv1 (pitch 16)
                pltpu.VMEM((C2R, 64), jnp.float32),    # conv2 output (pre-pool)
                pltpu.VMEM((8, FC1K), jnp.bfloat16),   # lane-major fc1 activation
            ],
        ),
        compiler_params=pltpu.CompilerParams(
            dimension_semantics=("parallel",),          # v7x: shard the batch over 2 TCs
            vmem_limit_bytes=32 * 1024 * 1024,
        ),
    )(p1, kp["w_c1"], kp["b_c1"], kp["w_c2"], kp["b_c2"],
      kp["w_fc1"], kp["b_fc1"], kp["w_fc2"], kp["b_fc2"])
    return out.reshape(B, 128)[:, :NUM_CLASSES]


def prepare_params(pt):
    """Convert PyTorch-layout parameters into the kernel's layouts."""
    f32, bf16 = jnp.float32, jnp.bfloat16
    # conv1: (O=32, I=1, 3, 3) -> (tap = dy*3+dx, cout), taps zero-padded 9 -> 16.
    w_c1 = jnp.transpose(pt["conv1.weight"], (2, 3, 1, 0)).reshape(9, 32)
    w_c1 = jnp.pad(w_c1, ((0, K1 - 9), (0, 0)))
    # conv2: (O=64, I=32, 3, 3) -> (tap, cin, cout).
    w_c2 = jnp.transpose(pt["conv2.weight"], (2, 3, 1, 0)).reshape(9, 32, 64)
    # fc1: PyTorch flatten order is (c, i, j) -> column c*49 + i*7 + j.  The kernel
    # computes G = flat @ Wcat with flat[j, i*64 + c] and sums the j-th 128-wide
    # diagonal block of G, so Wcat[i*64 + c, j*128 + n] = fc1_w[n, c*49 + i*7 + j].
    w4 = pt["fc1.weight"].reshape(128, 64, HP2, HP2)             # [n, c, i, j]
    w_f1 = jnp.transpose(w4, (2, 1, 3, 0)).reshape(FC1K, FC1N)   # [(i,c), (j,n)]
    # fc2: pad to 128 output lanes for a dense (1,128) store; wrapper slices to 10.
    w_f2 = jnp.zeros((128, 128), f32).at[:, :NUM_CLASSES].set(pt["fc2.weight"].T)
    b_f2 = jnp.zeros((1, 128), f32).at[0, :NUM_CLASSES].set(pt["fc2.bias"])
    return {
        "w_c1": w_c1.astype(bf16),
        "b_c1": pt["conv1.bias"].reshape(1, 32).astype(f32),
        "w_c2": w_c2.astype(bf16),
        "b_c2": pt["conv2.bias"].reshape(1, 64).astype(f32),
        "w_fc1": w_f1.astype(bf16),
        "b_fc1": pt["fc1.bias"].reshape(1, 128).astype(f32),
        "w_fc2": w_f2,
        "b_fc2": b_f2,
    }


def _reference(x_nchw, pt):
    """Pure-JAX reference with PyTorch (NCHW / OIHW) semantics."""
    hi = lax.Precision.HIGHEST

    def conv(x, w, b):
        y = lax.conv_general_dilated(x, w, (1, 1), ((1, 1), (1, 1)),
                                     dimension_numbers=("NCHW", "OIHW", "NCHW"),
                                     precision=hi)
        return jnp.maximum(y + b.reshape(1, -1, 1, 1), 0.0)

    def pool(x):
        B, C, H, W = x.shape
        return jnp.max(x.reshape(B, C, H // 2, 2, W // 2, 2), axis=(3, 5))

    y = pool(conv(x_nchw, pt["conv1.weight"], pt["conv1.bias"]))
    y = pool(conv(y, pt["conv2.weight"], pt["conv2.bias"]))
    y = y.reshape(y.shape[0], -1)                     # nn.Flatten on NCHW: (C, H, W) order
    y = jnp.maximum(jnp.dot(y, pt["fc1.weight"].T, precision=hi) + pt["fc1.bias"], 0.0)
    return jnp.dot(y, pt["fc2.weight"].T, precision=hi) + pt["fc2.bias"]


if __name__ == "__main__":
    key = jax.random.PRNGKey(0)
    ks = jax.random.split(key, 9)

    # Deterministic synthetic parameters in PyTorch layout (shapes from __init__).
    pt_params = {
        "conv1.weight": jax.random.normal(ks[0], (32, 1, 3, 3), jnp.float32) * 0.10,
        "conv1.bias":   jax.random.normal(ks[1], (32,), jnp.float32) * 0.10,
        "conv2.weight": jax.random.normal(ks[2], (64, 32, 3, 3), jnp.float32) * 0.05,
        "conv2.bias":   jax.random.normal(ks[3], (64,), jnp.float32) * 0.05,
        "fc1.weight":   jax.random.normal(ks[4], (128, 64 * 7 * 7), jnp.float32) * 0.02,
        "fc1.bias":     jax.random.normal(ks[5], (128,), jnp.float32) * 0.02,
        "fc2.weight":   jax.random.normal(ks[6], (10, 128), jnp.float32) * 0.10,
        "fc2.bias":     jax.random.normal(ks[7], (10,), jnp.float32) * 0.10,
    }
    # Input: batch=2, 1 channel, 28x28 (spatial must be 28 so Flatten -> 64*7*7).
    x = jax.random.normal(ks[8], (2, 1, 28, 28), jnp.float32)

    kp = prepare_params(pt_params)
    out = jax.jit(lambda xx: cnn_forward(xx, kp))(x)
    out = jax.block_until_ready(out)
    assert out.shape == (2, NUM_CLASSES), out.shape

    ref = _reference(x, pt_params)
    max_err = float(jnp.max(jnp.abs(out - ref)))
    # bf16 MXU operands (f32 accumulation) -> loosened tolerance vs f32 reference.
    assert max_err < 3e-2, f"mismatch vs reference: {max_err}"

    print("KERNEL_OK")
</pallas_src>

<mosaic_0001>
module attributes {stable_mosaic.version = 11 : i64} {
  func.func @_cnn_fused_kernel(%arg0: i32, %arg1: memref<1x784x16xbf16, #tpu.memory_space<vmem>>, %arg2: memref<16x32xbf16, #tpu.memory_space<vmem>>, %arg3: memref<1x32xf32, #tpu.memory_space<vmem>>, %arg4: memref<9x32x64xbf16, #tpu.memory_space<vmem>>, %arg5: memref<1x64xf32, #tpu.memory_space<vmem>>, %arg6: memref<448x896xbf16, #tpu.memory_space<vmem>>, %arg7: memref<1x128xf32, #tpu.memory_space<vmem>>, %arg8: memref<128x128xf32, #tpu.memory_space<vmem>>, %arg9: memref<1x128xf32, #tpu.memory_space<vmem>>, %arg10: memref<1x1x128xf32, #tpu.memory_space<vmem>>, %arg11: memref<784x32xf32, #tpu.memory_space<vmem>>, %arg12: memref<264x32xf32, #tpu.memory_space<vmem>>, %arg13: memref<224x64xf32, #tpu.memory_space<vmem>>, %arg14: memref<8x448xbf16, #tpu.memory_space<vmem>>) attributes {dimension_semantics = [#tpu.dimension_semantics<parallel>], iteration_bounds = array<i64: 2>, scalar_prefetch = 0 : i64, scratch_operands = 4 : i64, tpu.core_type = #tpu.core_type<tc>, window_params = [{transform_indices = @transform_0, window_bounds = array<i64: 1, 784, 16>}, {pipeline_mode = #tpu.pipeline_mode<synchronous>, transform_indices = @transform_1, window_bounds = array<i64: 16, 32>}, {pipeline_mode = #tpu.pipeline_mode<synchronous>, transform_indices = @transform_2, window_bounds = array<i64: 1, 32>}, {pipeline_mode = #tpu.pipeline_mode<synchronous>, transform_indices = @transform_3, window_bounds = array<i64: 9, 32, 64>}, {pipeline_mode = #tpu.pipeline_mode<synchronous>, transform_indices = @transform_4, window_bounds = array<i64: 1, 64>}, {pipeline_mode = #tpu.pipeline_mode<synchronous>, transform_indices = @transform_5, window_bounds = array<i64: 448, 896>}, {pipeline_mode = #tpu.pipeline_mode<synchronous>, transform_indices = @transform_6, window_bounds = array<i64: 1, 128>}, {pipeline_mode = #tpu.pipeline_mode<synchronous>, transform_indices = @transform_7, window_bounds = array<i64: 128, 128>}, {pipeline_mode = #tpu.pipeline_mode<synchronous>, transform_indices = @transform_8, window_bounds = array<i64: 1, 128>}, {transform_indices = @transform_9, window_bounds = array<i64: 1, 1, 128>}]} {
    %c0 = arith.constant 0 : index
    %c0_0 = arith.constant 0 : index
    %c0_1 = arith.constant 0 : index
    %0 = vector.load %arg1[%c0, %c0_0, %c0_1] : memref<1x784x16xbf16, #tpu.memory_space<vmem>>, vector<1x784x16xbf16>
    %1 = vector.shape_cast %0 : vector<1x784x16xbf16> to vector<784x16xbf16>
    %c0_2 = arith.constant 0 : index
    %c0_3 = arith.constant 0 : index
    %2 = vector.load %arg2[%c0_2, %c0_3] : memref<16x32xbf16, #tpu.memory_space<vmem>>, vector<16x32xbf16>
    %cst = arith.constant dense<0.000000e+00> : vector<784x32xf32>
    %3 = tpu.matmul %1, %2, %cst {dimension_numbers = #tpu.dot_dimension_numbers<[1], [0], [0], [1], [0, 0, 1, 1], [], []>} : vector<784x16xbf16>, vector<16x32xbf16>, vector<784x32xf32> -> vector<784x32xf32>
    %c0_4 = arith.constant 0 : index
    %c0_5 = arith.constant 0 : index
    %4 = vector.load %arg3[%c0_4, %c0_5] : memref<1x32xf32, #tpu.memory_space<vmem>>, vector<1x32xf32>
    %5 = vector.broadcast %4 : vector<1x32xf32> to vector<784x32xf32>
    %6 = arith.addf %3, %5 : vector<784x32xf32>
    %cst_6 = arith.constant 0.000000e+00 : f32
    %7 = vector.broadcast %cst_6 : f32 to vector<784x32xf32>
    %8 = arith.maximumf %6, %7 : vector<784x32xf32>
    %c0_7 = arith.constant 0 : index
    %c0_8 = arith.constant 0 : index
    %9 = vector.load %arg11[%c0_7, %c0_8] : memref<784x32xf32, #tpu.memory_space<vmem>>, vector<784x32xf32>
    tpu.vector_store %arg11[%c0_7, %c0_8], %8 {strides = array<i32>} : memref<784x32xf32, #tpu.memory_space<vmem>>, vector<784x32xf32>,
    %cst_9 = arith.constant 0.000000e+00 : f32
    %10 = vector.broadcast %cst_9 : f32 to vector<264x32xf32>
    %c0_10 = arith.constant 0 : index
    %c0_11 = arith.constant 0 : index
    %11 = vector.load %arg12[%c0_10, %c0_11] : memref<264x32xf32, #tpu.memory_space<vmem>>, vector<264x32xf32>
    tpu.vector_store %arg12[%c0_10, %c0_11], %10 {strides = array<i32>} : memref<264x32xf32, #tpu.memory_space<vmem>>, vector<264x32xf32>,
    %c0_12 = arith.constant 0 : index
    %c0_13 = arith.constant 0 : index
    %12 = tpu.strided_load %arg11[%c0_12, %c0_13] {strides = array<i32: 2, 1>} : memref<784x32xf32, #tpu.memory_space<vmem>>, vector<392x32xf32>
    %c1 = arith.constant 1 : index
    %c0_14 = arith.constant 0 : index
    %13 = tpu.strided_load %arg11[%c1, %c0_14] {strides = array<i32: 2, 1>} : memref<784x32xf32, #tpu.memory_space<vmem>>, vector<392x32xf32>
    %14 = arith.maximumf %12, %13 : vector<392x32xf32>
    %15 = vector.extract_strided_slice %14 {offsets = [0, 0], sizes = [14, 32], strides = [1, 1]} : vector<392x32xf32> to vector<14x32xf32>
    %16 = vector.extract_strided_slice %14 {offsets = [14, 0], sizes = [14, 32], strides = [1, 1]} : vector<392x32xf32> to vector<14x32xf32>
    %17 = arith.maximumf %15, %16 : vector<14x32xf32>
    %c17 = arith.constant 17 : index
    %c0_15 = arith.constant 0 : index
    %18 = vector.load %arg12[%c17, %c0_15] : memref<264x32xf32, #tpu.memory_space<vmem>>, vector<14x32xf32>
    tpu.vector_store %arg12[%c17, %c0_15], %17 {strides = array<i32>} : memref<264x32xf32, #tpu.memory_space<vmem>>, vector<14x32xf32>,
    %19 = vector.extract_strided_slice %14 {offsets = [28, 0], sizes = [14, 32], strides = [1, 1]} : vector<392x32xf32> to vector<14x32xf32>
    %20 = vector.extract_strided_slice %14 {offsets = [42, 0], sizes = [14, 32], strides = [1, 1]} : vector<392x32xf32> to vector<14x32xf32>
    %21 = arith.maximumf %19, %20 : vector<14x32xf32>
    %c33 = arith.constant 33 : index
    %c0_16 = arith.constant 0 : index
    %22 = vector.load %arg12[%c33, %c0_16] : memref<264x32xf32, #tpu.memory_space<vmem>>, vector<14x32xf32>
    tpu.vector_store %arg12[%c33, %c0_16], %21 {strides = array<i32>} : memref<264x32xf32, #tpu.memory_space<vmem>>, vector<14x32xf32>,
    %23 = vector.extract_strided_slice %14 {offsets = [56, 0], sizes = [14, 32], strides = [1, 1]} : vector<392x32xf32> to vector<14x32xf32>
    %24 = vector.extract_strided_slice %14 {offsets = [70, 0], sizes = [14, 32], strides = [1, 1]} : vector<392x32xf32> to vector<14x32xf32>
    %25 = arith.maximumf %23, %24 : vector<14x32xf32>
    %c49 = arith.constant 49 : index
    %c0_17 = arith.constant 0 : index
    %26 = vector.load %arg12[%c49, %c0_17] : memref<264x32xf32, #tpu.memory_space<vmem>>, vector<14x32xf32>
    tpu.vector_store %arg12[%c49, %c0_17], %25 {strides = array<i32>} : memref<264x32xf32, #tpu.memory_space<vmem>>, vector<14x32xf32>,
    %27 = vector.extract_strided_slice %14 {offsets = [84, 0], sizes = [14, 32], strides = [1, 1]} : vector<392x32xf32> to vector<14x32xf32>
    %28 = vector.extract_strided_slice %14 {offsets = [98, 0], sizes = [14, 32], strides = [1, 1]} : vector<392x32xf32> to vector<14x32xf32>
    %29 = arith.maximumf %27, %28 : vector<14x32xf32>
    %c65 = arith.constant 65 : index
    %c0_18 = arith.constant 0 : index
    %30 = vector.load %arg12[%c65, %c0_18] : memref<264x32xf32, #tpu.memory_space<vmem>>, vector<14x32xf32>
    tpu.vector_store %arg12[%c65, %c0_18], %29 {strides = array<i32>} : memref<264x32xf32, #tpu.memory_space<vmem>>, vector<14x32xf32>,
    %31 = vector.extract_strided_slice %14 {offsets = [112, 0], sizes = [14, 32], strides = [1, 1]} : vector<392x32xf32> to vector<14x32xf32>
    %32 = vector.extract_strided_slice %14 {offsets = [126, 0], sizes = [14, 32], strides = [1, 1]} : vector<392x32xf32> to vector<14x32xf32>
    %33 = arith.maximumf %31, %32 : vector<14x32xf32>
    %c81 = arith.constant 81 : index
    %c0_19 = arith.constant 0 : index
    %34 = vector.load %arg12[%c81, %c0_19] : memref<264x32xf32, #tpu.memory_space<vmem>>, vector<14x32xf32>
    tpu.vector_store %arg12[%c81, %c0_19], %33 {strides = array<i32>} : memref<264x32xf32, #tpu.memory_space<vmem>>, vector<14x32xf32>,
    %35 = vector.extract_strided_slice %14 {offsets = [140, 0], sizes = [14, 32], strides = [1, 1]} : vector<392x32xf32> to vector<14x32xf32>
    %36 = vector.extract_strided_slice %14 {offsets = [154, 0], sizes = [14, 32], strides = [1, 1]} : vector<392x32xf32> to vector<14x32xf32>
    %37 = arith.maximumf %35, %36 : vector<14x32xf32>
    %c97 = arith.constant 97 : index
    %c0_20 = arith.constant 0 : index
    %38 = vector.load %arg12[%c97, %c0_20] : memref<264x32xf32, #tpu.memory_space<vmem>>, vector<14x32xf32>
    tpu.vector_store %arg12[%c97, %c0_20], %37 {strides = array<i32>} : memref<264x32xf32, #tpu.memory_space<vmem>>, vector<14x32xf32>,
    %39 = vector.extract_strided_slice %14 {offsets = [168, 0], sizes = [14, 32], strides = [1, 1]} : vector<392x32xf32> to vector<14x32xf32>
    %40 = vector.extract_strided_slice %14 {offsets = [182, 0], sizes = [14, 32], strides = [1, 1]} : vector<392x32xf32> to vector<14x32xf32>
    %41 = arith.maximumf %39, %40 : vector<14x32xf32>
    %c113 = arith.constant 113 : index
    %c0_21 = arith.constant 0 : index
    %42 = vector.load %arg12[%c113, %c0_21] : memref<264x32xf32, #tpu.memory_space<vmem>>, vector<14x32xf32>
    tpu.vector_store %arg12[%c113, %c0_21], %41 {strides = array<i32>} : memref<264x32xf32, #tpu.memory_space<vmem>>, vector<14x32xf32>,
    %43 = vector.extract_strided_slice %14 {offsets = [196, 0], sizes = [14, 32], strides = [1, 1]} : vector<392x32xf32> to vector<14x32xf32>
    %44 = vector.extract_strided_slice %14 {offsets = [210, 0], sizes = [14, 32], strides = [1, 1]} : vector<392x32xf32> to vector<14x32xf32>
    %45 = arith.maximumf %43, %44 : vector<14x32xf32>
    %c129 = arith.constant 129 : index
    %c0_22 = arith.constant 0 : index
    %46 = vector.load %arg12[%c129, %c0_22] : memref<264x32xf32, #tpu.memory_space<vmem>>, vector<14x32xf32>
    tpu.vector_store %arg12[%c129, %c0_22], %45 {strides = array<i32>} : memref<264x32xf32, #tpu.memory_space<vmem>>, vector<14x32xf32>,
    %47 = vector.extract_strided_slice %14 {offsets = [224, 0], sizes = [14, 32], strides = [1, 1]} : vector<392x32xf32> to vector<14x32xf32>
    %48 = vector.extract_strided_slice %14 {offsets = [238, 0], sizes = [14, 32], strides = [1, 1]} : vector<392x32xf32> to vector<14x32xf32>
    %49 = arith.maximumf %47, %48 : vector<14x32xf32>
    %c145 = arith.constant 145 : index
    %c0_23 = arith.constant 0 : index
    %50 = vector.load %arg12[%c145, %c0_23] : memref<264x32xf32, #tpu.memory_space<vmem>>, vector<14x32xf32>
    tpu.vector_store %arg12[%c145, %c0_23], %49 {strides = array<i32>} : memref<264x32xf32, #tpu.memory_space<vmem>>, vector<14x32xf32>,
    %51 = vector.extract_strided_slice %14 {offsets = [252, 0], sizes = [14, 32], strides = [1, 1]} : vector<392x32xf32> to vector<14x32xf32>
    %52 = vector.extract_strided_slice %14 {offsets = [266, 0], sizes = [14, 32], strides = [1, 1]} : vector<392x32xf32> to vector<14x32xf32>
    %53 = arith.maximumf %51, %52 : vector<14x32xf32>
    %c161 = arith.constant 161 : index
    %c0_24 = arith.constant 0 : index
    %54 = vector.load %arg12[%c161, %c0_24] : memref<264x32xf32, #tpu.memory_space<vmem>>, vector<14x32xf32>
    tpu.vector_store %arg12[%c161, %c0_24], %53 {strides = array<i32>} : memref<264x32xf32, #tpu.memory_space<vmem>>, vector<14x32xf32>,
    %55 = vector.extract_strided_slice %14 {offsets = [280, 0], sizes = [14, 32], strides = [1, 1]} : vector<392x32xf32> to vector<14x32xf32>
    %56 = vector.extract_strided_slice %14 {offsets = [294, 0], sizes = [14, 32], strides = [1, 1]} : vector<392x32xf32> to vector<14x32xf32>
    %57 = arith.maximumf %55, %56 : vector<14x32xf32>
    %c177 = arith.constant 177 : index
    %c0_25 = arith.constant 0 : index
    %58 = vector.load %arg12[%c177, %c0_25] : memref<264x32xf32, #tpu.memory_space<vmem>>, vector<14x32xf32>
    tpu.vector_store %arg12[%c177, %c0_25], %57 {strides = array<i32>} : memref<264x32xf32, #tpu.memory_space<vmem>>, vector<14x32xf32>,
    %59 = vector.extract_strided_slice %14 {offsets = [308, 0], sizes = [14, 32], strides = [1, 1]} : vector<392x32xf32> to vector<14x32xf32>
    %60 = vector.extract_strided_slice %14 {offsets = [322, 0], sizes = [14, 32], strides = [1, 1]} : vector<392x32xf32> to vector<14x32xf32>
    %61 = arith.maximumf %59, %60 : vector<14x32xf32>
    %c193 = arith.constant 193 : index
    %c0_26 = arith.constant 0 : index
    %62 = vector.load %arg12[%c193, %c0_26] : memref<264x32xf32, #tpu.memory_space<vmem>>, vector<14x32xf32>
    tpu.vector_store %arg12[%c193, %c0_26], %61 {strides = array<i32>} : memref<264x32xf32, #tpu.memory_space<vmem>>, vector<14x32xf32>,
    %63 = vector.extract_strided_slice %14 {offsets = [336, 0], sizes = [14, 32], strides = [1, 1]} : vector<392x32xf32> to vector<14x32xf32>
    %64 = vector.extract_strided_slice %14 {offsets = [350, 0], sizes = [14, 32], strides = [1, 1]} : vector<392x32xf32> to vector<14x32xf32>
    %65 = arith.maximumf %63, %64 : vector<14x32xf32>
    %c209 = arith.constant 209 : index
    %c0_27 = arith.constant 0 : index
    %66 = vector.load %arg12[%c209, %c0_27] : memref<264x32xf32, #tpu.memory_space<vmem>>, vector<14x32xf32>
    tpu.vector_store %arg12[%c209, %c0_27], %65 {strides = array<i32>} : memref<264x32xf32, #tpu.memory_space<vmem>>, vector<14x32xf32>,
    %67 = vector.extract_strided_slice %14 {offsets = [364, 0], sizes = [14, 32], strides = [1, 1]} : vector<392x32xf32> to vector<14x32xf32>
    %68 = vector.extract_strided_slice %14 {offsets = [378, 0], sizes = [14, 32], strides = [1, 1]} : vector<392x32xf32> to vector<14x32xf32>
    %69 = arith.maximumf %67, %68 : vector<14x32xf32>
    %c225 = arith.constant 225 : index
    %c0_28 = arith.constant 0 : index
    %70 = vector.load %arg12[%c225, %c0_28] : memref<264x32xf32, #tpu.memory_space<vmem>>, vector<14x32xf32>
    tpu.vector_store %arg12[%c225, %c0_28], %69 {strides = array<i32>} : memref<264x32xf32, #tpu.memory_space<vmem>>, vector<14x32xf32>,
    %cst_29 = arith.constant 0.000000e+00 : f32
    %71 = vector.broadcast %cst_29 : f32 to vector<224x64xf32>
    %c0_30 = arith.constant 0 : index
    %c0_31 = arith.constant 0 : index
    %72 = vector.load %arg12[%c0_30, %c0_31] : memref<264x32xf32, #tpu.memory_space<vmem>>, vector<224x32xf32>
    %73 = arith.truncf %72 : vector<224x32xf32> to vector<224x32xbf16>
    %c0_32 = arith.constant 0 : index
    %c0_33 = arith.constant 0 : index
    %c0_34 = arith.constant 0 : index
    %74 = vector.load %arg4[%c0_32, %c0_33, %c0_34] : memref<9x32x64xbf16, #tpu.memory_space<vmem>>, vector<1x32x64xbf16>
    %75 = vector.shape_cast %74 : vector<1x32x64xbf16> to vector<32x64xbf16>
    %cst_35 = arith.constant dense<0.000000e+00> : vector<224x64xf32>
    %76 = tpu.matmul %73, %75, %cst_35 {dimension_numbers = #tpu.dot_dimension_numbers<[1], [0], [0], [1], [0, 0, 1, 1], [], []>} : vector<224x32xbf16>, vector<32x64xbf16>, vector<224x64xf32> -> vector<224x64xf32>
    %77 = arith.addf %71, %76 : vector<224x64xf32>
    %c1_36 = arith.constant 1 : index
    %c0_37 = arith.constant 0 : index
    %78 = vector.load %arg12[%c1_36, %c0_37] : memref<264x32xf32, #tpu.memory_space<vmem>>, vector<224x32xf32>
    %79 = arith.truncf %78 : vector<224x32xf32> to vector<224x32xbf16>
    %c1_38 = arith.constant 1 : index
    %c0_39 = arith.constant 0 : index
    %c0_40 = arith.constant 0 : index
    %80 = vector.load %arg4[%c1_38, %c0_39, %c0_40] : memref<9x32x64xbf16, #tpu.memory_space<vmem>>, vector<1x32x64xbf16>
    %81 = vector.shape_cast %80 : vector<1x32x64xbf16> to vector<32x64xbf16>
    %cst_41 = arith.constant dense<0.000000e+00> : vector<224x64xf32>
    %82 = tpu.matmul %79, %81, %cst_41 {dimension_numbers = #tpu.dot_dimension_numbers<[1], [0], [0], [1], [0, 0, 1, 1], [], []>} : vector<224x32xbf16>, vector<32x64xbf16>, vector<224x64xf32> -> vector<224x64xf32>
    %83 = arith.addf %77, %82 : vector<224x64xf32>
    %c2 = arith.constant 2 : index
    %c0_42 = arith.constant 0 : index
    %84 = vector.load %arg12[%c2, %c0_42] : memref<264x32xf32, #tpu.memory_space<vmem>>, vector<224x32xf32>
    %85 = arith.truncf %84 : vector<224x32xf32> to vector<224x32xbf16>
    %c2_43 = arith.constant 2 : index
    %c0_44 = arith.constant 0 : index
    %c0_45 = arith.constant 0 : index
    %86 = vector.load %arg4[%c2_43, %c0_44, %c0_45] : memref<9x32x64xbf16, #tpu.memory_space<vmem>>, vector<1x32x64xbf16>
    %87 = vector.shape_cast %86 : vector<1x32x64xbf16> to vector<32x64xbf16>
    %cst_46 = arith.constant dense<0.000000e+00> : vector<224x64xf32>
    %88 = tpu.matmul %85, %87, %cst_46 {dimension_numbers = #tpu.dot_dimension_numbers<[1], [0], [0], [1], [0, 0, 1, 1], [], []>} : vector<224x32xbf16>, vector<32x64xbf16>, vector<224x64xf32> -> vector<224x64xf32>
    %89 = arith.addf %83, %88 : vector<224x64xf32>
    %c16 = arith.constant 16 : index
    %c0_47 = arith.constant 0 : index
    %90 = vector.load %arg12[%c16, %c0_47] : memref<264x32xf32, #tpu.memory_space<vmem>>, vector<224x32xf32>
    %91 = arith.truncf %90 : vector<224x32xf32> to vector<224x32xbf16>
    %c3 = arith.constant 3 : index
    %c0_48 = arith.constant 0 : index
    %c0_49 = arith.constant 0 : index
    %92 = vector.load %arg4[%c3, %c0_48, %c0_49] : memref<9x32x64xbf16, #tpu.memory_space<vmem>>, vector<1x32x64xbf16>
    %93 = vector.shape_cast %92 : vector<1x32x64xbf16> to vector<32x64xbf16>
    %cst_50 = arith.constant dense<0.000000e+00> : vector<224x64xf32>
    %94 = tpu.matmul %91, %93, %cst_50 {dimension_numbers = #tpu.dot_dimension_numbers<[1], [0], [0], [1], [0, 0, 1, 1], [], []>} : vector<224x32xbf16>, vector<32x64xbf16>, vector<224x64xf32> -> vector<224x64xf32>
    %95 = arith.addf %89, %94 : vector<224x64xf32>
    %c17_51 = arith.constant 17 : index
    %c0_52 = arith.constant 0 : index
    %96 = vector.load %arg12[%c17_51, %c0_52] : memref<264x32xf32, #tpu.memory_space<vmem>>, vector<224x32xf32>
    %97 = arith.truncf %96 : vector<224x32xf32> to vector<224x32xbf16>
    %c4 = arith.constant 4 : index
    %c0_53 = arith.constant 0 : index
    %c0_54 = arith.constant 0 : index
    %98 = vector.load %arg4[%c4, %c0_53, %c0_54] : memref<9x32x64xbf16, #tpu.memory_space<vmem>>, vector<1x32x64xbf16>
    %99 = vector.shape_cast %98 : vector<1x32x64xbf16> to vector<32x64xbf16>
    %cst_55 = arith.constant dense<0.000000e+00> : vector<224x64xf32>
    %100 = tpu.matmul %97, %99, %cst_55 {dimension_numbers = #tpu.dot_dimension_numbers<[1], [0], [0], [1], [0, 0, 1, 1], [], []>} : vector<224x32xbf16>, vector<32x64xbf16>, vector<224x64xf32> -> vector<224x64xf32>
    %101 = arith.addf %95, %100 : vector<224x64xf32>
    %c18 = arith.constant 18 : index
    %c0_56 = arith.constant 0 : index
    %102 = vector.load %arg12[%c18, %c0_56] : memref<264x32xf32, #tpu.memory_space<vmem>>, vector<224x32xf32>
    %103 = arith.truncf %102 : vector<224x32xf32> to vector<224x32xbf16>
    %c5 = arith.constant 5 : index
    %c0_57 = arith.constant 0 : index
    %c0_58 = arith.constant 0 : index
    %104 = vector.load %arg4[%c5, %c0_57, %c0_58] : memref<9x32x64xbf16, #tpu.memory_space<vmem>>, vector<1x32x64xbf16>
    %105 = vector.shape_cast %104 : vector<1x32x64xbf16> to vector<32x64xbf16>
    %cst_59 = arith.constant dense<0.000000e+00> : vector<224x64xf32>
    %106 = tpu.matmul %103, %105, %cst_59 {dimension_numbers = #tpu.dot_dimension_numbers<[1], [0], [0], [1], [0, 0, 1, 1], [], []>} : vector<224x32xbf16>, vector<32x64xbf16>, vector<224x64xf32> -> vector<224x64xf32>
    %107 = arith.addf %101, %106 : vector<224x64xf32>
    %c32 = arith.constant 32 : index
    %c0_60 = arith.constant 0 : index
    %108 = vector.load %arg12[%c32, %c0_60] : memref<264x32xf32, #tpu.memory_space<vmem>>, vector<224x32xf32>
    %109 = arith.truncf %108 : vector<224x32xf32> to vector<224x32xbf16>
    %c6 = arith.constant 6 : index
    %c0_61 = arith.constant 0 : index
    %c0_62 = arith.constant 0 : index
    %110 = vector.load %arg4[%c6, %c0_61, %c0_62] : memref<9x32x64xbf16, #tpu.memory_space<vmem>>, vector<1x32x64xbf16>
    %111 = vector.shape_cast %110 : vector<1x32x64xbf16> to vector<32x64xbf16>
    %cst_63 = arith.constant dense<0.000000e+00> : vector<224x64xf32>
    %112 = tpu.matmul %109, %111, %cst_63 {dimension_numbers = #tpu.dot_dimension_numbers<[1], [0], [0], [1], [0, 0, 1, 1], [], []>} : vector<224x32xbf16>, vector<32x64xbf16>, vector<224x64xf32> -> vector<224x64xf32>
    %113 = arith.addf %107, %112 : vector<224x64xf32>
    %c33_64 = arith.constant 33 : index
    %c0_65 = arith.constant 0 : index
    %114 = vector.load %arg12[%c33_64, %c0_65] : memref<264x32xf32, #tpu.memory_space<vmem>>, vector<224x32xf32>
    %115 = arith.truncf %114 : vector<224x32xf32> to vector<224x32xbf16>
    %c7 = arith.constant 7 : index
    %c0_66 = arith.constant 0 : index
    %c0_67 = arith.constant 0 : index
    %116 = vector.load %arg4[%c7, %c0_66, %c0_67] : memref<9x32x64xbf16, #tpu.memory_space<vmem>>, vector<1x32x64xbf16>
    %117 = vector.shape_cast %116 : vector<1x32x64xbf16> to vector<32x64xbf16>
    %cst_68 = arith.constant dense<0.000000e+00> : vector<224x64xf32>
    %118 = tpu.matmul %115, %117, %cst_68 {dimension_numbers = #tpu.dot_dimension_numbers<[1], [0], [0], [1], [0, 0, 1, 1], [], []>} : vector<224x32xbf16>, vector<32x64xbf16>, vector<224x64xf32> -> vector<224x64xf32>
    %119 = arith.addf %113, %118 : vector<224x64xf32>
    %c34 = arith.constant 34 : index
    %c0_69 = arith.constant 0 : index
    %120 = vector.load %arg12[%c34, %c0_69] : memref<264x32xf32, #tpu.memory_space<vmem>>, vector<224x32xf32>
    %121 = arith.truncf %120 : vector<224x32xf32> to vector<224x32xbf16>
    %c8 = arith.constant 8 : index
    %c0_70 = arith.constant 0 : index
    %c0_71 = arith.constant 0 : index
    %122 = vector.load %arg4[%c8, %c0_70, %c0_71] : memref<9x32x64xbf16, #tpu.memory_space<vmem>>, vector<1x32x64xbf16>
    %123 = vector.shape_cast %122 : vector<1x32x64xbf16> to vector<32x64xbf16>
    %cst_72 = arith.constant dense<0.000000e+00> : vector<224x64xf32>
    %124 = tpu.matmul %121, %123, %cst_72 {dimension_numbers = #tpu.dot_dimension_numbers<[1], [0], [0], [1], [0, 0, 1, 1], [], []>} : vector<224x32xbf16>, vector<32x64xbf16>, vector<224x64xf32> -> vector<224x64xf32>
    %125 = arith.addf %119, %124 : vector<224x64xf32>
    %c0_73 = arith.constant 0 : index
    %c0_74 = arith.constant 0 : index
    %126 = vector.load %arg5[%c0_73, %c0_74] : memref<1x64xf32, #tpu.memory_space<vmem>>, vector<1x64xf32>
    %127 = vector.broadcast %126 : vector<1x64xf32> to vector<224x64xf32>
    %128 = arith.addf %125, %127 : vector<224x64xf32>
    %cst_75 = arith.constant 0.000000e+00 : f32
    %129 = vector.broadcast %cst_75 : f32 to vector<224x64xf32>
    %130 = arith.maximumf %128, %129 : vector<224x64xf32>
    %c0_76 = arith.constant 0 : index
    %c0_77 = arith.constant 0 : index
    %131 = vector.load %arg13[%c0_76, %c0_77] : memref<224x64xf32, #tpu.memory_space<vmem>>, vector<224x64xf32>
    tpu.vector_store %arg13[%c0_76, %c0_77], %130 {strides = array<i32>} : memref<224x64xf32, #tpu.memory_space<vmem>>, vector<224x64xf32>,
    %c0_78 = arith.constant 0 : index
    %c0_79 = arith.constant 0 : index
    %132 = tpu.strided_load %arg13[%c0_78, %c0_79] {strides = array<i32: 2, 1>} : memref<224x64xf32, #tpu.memory_space<vmem>>, vector<112x64xf32>
    %c1_80 = arith.constant 1 : index
    %c0_81 = arith.constant 0 : index
    %133 = tpu.strided_load %arg13[%c1_80, %c0_81] {strides = array<i32: 2, 1>} : memref<224x64xf32, #tpu.memory_space<vmem>>, vector<112x64xf32>
    %134 = arith.maximumf %132, %133 : vector<112x64xf32>
    %135 = vector.extract_strided_slice %134 {offsets = [0, 0], sizes = [8, 64], strides = [1, 1]} : vector<112x64xf32> to vector<8x64xf32>
    %136 = vector.extract_strided_slice %134 {offsets = [8, 0], sizes = [8, 64], strides = [1, 1]} : vector<112x64xf32> to vector<8x64xf32>
    %137 = arith.maximumf %135, %136 : vector<8x64xf32>
    %138 = arith.truncf %137 : vector<8x64xf32> to vector<8x64xbf16>
    %c0_82 = arith.constant 0 : index
    %c0_83 = arith.constant 0 : index
    %139 = vector.load %arg14[%c0_82, %c0_83] : memref<8x448xbf16, #tpu.memory_space<vmem>>, vector<8x64xbf16>
    tpu.vector_store %arg14[%c0_82, %c0_83], %138 {strides = array<i32>} : memref<8x448xbf16, #tpu.memory_space<vmem>>, vector<8x64xbf16>,
    %140 = vector.extract_strided_slice %134 {offsets = [16, 0], sizes = [8, 64], strides = [1, 1]} : vector<112x64xf32> to vector<8x64xf32>
    %141 = vector.extract_strided_slice %134 {offsets = [24, 0], sizes = [8, 64], strides = [1, 1]} : vector<112x64xf32> to vector<8x64xf32>
    %142 = arith.maximumf %140, %141 : vector<8x64xf32>
    %143 = arith.truncf %142 : vector<8x64xf32> to vector<8x64xbf16>
    %c0_84 = arith.constant 0 : index
    %c64 = arith.constant 64 : index
    %144 = vector.load %arg14[%c0_84, %c64] : memref<8x448xbf16, #tpu.memory_space<vmem>>, vector<8x64xbf16>
    tpu.vector_store %arg14[%c0_84, %c64], %143 {strides = array<i32>} : memref<8x448xbf16, #tpu.memory_space<vmem>>, vector<8x64xbf16>,
    %145 = vector.extract_strided_slice %134 {offsets = [32, 0], sizes = [8, 64], strides = [1, 1]} : vector<112x64xf32> to vector<8x64xf32>
    %146 = vector.extract_strided_slice %134 {offsets = [40, 0], sizes = [8, 64], strides = [1, 1]} : vector<112x64xf32> to vector<8x64xf32>
    %147 = arith.maximumf %145, %146 : vector<8x64xf32>
    %148 = arith.truncf %147 : vector<8x64xf32> to vector<8x64xbf16>
    %c0_85 = arith.constant 0 : index
    %c128 = arith.constant 128 : index
    %149 = vector.load %arg14[%c0_85, %c128] : memref<8x448xbf16, #tpu.memory_space<vmem>>, vector<8x64xbf16>
    tpu.vector_store %arg14[%c0_85, %c128], %148 {strides = array<i32>} : memref<8x448xbf16, #tpu.memory_space<vmem>>, vector<8x64xbf16>,
    %150 = vector.extract_strided_slice %134 {offsets = [48, 0], sizes = [8, 64], strides = [1, 1]} : vector<112x64xf32> to vector<8x64xf32>
    %151 = vector.extract_strided_slice %134 {offsets = [56, 0], sizes = [8, 64], strides = [1, 1]} : vector<112x64xf32> to vector<8x64xf32>
    %152 = arith.maximumf %150, %151 : vector<8x64xf32>
    %153 = arith.truncf %152 : vector<8x64xf32> to vector<8x64xbf16>
    %c0_86 = arith.constant 0 : index
    %c192 = arith.constant 192 : index
    %154 = vector.load %arg14[%c0_86, %c192] : memref<8x448xbf16, #tpu.memory_space<vmem>>, vector<8x64xbf16>
    tpu.vector_store %arg14[%c0_86, %c192], %153 {strides = array<i32>} : memref<8x448xbf16, #tpu.memory_space<vmem>>, vector<8x64xbf16>,
    %155 = vector.extract_strided_slice %134 {offsets = [64, 0], sizes = [8, 64], strides = [1, 1]} : vector<112x64xf32> to vector<8x64xf32>
    %156 = vector.extract_strided_slice %134 {offsets = [72, 0], sizes = [8, 64], strides = [1, 1]} : vector<112x64xf32> to vector<8x64xf32>
    %157 = arith.maximumf %155, %156 : vector<8x64xf32>
    %158 = arith.truncf %157 : vector<8x64xf32> to vector<8x64xbf16>
    %c0_87 = arith.constant 0 : index
    %c256 = arith.constant 256 : index
    %159 = vector.load %arg14[%c0_87, %c256] : memref<8x448xbf16, #tpu.memory_space<vmem>>, vector<8x64xbf16>
    tpu.vector_store %arg14[%c0_87, %c256], %158 {strides = array<i32>} : memref<8x448xbf16, #tpu.memory_space<vmem>>, vector<8x64xbf16>,
    %160 = vector.extract_strided_slice %134 {offsets = [80, 0], sizes = [8, 64], strides = [1, 1]} : vector<112x64xf32> to vector<8x64xf32>
    %161 = vector.extract_strided_slice %134 {offsets = [88, 0], sizes = [8, 64], strides = [1, 1]} : vector<112x64xf32> to vector<8x64xf32>
    %162 = arith.maximumf %160, %161 : vector<8x64xf32>
    %163 = arith.truncf %162 : vector<8x64xf32> to vector<8x64xbf16>
    %c0_88 = arith.constant 0 : index
    %c320 = arith.constant 320 : index
    %164 = vector.load %arg14[%c0_88, %c320] : memref<8x448xbf16, #tpu.memory_space<vmem>>, vector<8x64xbf16>
    tpu.vector_store %arg14[%c0_88, %c320], %163 {strides = array<i32>} : memref<8x448xbf16, #tpu.memory_space<vmem>>, vector<8x64xbf16>,
    %165 = vector.extract_strided_slice %134 {offsets = [96, 0], sizes = [8, 64], strides = [1, 1]} : vector<112x64xf32> to vector<8x64xf32>
    %166 = vector.extract_strided_slice %134 {offsets = [104, 0], sizes = [8, 64], strides = [1, 1]} : vector<112x64xf32> to vector<8x64xf32>
    %167 = arith.maximumf %165, %166 : vector<8x64xf32>
    %168 = arith.truncf %167 : vector<8x64xf32> to vector<8x64xbf16>
    %c0_89 = arith.constant 0 : index
    %c384 = arith.constant 384 : index
    %169 = vector.load %arg14[%c0_89, %c384] : memref<8x448xbf16, #tpu.memory_space<vmem>>, vector<8x64xbf16>
    tpu.vector_store %arg14[%c0_89, %c384], %168 {strides = array<i32>} : memref<8x448xbf16, #tpu.memory_space<vmem>>, vector<8x64xbf16>,
    %c0_90 = arith.constant 0 : index
    %c0_91 = arith.constant 0 : index
    %170 = vector.load %arg14[%c0_90, %c0_91] : memref<8x448xbf16, #tpu.memory_space<vmem>>, vector<8x448xbf16>
    %c0_92 = arith.constant 0 : index
    %c0_93 = arith.constant 0 : index
    %171 = vector.load %arg6[%c0_92, %c0_93] : memref<448x896xbf16, #tpu.memory_space<vmem>>, vector<448x896xbf16>
    %cst_94 = arith.constant dense<0.000000e+00> : vector<8x896xf32>
    %172 = tpu.matmul %170, %171, %cst_94 {dimension_numbers = #tpu.dot_dimension_numbers<[1], [0], [0], [1], [0, 0, 1, 1], [], []>} : vector<8x448xbf16>, vector<448x896xbf16>, vector<8x896xf32> -> vector<8x896xf32>
    %c0_95 = arith.constant 0 : index
    %c0_96 = arith.constant 0 : index
    %173 = vector.load %arg7[%c0_95, %c0_96] : memref<1x128xf32, #tpu.memory_space<vmem>>, vector<1x128xf32>
    %174 = vector.extract_strided_slice %172 {offsets = [0, 0], sizes = [1, 128], strides = [1, 1]} : vector<8x896xf32> to vector<1x128xf32>
    %175 = arith.addf %173, %174 : vector<1x128xf32>
    %176 = vector.extract_strided_slice %172 {offsets = [1, 128], sizes = [1, 128], strides = [1, 1]} : vector<8x896xf32> to vector<1x128xf32>
    %177 = arith.addf %175, %176 : vector<1x128xf32>
    %178 = vector.extract_strided_slice %172 {offsets = [2, 256], sizes = [1, 128], strides = [1, 1]} : vector<8x896xf32> to vector<1x128xf32>
    %179 = arith.addf %177, %178 : vector<1x128xf32>
    %180 = vector.extract_strided_slice %172 {offsets = [3, 384], sizes = [1, 128], strides = [1, 1]} : vector<8x896xf32> to vector<1x128xf32>
    %181 = arith.addf %179, %180 : vector<1x128xf32>
    %182 = vector.extract_strided_slice %172 {offsets = [4, 512], sizes = [1, 128], strides = [1, 1]} : vector<8x896xf32> to vector<1x128xf32>
    %183 = arith.addf %181, %182 : vector<1x128xf32>
    %184 = vector.extract_strided_slice %172 {offsets = [5, 640], sizes = [1, 128], strides = [1, 1]} : vector<8x896xf32> to vector<1x128xf32>
    %185 = arith.addf %183, %184 : vector<1x128xf32>
    %186 = vector.extract_strided_slice %172 {offsets = [6, 768], sizes = [1, 128], strides = [1, 1]} : vector<8x896xf32> to vector<1x128xf32>
    %187 = arith.addf %185, %186 : vector<1x128xf32>
    %cst_97 = arith.constant 0.000000e+00 : f32
    %188 = vector.broadcast %cst_97 : f32 to vector<1x128xf32>
    %189 = arith.maximumf %187, %188 : vector<1x128xf32>
    %c0_98 = arith.constant 0 : index
    %c0_99 = arith.constant 0 : index
    %190 = vector.load %arg8[%c0_98, %c0_99] : memref<128x128xf32, #tpu.memory_space<vmem>>, vector<128x128xf32>
    %cst_100 = arith.constant dense<0.000000e+00> : vector<1x128xf32>
    %191 = tpu.matmul %189, %190, %cst_100 {dimension_numbers = #tpu.dot_dimension_numbers<[1], [0], [0], [1], [0, 0, 1, 1], [], []>} : vector<1x128xf32>, vector<128x128xf32>, vector<1x128xf32> -> vector<1x128xf32>
    %c0_101 = arith.constant 0 : index
    %c0_102 = arith.constant 0 : index
    %192 = vector.load %arg9[%c0_101, %c0_102] : memref<1x128xf32, #tpu.memory_space<vmem>>, vector<1x128xf32>
    %193 = arith.addf %191, %192 : vector<1x128xf32>
    %c0_103 = arith.constant 0 : index
    %c0_104 = arith.constant 0 : index
    %c0_105 = arith.constant 0 : index
    %194 = vector.load %arg10[%c0_103, %c0_104, %c0_105] : memref<1x1x128xf32, #tpu.memory_space<vmem>>, vector<1x1x128xf32>
    %195 = vector.shape_cast %194 : vector<1x1x128xf32> to vector<1x128xf32>
    %196 = vector.shape_cast %193 : vector<1x128xf32> to vector<1x1x128xf32>
    tpu.vector_store %arg10[%c0_103, %c0_104, %c0_105], %196 {strides = array<i32>} : memref<1x1x128xf32, #tpu.memory_space<vmem>>, vector<1x1x128xf32>,
    return
  }
  func.func @transform_0(%arg0: i32) -> (i32, i32, i32) {
    %c0_i32 = arith.constant 0 : i32
    %c0_i32_0 = arith.constant 0 : i32
    %c0_i32_1 = arith.constant 0 : i32
    return %arg0, %c0_i32, %c0_i32_0 : i32, i32, i32
  }
  func.func @transform_1(%arg0: i32) -> (i32, i32) {
    %c0_i32 = arith.constant 0 : i32
    %c0_i32_0 = arith.constant 0 : i32
    %c0_i32_1 = arith.constant 0 : i32
    return %c0_i32, %c0_i32_0 : i32, i32
  }
  func.func @transform_2(%arg0: i32) -> (i32, i32) {
    %c0_i32 = arith.constant 0 : i32
    %c0_i32_0 = arith.constant 0 : i32
    %c0_i32_1 = arith.constant 0 : i32
    return %c0_i32, %c0_i32_0 : i32, i32
  }
  func.func @transform_3(%arg0: i32) -> (i32, i32, i32) {
    %c0_i32 = arith.constant 0 : i32
    %c0_i32_0 = arith.constant 0 : i32
    %c0_i32_1 = arith.constant 0 : i32
    %c0_i32_2 = arith.constant 0 : i32
    return %c0_i32, %c0_i32_0, %c0_i32_1 : i32, i32, i32
  }
  func.func @transform_4(%arg0: i32) -> (i32, i32) {
    %c0_i32 = arith.constant 0 : i32
    %c0_i32_0 = arith.constant 0 : i32
    %c0_i32_1 = arith.constant 0 : i32
    return %c0_i32, %c0_i32_0 : i32, i32
  }
  func.func @transform_5(%arg0: i32) -> (i32, i32) {
    %c0_i32 = arith.constant 0 : i32
    %c0_i32_0 = arith.constant 0 : i32
    %c0_i32_1 = arith.constant 0 : i32
    return %c0_i32, %c0_i32_0 : i32, i32
  }
  func.func @transform_6(%arg0: i32) -> (i32, i32) {
    %c0_i32 = arith.constant 0 : i32
    %c0_i32_0 = arith.constant 0 : i32
    %c0_i32_1 = arith.constant 0 : i32
    return %c0_i32, %c0_i32_0 : i32, i32
  }
  func.func @transform_7(%arg0: i32) -> (i32, i32) {
    %c0_i32 = arith.constant 0 : i32
    %c0_i32_0 = arith.constant 0 : i32
    %c0_i32_1 = arith.constant 0 : i32
    return %c0_i32, %c0_i32_0 : i32, i32
  }
  func.func @transform_8(%arg0: i32) -> (i32, i32) {
    %c0_i32 = arith.constant 0 : i32
    %c0_i32_0 = arith.constant 0 : i32
    %c0_i32_1 = arith.constant 0 : i32
    return %c0_i32, %c0_i32_0 : i32, i32
  }
  func.func @transform_9(%arg0: i32) -> (i32, i32, i32) {
    %c0_i32 = arith.constant 0 : i32
    %c0_i32_0 = arith.constant 0 : i32
    %c0_i32_1 = arith.constant 0 : i32
    return %arg0, %c0_i32, %c0_i32_0 : i32, i32, i32
  }
}

</mosaic_0001>

<bundles_post_ra>
// kernel: _lambda_.1
= control target key start
LH: loop header
LB: loop body
LE: loop exit
PB: predicated region body
PF: predicated region fallthrough
CT: control target
= control target key end

     0   :  { %14 = vsyncpa [#allocation7], 0  ;;  %s10204_s0 = inlined_call_operand.vmem [shape: bf16[2,784,16], index: 0, kind: input, shape index: {}]   ;;  %s10205_s1 = inlined_call_operand.vmem [shape: bf16[16,32], index: 1, kind: input, shape index: {}]   ;;  %s10206_s2 = inlined_call_operand.vmem [shape: f32[1,32], index: 2, kind: input, shape index: {}]   ;;  %s10207_s3 = inlined_call_operand.vmem [shape: bf16[9,32,64], index: 3, kind: input, shape index: {}]   ;;  %s10208_s4 = inlined_call_operand.vmem [shape: f32[1,64], index: 4, kind: input, shape index: {}]   ;;  %s10209_s5 = inlined_call_operand.vmem [shape: bf16[448,896], index: 5, kind: input, shape index: {}]   ;;  %s10210_s6 = inlined_call_operand.vmem [shape: f32[1,128], index: 6, kind: input, shape index: {}]   ;;  %s10211_s7 = inlined_call_operand.vmem [shape: f32[128,128], index: 7, kind: input, shape index: {}]   ;;  %s10212_s8 = inlined_call_operand.vmem [shape: f32[1,128], index: 8, kind: input, shape index: {}]   ;;  %s10213_s9 = inlined_call_operand.hbm [shape: f32[2,1,128], index: 9, kind: output, shape index: {}]  }
   0x1   :  { %16 = vsyncpa [#allocation7 + $0x1], 0  ;;  %s8418_s30 = smov 0   ;;  %s8420_s10 = smov 0  }
   0x2   :  { %s8422_s11 = smov 0   ;;  %s8424_s12 = smov 0  }
   0x3 LB: > { %s8439_s13 = sadd.s32 4294967295, %s8359_s12   ;;  %s6393_s14 = sadd.s32 4294967294, %s8359_s12   ;;  %s8359_s12 = sphi %s8424_s12, %s10219_s12   ;;  %s8355_s11 = sphi %s8422_s11, %s10218_s11   ;;  %s8351_s10 = sphi %s8420_s10, %s10217_s10   ;;  %s8347_s30 = sphi %s8418_s30, %s10216_s30  }
   0x4   : > { %s8443_s15 = sadd.s32 1, %s8359_s12   ;;  %s223_s16 = sadd.s32 1, %s8355_s11 }
   0x5   : > { %s220_s17 = ssub.s32 %s8359_s12, %s8443_s15  ;;  %p233_p0 = scmp.ne.s32.totalorder %s8355_s11, %s8351_s10 }
   0x6   : > { %p221_p1 = scmp.eq.s32.totalorder %s220_s17, 0  ;;  %p234_p2 = scmp.eq.s32.totalorder %s8439_s13, 1 }
   0x7   : > { %p239_p3 = scmp.ne.s32.totalorder %s8351_s10, %s8347_s30  ;;  %p240_p4 = scmp.eq.s32.totalorder %s6393_s14, 1 }
   0x8   : > { %s8454_s18 = scalar_select %p221_p1, %s8355_s11, %s223_s16  }
   0x9   : > { %p8456_p5 = por %p234_p2, %p233_p0  ;;  %p8460_p6 = por %p240_p4, %p239_p3 }
   0xa   : > { %p6396_p7 = scmp.ge.s32.totalorder %s8359_s12, 1  ;;  %p290_p8 = scmp.lt.s32.totalorder %s8359_s12, 3 }
   0xc   : > { %p291_p9 = pnand %p6396_p7, %p290_p8 }
   0xd   : > { %v7944_v0 = vld [vmem:[%s10205_s1] sm:$0xff] (!%p291_p9)   ;;  %v8361_v1 = vmov (!%p291_p9), 0.0   ;;  %p325_p10 = scmp.lt.s32.totalorder (!%p291_p9), %s8439_s13, 1  ;;  %vm689_vm0 = vcmask (!%p291_p9), 130048   ;;  %vm8362_vm1 = vmmov (!%p291_p9), 0   ;;  %vm1360_vm2 = vcmask (!%p291_p9), 261120  }
   0xe   : > { %294 = sbr.rel (%p291_p9) target bundleno = 2062 (0x80e), region = 56  ;;  %7121 = vmatprep.subr.bf16.mxu0 (!%p291_p9), %v8361_v1  ;;  %7123 = vmatprep.mubr.msk.bf16.mxu0 (!%p291_p9), %vm8362_vm1, %v8361_v1  ;;  %1459 = vst.msk [vmem:[#allocation3] sm:$0xff] (!%p291_p9), %vm1360_vm2, %v8361_v1  ;;  %1460 = vst.msk [vmem:[#allocation3 + $0x8] sm:$0xff] (!%p291_p9), %vm1360_vm2, %v8361_v1  ;;  %v7978_v19 = vld [vmem:[%s10207_s3 + $0x10] sm:$0xff] (!%p291_p9)   ;;  %v7979_v21 = vld [vmem:[%s10207_s3 + $0x18] sm:$0xff] (!%p291_p9)   ;;  %vm1739_vm3 = vcmask (!%p291_p9), 1041408  }
   0xf   : > { %7122 = vmatpush3.bf16.msra.mxu0 (!%p291_p9), %v7944_v0  ;;  %1461 = vst.msk [vmem:[#allocation3 + $0x10] sm:$0xff] (!%p291_p9), %vm1360_vm2, %v8361_v1  ;;  %1462 = vst.msk [vmem:[#allocation3 + $0x18] sm:$0xff] (!%p291_p9), %vm1360_vm2, %v8361_v1  ;;  %7319 = vmatprep.subr.bf16.mxu1 (!%p291_p9), %v7978_v19  ;;  %v8661_v34 = vld [vmem:[%s10206_s2] ss:$0 sm:$0xff] (!%p291_p9)  ;;  %vm1750_vm4 = vcmask (!%p291_p9), 259072   ;;  %vm1763_vm5 = vcmask (!%p291_p9), 261124  }
  0x10   : > { %1463 = vst.msk [vmem:[#allocation3 + $0x20] sm:$0xff] (!%p291_p9), %vm1360_vm2, %v8361_v1  ;;  %1464 = vst.msk [vmem:[#allocation3 + $0x28] sm:$0xff] (!%p291_p9), %vm1360_vm2, %v8361_v1  ;;  %7320 = vmatpush3.bf16.msra.mxu1 (!%p291_p9), %v7978_v19  ;;  %vm1766_vm6 = vcmask (!%p291_p9), 254976   ;;  %vm4408_vm7 = vcmask (!%p291_p9), 523264   ;;  %vm4508_vm8 = vcmask (!%p291_p9), 519168   ;;  %s8363_s22 = smov (!%p291_p9), 64  }
  0x11   : > { %1465 = vst.msk [vmem:[#allocation3 + $0x30] sm:$0xff] (!%p291_p9), %vm1360_vm2, %v8361_v1  ;;  %1466 = vst.msk [vmem:[#allocation3 + $0x38] sm:$0xff] (!%p291_p9), %vm1360_vm2, %v8361_v1  ;;  %7321 = vmatprep.subr.bf16.mxu1 (!%p291_p9), %v7979_v21  ;;  %vm4518_vm9 = vcmask (!%p291_p9), 1043968   ;;  %s323_s29 = sand.u32 (!%p291_p9), 1, %s8351_s10   ;;  %s6882_s17 = sshll.u32 (!%p291_p9), %s8439_s13, 4 }
  0x12   : > { %1467 = vst.msk [vmem:[#allocation3 + $0x40] sm:$0xff] (!%p291_p9), %vm1360_vm2, %v8361_v1  ;;  %1468 = vst.msk [vmem:[#allocation3 + $0x48] sm:$0xff] (!%p291_p9), %vm1360_vm2, %v8361_v1  ;;  %s324_s21 = scalar_lea.vmem (!%p291_p9), [#allocation6], %s323_s29  ;;  %s10162_s25 = scalar_lea.hbm (!%p291_p9), %s10213_s9, %s6882_s17 }
  0x13   : > { %1469 = vst.msk [vmem:[#allocation3 + $0x50] sm:$0xff] (!%p291_p9), %vm1360_vm2, %v8361_v1  ;;  %1470 = vst.msk [vmem:[#allocation3 + $0x58] sm:$0xff] (!%p291_p9), %vm1360_vm2, %v8361_v1  ;;  %s6326_s26 = scalar_lea.sflag (!%p291_p9), [#allocation7], %s323_s29 }
  0x14   : > { %1471 = vst.msk [vmem:[#allocation3 + $0x60] sm:$0xff] (!%p291_p9), %vm1360_vm2, %v8361_v1  ;;  %1472 = vst.msk [vmem:[#allocation3 + $0x68] sm:$0xff] (!%p291_p9), %vm1360_vm2, %v8361_v1  ;;  %7322 = vmatpush3.bf16.msra.mxu1 (!%p291_p9), %v7979_v21 }
  0x15   : > { %s326_s23 = scalar_select %p325_p10, %s8439_s13, 1  ;;  %1473 = vst.msk [vmem:[#allocation3 + $0x70] sm:$0xff] %vm1360_vm2, %v8361_v1  ;;  %1474 = vst.msk [vmem:[#allocation3 + $0x78] sm:$0xff] %vm1360_vm2, %v8361_v1  ;;  %v1982_v22 = vld [vmem:[#allocation3 + $0x1] sm:$0xff] }
  0x16   : > { %1475 = vst.msk [vmem:[#allocation3 + $0x80] sm:$0xff] %vm1360_vm2, %v8361_v1  ;;  %1476 = vst.msk [vmem:[#allocation3 + $0x88] sm:$0xff] %vm1360_vm2, %v8361_v1  ;;  %v1983_v23 = vld [vmem:[#allocation3 + $0x9] sm:$0xff]  ;;  %s8367_s13 = smov [#allocation6]  }
  0x17   : > { %s7898_s24 = smul.u32 392, %s326_s23  ;;  %1477 = vst.msk [vmem:[#allocation3 + $0x90] sm:$0xff] %vm1360_vm2, %v8361_v1  ;;  %1478 = vst.msk [vmem:[#allocation3 + $0x98] sm:$0xff] %vm1360_vm2, %v8361_v1  ;;  %v2010_v24 = vpack.c.bf16 %v1983_v23, %v1982_v22  ;;  %s6338_s23 = sshll.u32 %s324_s21, 4  ;;  %s10164_s23 = int_to_ptr.vmem [resolvable:$true] %s6338_s23 }
  0x18   : > { %1479 = vst.msk [vmem:[#allocation3 + $0xa0] sm:$0xff] %vm1360_vm2, %v8361_v1  ;;  %1480 = vst.msk [vmem:[#allocation3 + $0xa8] sm:$0xff] %vm1360_vm2, %v8361_v1  ;;  %s8301_s28 = sshll.u32 %s8367_s13, 4  ;;  %s8302_s28 = int_to_ptr.vmem [resolvable:$false] %s8301_s28 }
  0x19   : > { %s8477_s27 = scalar_lea.vmem %s10204_s0, %s7898_s24  ;;  %1481 = vst.msk [vmem:[#allocation3 + $0xb0] sm:$0xff] %vm1360_vm2, %v8361_v1  ;;  %1482 = vst.msk [vmem:[#allocation3 + $0xb8] sm:$0xff] %vm1360_vm2, %v8361_v1  ;;  %7323 = vmatprep.mubr.msk.bf16.mxu1 %vm1360_vm2, %v2010_v24  ;;  %s8303_s14 = scalar_lea.vmem %s8302_s28, 32 }
  0x1a   : > { %v7945_v2 = vld [vmem:[%s8477_s27] sm:$0xff]   ;;  %v7946_v3 = vld [vmem:[%s8477_s27 + $0x8] sm:$0xff]   ;;  %v7947_v4 = vld [vmem:[%s8477_s27 + $0x10] sm:$0xff]   ;;  %1483 = vst.msk [vmem:[#allocation3 + $0xc0] sm:$0xff] %vm1360_vm2, %v8361_v1  ;;  %p8304_p0 = scmp.lt.s32.totalorder %s10164_s23, %s8302_s28 }
  0x1b   : > { %7124 = vmatmul.mubr.msk.bf16.vlgmr.msra.gmra.mrb[0].mxu0 %vm689_vm0, %v7945_v2  ;;  %v7948_v5 = vld [vmem:[%s8477_s27 + $0x18] sm:$0xff]   ;;  %v7949_v6 = vld [vmem:[%s8477_s27 + $0x20] sm:$0xff]   ;;  %v7950_v7 = vld [vmem:[%s8477_s27 + $0x28] sm:$0xff]   ;;  %1484 = vst.msk [vmem:[#allocation3 + $0xc8] sm:$0xff] %vm1360_vm2, %v8361_v1 }
  0x1c   : > { %7127 = vmatprep.mubr.msk.bf16.mxu0 %vm8362_vm1, %v8361_v1  ;;  %v7951_v8 = vld [vmem:[%s8477_s27 + $0x30] sm:$0xff]   ;;  %v7952_v9 = vld [vmem:[%s8477_s27 + $0x38] sm:$0xff]   ;;  %v7953_v10 = vld [vmem:[%s8477_s27 + $0x40] sm:$0xff]   ;;  %1485 = vst.msk [vmem:[#allocation3 + $0xd0] sm:$0xff] %vm1360_vm2, %v8361_v1 }
  0x1d   : > { %v7954_v11 = vld [vmem:[%s8477_s27 + $0x48] sm:$0xff]   ;;  %v7955_v12 = vld [vmem:[%s8477_s27 + $0x50] sm:$0xff]   ;;  %v7956_v13 = vld [vmem:[%s8477_s27 + $0x58] sm:$0xff]   ;;  %1486 = vst.msk [vmem:[#allocation3 + $0xd8] sm:$0xff] %vm1360_vm2, %v8361_v1 }
  0x1e   : > { %1487 = vst.msk [vmem:[#allocation3 + $0xe0] sm:$0xff] %vm1360_vm2, %v8361_v1  ;;  %1488 = vst.msk [vmem:[#allocation3 + $0xe8] sm:$0xff] %vm1360_vm2, %v8361_v1  ;;  %v7957_v14 = vld [vmem:[%s8477_s27 + $0x60] sm:$0xff]   ;;  %v7958_v15 = vld [vmem:[%s8477_s27 + $0x68] sm:$0xff]  }
  0x1f   : > { %1489 = vst.msk [vmem:[#allocation3 + $0xf0] sm:$0xff] %vm1360_vm2, %v8361_v1  ;;  %1490 = vst.msk [vmem:[#allocation3 + $0xf8] sm:$0xff] %vm1360_vm2, %v8361_v1  ;;  %v7959_v16 = vld [vmem:[%s8477_s27 + $0x70] sm:$0xff]   ;;  %v7960_v17 = vld [vmem:[%s8477_s27 + $0x78] sm:$0xff]  }
  0x20   : > { %1491 = vst.msk [vmem:[#allocation3 + $0x100] sm:$0xff] %vm1360_vm2, %v8361_v1  ;;  %v7961_v18 = vld [vmem:[%s8477_s27 + $0x80] sm:$0xff]   ;;  %v7962_v20 = vld [vmem:[%s8477_s27 + $0x88] sm:$0xff]   ;;  %v7963_v25 = vld [vmem:[%s8477_s27 + $0x90] sm:$0xff]  }
  0x21   : > { %v7964_v26 = vld [vmem:[%s8477_s27 + $0x98] sm:$0xff]   ;;  %v7965_v27 = vld [vmem:[%s8477_s27 + $0xa0] sm:$0xff]   ;;  %v7966_v28 = vld [vmem:[%s8477_s27 + $0xa8] sm:$0xff]  }
  0x22   : > { %v7967_v29 = vld [vmem:[%s8477_s27 + $0xb0] sm:$0xff]   ;;  %v7968_v30 = vld [vmem:[%s8477_s27 + $0xb8] sm:$0xff]   ;;  %v7969_v31 = vld [vmem:[%s8477_s27 + $0xc0] sm:$0xff]  }
  0x23   : > { %7128 = vmatmul.mubr.msk.bf16.gmra.mrb[4].mxu0 %vm689_vm0, %v7946_v3  ;;  %v7970_v32 = vld [vmem:[%s8477_s27 + $0xc8] sm:$0xff]   ;;  %v7971_v33 = vld [vmem:[%s8477_s27 + $0xd0] sm:$0xff]   ;;  %v7972_v38 = vld [vmem:[%s8477_s27 + $0xd8] sm:$0xff]  }
  0x24   : > { %7131 = vmatprep.mubr.msk.bf16.mxu0 %vm8362_vm1, %v8361_v1  ;;  %v7973_v47 = vld [vmem:[%s8477_s27 + $0xe0] sm:$0xff]   ;;  %v7974_v56 = vld [vmem:[%s8477_s27 + $0xe8] sm:$0xff]   ;;  %v7975_v2 = vld [vmem:[%s8477_s27 + $0xf0] sm:$0xff]  }
  0x25   : > { %v7976_v21 = vld [vmem:[%s8477_s27 + $0xf8] sm:$0xff]  }
  0x2b   : > { %7132 = vmatmul.mubr.msk.bf16.gmra.mrb[8].mxu0 %vm689_vm0, %v7947_v4 }
  0x2c   : > { %7135 = vmatprep.mubr.msk.bf16.mxu0 %vm8362_vm1, %v8361_v1 }
  0x33   : > { %7136 = vmatmul.mubr.msk.bf16.gmra.mrb[12].mxu0 %vm689_vm0, %v7948_v5 }
  0x34   : > { %7139 = vmatprep.mubr.msk.bf16.mxu0 %vm8362_vm1, %v8361_v1 }
  0x3b   : > { %7140 = vmatmul.mubr.msk.bf16.gmra.mrb[16].mxu0 %vm689_vm0, %v7949_v6 }
  0x3c   : > { %7143 = vmatprep.mubr.msk.bf16.mxu0 %vm8362_vm1, %v8361_v1 }
  0x43   : > { %7144 = vmatmul.mubr.msk.bf16.gmra.mrb[20].mxu0 %vm689_vm0, %v7950_v7 }
  0x44   : > { %7147 = vmatprep.mubr.msk.bf16.mxu0 %vm8362_vm1, %v8361_v1 }
  0x4b   : > { %7148 = vmatmul.mubr.msk.bf16.gmra.mrb[24].mxu0 %vm689_vm0, %v7951_v8 }
  0x4c   : > { %7151 = vmatprep.mubr.msk.bf16.mxu0 %vm8362_vm1, %v8361_v1 }
  0x53   : > { %7152 = vmatmul.mubr.msk.bf16.gmra.mrb[28].mxu0 %vm689_vm0, %v7952_v9 }
  0x54   : > { %7155 = vmatprep.mubr.msk.bf16.mxu0 %vm8362_vm1, %v8361_v1 }
  0x5b   : > { %7156 = vmatmul.mubr.msk.bf16.gmra.mrb[32].mxu0 %vm689_vm0, %v7953_v10 }
  0x5c   : > { %7159 = vmatprep.mubr.msk.bf16.mxu0 %vm8362_vm1, %v8361_v1 }
  0x63   : > { %7160 = vmatmul.mubr.msk.bf16.gmra.mrb[36].mxu0 %vm689_vm0, %v7954_v11 }
  0x64   : > { %7163 = vmatprep.mubr.msk.bf16.mxu0 %vm8362_vm1, %v8361_v1 }
  0x6b   : > { %7164 = vmatmul.mubr.msk.bf16.gmra.mrb[40].mxu0 %vm689_vm0, %v7955_v12 }
  0x6c   : > { %7167 = vmatprep.mubr.msk.bf16.mxu0 %vm8362_vm1, %v8361_v1 }
  0x73   : > { %7168 = vmatmul.mubr.msk.bf16.gmra.mrb[44].mxu0 %vm689_vm0, %v7956_v13 }
  0x74   : > { %7171 = vmatprep.mubr.msk.bf16.mxu0 %vm8362_vm1, %v8361_v1 }
  0x7b   : > { %7172 = vmatmul.mubr.msk.bf16.gmra.mrb[48].mxu0 %vm689_vm0, %v7957_v14 }
  0x7c   : > { %7175 = vmatprep.mubr.msk.bf16.mxu0 %vm8362_vm1, %v8361_v1 }
  0x83   : > { %7176 = vmatmul.mubr.msk.bf16.gmra.mrb[52].mxu0 %vm689_vm0, %v7958_v15 }
  0x84   : > { %7179 = vmatprep.mubr.msk.bf16.mxu0 %vm8362_vm1, %v8361_v1 }
  0x8b   : > { %7180 = vmatmul.mubr.msk.bf16.gmra.mrb[56].mxu0 %vm689_vm0, %v7959_v16 }
  0x8c   : > { %7183 = vmatprep.mubr.msk.bf16.mxu0 %vm8362_vm1, %v8361_v1 }
  0x93   : > { %7184 = vmatmul.mubr.msk.bf16.gmra.mrb[60].mxu0 %vm689_vm0, %v7960_v17 }
  0x94   : > { %7187 = vmatprep.mubr.msk.bf16.mxu0 %vm8362_vm1, %v8361_v1 }
  0x9b   : > { %7188 = vmatmul.mubr.msk.bf16.gmra.mrb[64].mxu0 %vm689_vm0, %v7961_v18 }
  0x9c   : > { %7191 = vmatprep.mubr.msk.bf16.mxu0 %vm8362_vm1, %v8361_v1 }
  0xa3   : > { %7192 = vmatmul.mubr.msk.bf16.gmra.mrb[68].mxu0 %vm689_vm0, %v7962_v20 }
  0xa4   : > { %7195 = vmatprep.mubr.msk.bf16.mxu0 %vm8362_vm1, %v8361_v1 }
  0xab   : > { %7196 = vmatmul.mubr.msk.bf16.gmra.mrb[72].mxu0 %vm689_vm0, %v7963_v25 }
  0xac   : > { %7199 = vmatprep.mubr.msk.bf16.mxu0 %vm8362_vm1, %v8361_v1 }
  0xb3   : > { %7200 = vmatmul.mubr.msk.bf16.gmra.mrb[76].mxu0 %vm689_vm0, %v7964_v26 }
  0xb4   : > { %7203 = vmatprep.mubr.msk.bf16.mxu0 %vm8362_vm1, %v8361_v1 }
  0xbb   : > { %7204 = vmatmul.mubr.msk.bf16.gmra.mrb[80].mxu0 %vm689_vm0, %v7965_v27 }
  0xbc   : > { %7207 = vmatprep.mubr.msk.bf16.mxu0 %vm8362_vm1, %v8361_v1 }
  0xc3   : > { %7208 = vmatmul.mubr.msk.bf16.gmra.mrb[84].mxu0 %vm689_vm0, %v7966_v28 }
  0xc4   : > { %7211 = vmatprep.mubr.msk.bf16.mxu0 %vm8362_vm1, %v8361_v1 }
  0xcb   : > { %7212 = vmatmul.mubr.msk.bf16.gmra.mrb[88].mxu0 %vm689_vm0, %v7967_v29 }
  0xcc   : > { %7215 = vmatprep.mubr.msk.bf16.mxu0 %vm8362_vm1, %v8361_v1 }
  0xd3   : > { %7216 = vmatmul.mubr.msk.bf16.gmra.mrb[92].mxu0 %vm689_vm0, %v7968_v30 }
  0xd4   : > { %7219 = vmatprep.mubr.msk.bf16.mxu0 %vm8362_vm1, %v8361_v1 }
  0xdb   : > { %7220 = vmatmul.mubr.msk.bf16.gmra.mrb[96].mxu0 %vm689_vm0, %v7969_v31 }
  0xdc   : > { %7223 = vmatprep.mubr.msk.bf16.mxu0 %vm8362_vm1, %v8361_v1 }
  0xe3   : > { %7224 = vmatmul.mubr.msk.bf16.gmra.mrb[100].mxu0 %vm689_vm0, %v7970_v32 }
  0xe4   : > { %7227 = vmatprep.mubr.msk.bf16.mxu0 %vm8362_vm1, %v8361_v1 }
  0xeb   : > { %7228 = vmatmul.mubr.msk.bf16.gmra.mrb[104].mxu0 %vm689_vm0, %v7971_v33 }
  0xec   : > { %7231 = vmatprep.mubr.msk.bf16.mxu0 %vm8362_vm1, %v8361_v1 }
  0xee   : > { %v871_v35 = vpop.f32.mrb[0].mxu0 }
  0xef   : > { %v872_v36 = vadd.f32 %v8661_v34, %v871_v35  ;;  %v7125_v37 = vpop.f32.mrb[1].mxu0 }
  0xf0   : > { %v874_v39 = vpop.f32.mrb[2].mxu0 }
  0xf1   : > { %v1262_v40 = vmax.f32 %v872_v36, 0.0  ;;  %v875_v41 = vadd.f32 %v8661_v34, %v874_v39  ;;  %v7126_v42 = vpop.f32.mrb[3].mxu0 }
  0xf3   : > { %1361 = vst.msk [vmem:[#allocation2] sm:$0xff] %vm1360_vm2, %v1262_v40  ;;  %v1263_v43 = vmax.f32 %v875_v41, 0.0  ;;  %7232 = vmatmul.mubr.msk.bf16.gmra.mrb[108].mxu0 %vm689_vm0, %v7972_v38  ;;  %v7977_v38 = vld [vmem:[%s8477_s27 + $0x100] sm:$0xff]  }
  0xf4   : > { %7235 = vmatprep.mubr.msk.bf16.mxu0 %vm8362_vm1, %v8361_v1 }
  0xf5   : > { %1362 = vst.msk [vmem:[#allocation2 + $0x8] sm:$0xff] %vm1360_vm2, %v1263_v43 }
  0xf6   : > { %v879_v44 = vpop.f32.mrb[4].mxu0 }
  0xf7   : > { %v880_v45 = vadd.f32 %v8661_v34, %v879_v44  ;;  %v7129_v46 = vpop.f32.mrb[5].mxu0 }
  0xf8   : > { %v882_v48 = vpop.f32.mrb[6].mxu0 }
  0xf9   : > { %v1264_v49 = vmax.f32 %v880_v45, 0.0  ;;  %v883_v50 = vadd.f32 %v8661_v34, %v882_v48  ;;  %v7130_v51 = vpop.f32.mrb[7].mxu0 }
  0xfb   : > { %1363 = vst.msk [vmem:[#allocation2 + $0x10] sm:$0xff] %vm1360_vm2, %v1264_v49  ;;  %v1265_v52 = vmax.f32 %v883_v50, 0.0  ;;  %7236 = vmatmul.mubr.msk.bf16.gmra.mrb[112].mxu0 %vm689_vm0, %v7973_v47  ;;  %v7980_v49 = vld [vmem:[%s8477_s27 + $0x108] sm:$0xff]  }
  0xfc   : > { %7239 = vmatprep.mubr.msk.bf16.mxu0 %vm8362_vm1, %v8361_v1  ;;  %v1492_v13 = vld [vmem:[#allocation2] ss:$2 sm:$0xff]  ;;  %v1590_v14 = vld [vmem:[#allocation2 + $0x1] ss:$2 sm:$0xff] }
  0xfd   : > { %1364 = vst.msk [vmem:[#allocation2 + $0x18] sm:$0xff] %vm1360_vm2, %v1265_v52  ;;  %v1687_v22 = vmax.f32 %v1492_v13, %v1590_v14 }
  0xfe   : > { %v887_v53 = vpop.f32.mrb[8].mxu0 }
  0xff   : > { %v888_v54 = vadd.f32 %v8661_v34, %v887_v53  ;;  %v7133_v55 = vpop.f32.mrb[9].mxu0 }
 0x100   : > { %v890_v57 = vpop.f32.mrb[10].mxu0 }
 0x101   : > { %v1266_v58 = vmax.f32 %v888_v54, 0.0  ;;  %v891_v59 = vadd.f32 %v8661_v34, %v890_v57  ;;  %v7134_v60 = vpop.f32.mrb[11].mxu0 }
 0x103   : > { %1365 = vst.msk [vmem:[#allocation2 + $0x20] sm:$0xff] %vm1360_vm2, %v1266_v58  ;;  %v1267_v61 = vmax.f32 %v891_v59, 0.0  ;;  %7240 = vmatmul.mubr.msk.bf16.gmra.mrb[116].mxu0 %vm689_vm0, %v7974_v56 }
 0x104   : > { %7243 = vmatprep.mubr.msk.bf16.mxu0 %vm8362_vm1, %v8361_v1  ;;  %v1494_v3 = vld [vmem:[#allocation2 + $0x10] ss:$2 sm:$0xff]  ;;  %v1592_v4 = vld [vmem:[#allocation2 + $0x11] ss:$2 sm:$0xff] }
 0x105   : > { %1366 = vst.msk [vmem:[#allocation2 + $0x28] sm:$0xff] %vm1360_vm2, %v1267_v61  ;;  %v1688_v9 = vmax.f32 %v1494_v3, %v1592_v4 }
 0x106   : > { %v895_v62 = vpop.f32.mrb[12].mxu0 }
 0x107   : > { %v896_v63 = vadd.f32 %v8661_v34, %v895_v62  ;;  %v7137_v0 = vpop.f32.mrb[13].mxu0  ;;  %v1740_v17 = vrot.slane %v1688_v9, 6 }
 0x108   : > { %v898_v5 = vpop.f32.mrb[14].mxu0 }
 0x109   : > { %v1268_v6 = vmax.f32 %v896_v63, 0.0  ;;  %v899_v7 = vadd.f32 %v8661_v34, %v898_v5  ;;  %v7138_v8 = vpop.f32.mrb[15].mxu0 }
 0x10b   : > { %1367 = vst.msk [vmem:[#allocation2 + $0x30] sm:$0xff] %vm1360_vm2, %v1268_v6  ;;  %v1269_v10 = vmax.f32 %v899_v7, 0.0  ;;  %7244 = vmatmul.mubr.msk.bf16.gmra.mrb[120].mxu0 %vm689_vm0, %v7975_v2  ;;  %v7981_v2 = vld [vmem:[%s8477_s27 + $0x110] sm:$0xff]  }
 0x10c   : > { %v1496_v11 = vld [vmem:[#allocation2 + $0x20] ss:$2 sm:$0xff]  ;;  %v1594_v12 = vld [vmem:[#allocation2 + $0x21] ss:$2 sm:$0xff]  ;;  %7247 = vmatprep.mubr.msk.bf16.mxu0 %vm8362_vm1, %v8361_v1 }
 0x10d   : > { %v1689_v15 = vmax.f32 %v1496_v11, %v1594_v12  ;;  %1368 = vst.msk [vmem:[#allocation2 + $0x38] sm:$0xff] %vm1360_vm2, %v1269_v10 }
 0x10e   : > { %v903_v16 = vpop.f32.mrb[16].mxu0 }
 0x10f   : > { %v1741_v18 = vrot.slane %v1689_v15, 6  ;;  %v904_v19 = vadd.f32 %v8661_v34, %v903_v16  ;;  %v7141_v20 = vpop.f32.mrb[17].mxu0 }
 0x110   : > { %v906_v23 = vpop.f32.mrb[18].mxu0 }
 0x111   : > { %v1742_v24 = vsel %vm1739_vm3, %v1740_v17, %v1741_v18  ;;  %v1270_v25 = vmax.f32 %v904_v19, 0.0  ;;  %v907_v26 = vadd.f32 %v8661_v34, %v906_v23  ;;  %v7142_v27 = vpop.f32.mrb[19].mxu0 }
 0x112   : > { %v1747_v28 = vmax.f32 %v1687_v22, %v1742_v24 }
 0x113   : > { %1369 = vst.msk [vmem:[#allocation2 + $0x40] sm:$0xff] %vm1360_vm2, %v1270_v25  ;;  %v1271_v29 = vmax.f32 %v907_v26, 0.0  ;;  %7248 = vmatmul.mubr.msk.bf16.gmra.mrb[124].mxu0 %vm689_vm0, %v7976_v21 }
 0x114   : > { %1749 = vst.msk [vmem:[#allocation3 + $0x11] sm:$0xff] %vm1360_vm2, %v1747_v28  ;;  %v1498_v30 = vld [vmem:[#allocation2 + $0x30] ss:$2 sm:$0xff]  ;;  %v1596_v31 = vld [vmem:[#allocation2 + $0x31] ss:$2 sm:$0xff]  ;;  %7251 = vmatprep.mubr.msk.bf16.mxu0 %vm8362_vm1, %v8361_v1 }
 0x115   : > { %v1690_v32 = vmax.f32 %v1498_v30, %v1596_v31  ;;  %1370 = vst.msk [vmem:[#allocation2 + $0x48] sm:$0xff] %vm1360_vm2, %v1271_v29  ;;  %v7983_v31 = vld [vmem:[%s8477_s27 + $0x120] sm:$0xff]  }
 0x116   : > { %v911_v33 = vpop.f32.mrb[20].mxu0 }
 0x117   : > { %v1743_v35 = vrot.slane %v1690_v32, 6  ;;  %v912_v36 = vadd.f32 %v8661_v34, %v911_v33  ;;  %v7145_v37 = vpop.f32.mrb[21].mxu0 }
 0x118   : > { %v914_v39 = vpop.f32.mrb[22].mxu0 }
 0x119   : > { %v1744_v40 = vsel %vm1739_vm3, %v1741_v18, %v1743_v35  ;;  %v1272_v41 = vmax.f32 %v912_v36, 0.0  ;;  %v915_v42 = vadd.f32 %v8661_v34, %v914_v39  ;;  %v7146_v43 = vpop.f32.mrb[23].mxu0  ;;  %v7982_v18 = vld [vmem:[%s8477_s27 + $0x118] sm:$0xff]  }
 0x11a   : > { %v1748_v44 = vmax.f32 %v1688_v9, %v1744_v40 }
 0x11b   : > { %1371 = vst.msk [vmem:[#allocation2 + $0x50] sm:$0xff] %vm1360_vm2, %v1272_v41  ;;  %v1273_v45 = vmax.f32 %v915_v42, 0.0  ;;  %7252 = vmatmul.mubr.msk.bf16.gmra.mrb[128].mxu0 %vm689_vm0, %v7977_v38  ;;  %v1984_v55 = vld [vmem:[#allocation3 + $0x11] sm:$0xff] }
 0x11c   : > { %7255 = vmatprep.mubr.msk.bf16.mxu0 %vm8362_vm1, %v8361_v1  ;;  %1751 = vst.msk [vmem:[#allocation3 + $0x19] sm:$0x3f] %vm1750_vm4, %v1748_v44  ;;  %v1500_v11 = vld [vmem:[#allocation2 + $0x40] ss:$2 sm:$0xff]  ;;  %v1598_v12 = vld [vmem:[#allocation2 + $0x41] ss:$2 sm:$0xff] }
 0x11d   : > { %1372 = vst.msk [vmem:[#allocation2 + $0x58] sm:$0xff] %vm1360_vm2, %v1273_v45  ;;  %v1691_v19 = vmax.f32 %v1500_v11, %v1598_v12  ;;  %v7984_v44 = vld [vmem:[%s8477_s27 + $0x128] sm:$0xff]  }
 0x11e   : > { %v919_v46 = vpop.f32.mrb[24].mxu0 }
 0x11f   : > { %v920_v47 = vadd.f32 %v8661_v34, %v919_v46  ;;  %v7149_v48 = vpop.f32.mrb[25].mxu0 }
 0x120   : > { %v922_v50 = vpop.f32.mrb[26].mxu0 }
 0x121   : > { %v1274_v51 = vmax.f32 %v920_v47, 0.0  ;;  %v923_v52 = vadd.f32 %v8661_v34, %v922_v50  ;;  %v7150_v53 = vpop.f32.mrb[27].mxu0 }
 0x123   : > { %1373 = vst.msk [vmem:[#allocation2 + $0x60] sm:$0xff] %vm1360_vm2, %v1274_v51  ;;  %v1275_v54 = vmax.f32 %v923_v52, 0.0  ;;  %7256 = vmatmul.mubr.msk.bf16.gmra.mrb[132].mxu0 %vm689_vm0, %v7980_v49  ;;  %v1985_v56 = vld [vmem:[#allocation3 + $0x19] sm:$0xff] }
 0x124   : > { %v1502_v57 = vld [vmem:[#allocation2 + $0x50] ss:$2 sm:$0xff]  ;;  %v1600_v58 = vld [vmem:[#allocation2 + $0x51] ss:$2 sm:$0xff]  ;;  %v2011_v59 = vpack.c.bf16 %v1985_v56, %v1984_v55  ;;  %7259 = vmatprep.mubr.msk.bf16.mxu0 %vm8362_vm1, %v8361_v1 }
 0x125   : > { %v1692_v60 = vmax.f32 %v1502_v57, %v1600_v58  ;;  %1374 = vst.msk [vmem:[#allocation2 + $0x68] sm:$0xff] %vm1360_vm2, %v1275_v54 }
 0x126   : > { %v927_v61 = vpop.f32.mrb[28].mxu0  ;;  %7324 = vmatmul.mubr.msk.bf16.vlgmr.msra.gmra.mrb[0].mxu1 %vm1360_vm2, %v2011_v59 }
 0x127   : > { %v1754_v62 = vrot.slane %v1692_v60, 6  ;;  %v928_v63 = vadd.f32 %v8661_v34, %v927_v61  ;;  %v7153_v0 = vpop.f32.mrb[29].mxu0 }
 0x128   : > { %v930_v3 = vpop.f32.mrb[30].mxu0 }
 0x129   : > { %v1760_v4 = vmax.f32 %v1690_v32, %v1754_v62  ;;  %v1276_v5 = vmax.f32 %v928_v63, 0.0  ;;  %v931_v6 = vadd.f32 %v8661_v34, %v930_v3  ;;  %v7154_v7 = vpop.f32.mrb[31].mxu0  ;;  %v7985_v63 = vld [vmem:[%s8477_s27 + $0x130] sm:$0xff]  }
 0x12b   : > { %1375 = vst.msk [vmem:[#allocation2 + $0x70] sm:$0xff] %vm1360_vm2, %v1276_v5  ;;  %v1277_v8 = vmax.f32 %v931_v6, 0.0  ;;  %7260 = vmatmul.mubr.msk.bf16.gmra.mrb[136].mxu0 %vm689_vm0, %v7981_v2 }
 0x12c   : > { %1764 = vst.msk [vmem:[#allocation3 + $0x1d] sm:$0xf0] %vm1763_vm5, %v1760_v4  ;;  %v1504_v9 = vld [vmem:[#allocation2 + $0x60] ss:$2 sm:$0xff]  ;;  %v1602_v10 = vld [vmem:[#allocation2 + $0x61] ss:$2 sm:$0xff]  ;;  %7263 = vmatprep.mubr.msk.bf16.mxu0 %vm8362_vm1, %v8361_v1 }
 0x12d   : > { %v1693_v13 = vmax.f32 %v1504_v9, %v1602_v10  ;;  %1376 = vst.msk [vmem:[#allocation2 + $0x78] sm:$0xff] %vm1360_vm2, %v1277_v8 }
 0x12e   : > { %v935_v14 = vpop.f32.mrb[32].mxu0 }
 0x12f   : > { %v1755_v15 = vrot.slane %v1693_v13, 6  ;;  %v936_v16 = vadd.f32 %v8661_v34, %v935_v14  ;;  %v7157_v17 = vpop.f32.mrb[33].mxu0 }
 0x130   : > { %v938_v20 = vpop.f32.mrb[34].mxu0 }
 0x131   : > { %v1756_v21 = vsel %vm1739_vm3, %v1754_v62, %v1755_v15  ;;  %v1762_v22 = vmax.f32 %v1692_v60, %v1755_v15  ;;  %v1278_v23 = vmax.f32 %v936_v16, 0.0  ;;  %v939_v24 = vadd.f32 %v8661_v34, %v938_v20  ;;  %v7158_v25 = vpop.f32.mrb[35].mxu0  ;;  %v7986_v16 = vld [vmem:[%s8477_s27 + $0x138] sm:$0xff]  }
 0x132   : > { %v1761_v26 = vmax.f32 %v1691_v19, %v1756_v21 }
 0x133   : > { %1377 = vst.msk [vmem:[#allocation2 + $0x80] sm:$0xff] %vm1360_vm2, %v1278_v23  ;;  %v1279_v27 = vmax.f32 %v939_v24, 0.0  ;;  %7264 = vmatmul.mubr.msk.bf16.gmra.mrb[140].mxu0 %vm689_vm0, %v7982_v18 }
 0x134   : > { %1767 = vst.msk [vmem:[#allocation3 + $0x2d] sm:$0x3] %vm1766_vm6, %v1762_v22  ;;  %7267 = vmatprep.mubr.msk.bf16.mxu0 %vm8362_vm1, %v8361_v1  ;;  %v1506_v55 = vld [vmem:[#allocation2 + $0x70] ss:$2 sm:$0xff]  ;;  %v1604_v56 = vld [vmem:[#allocation2 + $0x71] ss:$2 sm:$0xff] }
 0x135   : > { %1765 = vst.msk [vmem:[#allocation3 + $0x25] sm:$0xff] %vm1360_vm2, %v1761_v26  ;;  %1378 = vst.msk [vmem:[#allocation2 + $0x88] sm:$0xff] %vm1360_vm2, %v1279_v27  ;;  %v1694_v0 = vmax.f32 %v1506_v55, %v1604_v56  ;;  %v7987_v27 = vld [vmem:[%s8477_s27 + $0x140] sm:$0xff]  }
 0x136   : > { %v943_v28 = vpop.f32.mrb[36].mxu0 }
 0x137   : > { %v944_v29 = vadd.f32 %v8661_v34, %v943_v28  ;;  %v7161_v30 = vpop.f32.mrb[37].mxu0 }
 0x138   : > { %v946_v32 = vpop.f32.mrb[38].mxu0 }
 0x139   : > { %v1280_v33 = vmax.f32 %v944_v29, 0.0  ;;  %v947_v35 = vadd.f32 %v8661_v34, %v946_v32  ;;  %v7162_v36 = vpop.f32.mrb[39].mxu0 }
 0x13b   : > { %1379 = vst.msk [vmem:[#allocation2 + $0x90] sm:$0xff] %vm1360_vm2, %v1280_v33  ;;  %v1281_v37 = vmax.f32 %v947_v35, 0.0  ;;  %7268 = vmatmul.mubr.msk.bf16.gmra.mrb[144].mxu0 %vm689_vm0, %v7983_v31 }
 0x13c   : > { %v1986_v38 = vld [vmem:[#allocation3 + $0x21] sm:$0xff]  ;;  %v1987_v39 = vld [vmem:[#allocation3 + $0x29] sm:$0xff]  ;;  %7271 = vmatprep.mubr.msk.bf16.mxu0 %vm8362_vm1, %v8361_v1  ;;  %v1606_v46 = vld [vmem:[#allocation2 + $0x81] ss:$2 sm:$0xff] }
 0x13d   : > { %v2012_v40 = vpack.c.bf16 %v1987_v39, %v1986_v38  ;;  %1380 = vst.msk [vmem:[#allocation2 + $0x98] sm:$0xff] %vm1360_vm2, %v1281_v37  ;;  %v1508_v45 = vld [vmem:[#allocation2 + $0x80] ss:$2 sm:$0xff] }
 0x13e   : > { %v951_v41 = vpop.f32.mrb[40].mxu0  ;;  %v1695_v51 = vmax.f32 %v1508_v45, %v1606_v46 }
 0x13f   : > { %7327 = vmatprep.mubr.msk.bf16.mxu1 %vm1360_vm2, %v2012_v40  ;;  %v952_v42 = vadd.f32 %v8661_v34, %v951_v41  ;;  %v7165_v43 = vpop.f32.mrb[41].mxu0 }
 0x140   : > { %v954_v47 = vpop.f32.mrb[42].mxu0  ;;  %v1771_v59 = vrot.slane %v1695_v51, 6 }
 0x141   : > { %v1282_v48 = vmax.f32 %v952_v42, 0.0  ;;  %v955_v49 = vadd.f32 %v8661_v34, %v954_v47  ;;  %v7166_v50 = vpop.f32.mrb[43].mxu0 }
 0x143   : > { %1381 = vst.msk [vmem:[#allocation2 + $0xa0] sm:$0xff] %vm1360_vm2, %v1282_v48  ;;  %v1283_v52 = vmax.f32 %v955_v49, 0.0  ;;  %7272 = vmatmul.mubr.msk.bf16.gmra.mrb[148].mxu0 %vm689_vm0, %v7984_v44  ;;  %v7988_v44 = vld [vmem:[%s8477_s27 + $0x148] sm:$0xff]  }
 0x144   : > { %v1510_v53 = vld [vmem:[#allocation2 + $0x90] ss:$2 sm:$0xff]  ;;  %v1608_v54 = vld [vmem:[#allocation2 + $0x91] ss:$2 sm:$0xff]  ;;  %7275 = vmatprep.mubr.msk.bf16.mxu0 %vm8362_vm1, %v8361_v1 }
 0x145   : > { %v1696_v57 = vmax.f32 %v1510_v53, %v1608_v54  ;;  %1382 = vst.msk [vmem:[#allocation2 + $0xa8] sm:$0xff] %vm1360_vm2, %v1283_v52 }
 0x146   : > { %v959_v58 = vpop.f32.mrb[44].mxu0 }
 0x147   : > { %v1772_v60 = vrot.slane %v1696_v57, 6  ;;  %v960_v61 = vadd.f32 %v8661_v34, %v959_v58  ;;  %v7169_v62 = vpop.f32.mrb[45].mxu0 }
 0x148   : > { %v962_v2 = vpop.f32.mrb[46].mxu0 }
 0x149   : > { %v1773_v3 = vsel %vm1739_vm3, %v1771_v59, %v1772_v60  ;;  %v1284_v4 = vmax.f32 %v960_v61, 0.0  ;;  %v963_v5 = vadd.f32 %v8661_v34, %v962_v2  ;;  %v7170_v6 = vpop.f32.mrb[47].mxu0 }
 0x14a   : > { %v1778_v7 = vmax.f32 %v1694_v0, %v1773_v3 }
 0x14b   : > { %1383 = vst.msk [vmem:[#allocation2 + $0xb0] sm:$0xff] %vm1360_vm2, %v1284_v4  ;;  %v1285_v8 = vmax.f32 %v963_v5, 0.0  ;;  %7276 = vmatmul.mubr.msk.bf16.gmra.mrb[152].mxu0 %vm689_vm0, %v7985_v63 }
 0x14c   : > { %1780 = vst.msk [vmem:[#allocation3 + $0x31] sm:$0xff] %vm1360_vm2, %v1778_v7  ;;  %v1512_v9 = vld [vmem:[#allocation2 + $0xa0] ss:$2 sm:$0xff]  ;;  %v1610_v10 = vld [vmem:[#allocation2 + $0xa1] ss:$2 sm:$0xff]  ;;  %7279 = vmatprep.mubr.msk.bf16.mxu0 %vm8362_vm1, %v8361_v1 }
 0x14d   : > { %v1697_v11 = vmax.f32 %v1512_v9, %v1610_v10  ;;  %1384 = vst.msk [vmem:[#allocation2 + $0xb8] sm:$0xff] %vm1360_vm2, %v1285_v8  ;;  %v7990_v10 = vld [vmem:[%s8477_s27 + $0x158] sm:$0xff]  }
 0x14e   : > { %v967_v12 = vpop.f32.mrb[48].mxu0 }
 0x14f   : > { %v1774_v13 = vrot.slane %v1697_v11, 6  ;;  %v968_v14 = vadd.f32 %v8661_v34, %v967_v12  ;;  %v7173_v15 = vpop.f32.mrb[49].mxu0 }
 0x150   : > { %v970_v17 = vpop.f32.mrb[50].mxu0 }
 0x151   : > { %v1775_v18 = vsel %vm1739_vm3, %v1772_v60, %v1774_v13  ;;  %v1286_v19 = vmax.f32 %v968_v14, 0.0  ;;  %v971_v20 = vadd.f32 %v8661_v34, %v970_v17  ;;  %v7174_v21 = vpop.f32.mrb[51].mxu0  ;;  %v7989_v60 = vld [vmem:[%s8477_s27 + $0x150] sm:$0xff]  }
 0x152   : > { %v1779_v22 = vmax.f32 %v1695_v51, %v1775_v18 }
 0x153   : > { %1385 = vst.msk [vmem:[#allocation2 + $0xc0] sm:$0xff] %vm1360_vm2, %v1286_v19  ;;  %v1287_v23 = vmax.f32 %v971_v20, 0.0  ;;  %7280 = vmatmul.mubr.msk.bf16.gmra.mrb[156].mxu0 %vm689_vm0, %v7986_v16  ;;  %v1988_v33 = vld [vmem:[#allocation3 + $0x31] sm:$0xff] }
 0x154   : > { %1781 = vst.msk [vmem:[#allocation3 + $0x39] sm:$0x3f] %vm1750_vm4, %v1779_v22  ;;  %7283 = vmatprep.mubr.msk.bf16.mxu0 %vm8362_vm1, %v8361_v1  ;;  %v1514_v53 = vld [vmem:[#allocation2 + $0xb0] ss:$2 sm:$0xff]  ;;  %v1612_v54 = vld [vmem:[#allocation2 + $0xb1] ss:$2 sm:$0xff] }
 0x155   : > { %1386 = vst.msk [vmem:[#allocation2 + $0xc8] sm:$0xff] %vm1360_vm2, %v1287_v23  ;;  %v1698_v61 = vmax.f32 %v1514_v53, %v1612_v54  ;;  %v7991_v22 = vld [vmem:[%s8477_s27 + $0x160] sm:$0xff]  }
 0x156   : > { %v975_v24 = vpop.f32.mrb[52].mxu0 }
 0x157   : > { %v976_v25 = vadd.f32 %v8661_v34, %v975_v24  ;;  %v7177_v26 = vpop.f32.mrb[53].mxu0 }
 0x158   : > { %v978_v28 = vpop.f32.mrb[54].mxu0 }
 0x159   : > { %v1288_v29 = vmax.f32 %v976_v25, 0.0  ;;  %v979_v30 = vadd.f32 %v8661_v34, %v978_v28  ;;  %v7178_v31 = vpop.f32.mrb[55].mxu0 }
 0x15b   : > { %1387 = vst.msk [vmem:[#allocation2 + $0xd0] sm:$0xff] %vm1360_vm2, %v1288_v29  ;;  %v1289_v32 = vmax.f32 %v979_v30, 0.0  ;;  %7284 = vmatmul.mubr.msk.bf16.gmra.mrb[160].mxu0 %vm689_vm0, %v7987_v27  ;;  %v1989_v35 = vld [vmem:[#allocation3 + $0x39] sm:$0xff] }
 0x15c   : > { %v1516_v36 = vld [vmem:[#allocation2 + $0xc0] ss:$2 sm:$0xff]  ;;  %v1614_v37 = vld [vmem:[#allocation2 + $0xc1] ss:$2 sm:$0xff]  ;;  %v2013_v38 = vpack.c.bf16 %v1989_v35, %v1988_v33  ;;  %7287 = vmatprep.mubr.msk.bf16.mxu0 %vm8362_vm1, %v8361_v1 }
 0x15d   : > { %v1699_v39 = vmax.f32 %v1516_v36, %v1614_v37  ;;  %1388 = vst.msk [vmem:[#allocation2 + $0xd8] sm:$0xff] %vm1360_vm2, %v1289_v32 }
 0x15e   : > { %v983_v40 = vpop.f32.mrb[56].mxu0  ;;  %7328 = vmatmul.mubr.msk.bf16.gmra.mrb[4].mxu1 %vm1360_vm2, %v2013_v38 }
 0x15f   : > { %v1784_v41 = vrot.slane %v1699_v39, 6  ;;  %v984_v42 = vadd.f32 %v8661_v34, %v983_v40  ;;  %v7181_v43 = vpop.f32.mrb[57].mxu0 }
 0x160   : > { %v986_v45 = vpop.f32.mrb[58].mxu0 }
 0x161   : > { %v1790_v46 = vmax.f32 %v1697_v11, %v1784_v41  ;;  %v1290_v47 = vmax.f32 %v984_v42, 0.0  ;;  %v987_v48 = vadd.f32 %v8661_v34, %v986_v45  ;;  %v7182_v49 = vpop.f32.mrb[59].mxu0  ;;  %v7992_v42 = vld [vmem:[%s8477_s27 + $0x168] sm:$0xff]  }
 0x163   : > { %1793 = vst.msk [vmem:[#allocation3 + $0x3d] sm:$0xf0] %vm1763_vm5, %v1790_v46  ;;  %v1291_v50 = vmax.f32 %v987_v48, 0.0  ;;  %7288 = vmatmul.mubr.msk.bf16.gmra.mrb[164].mxu0 %vm689_vm0, %v7988_v44 }
 0x164   : > { %1389 = vst.msk [vmem:[#allocation2 + $0xe0] sm:$0xff] %vm1360_vm2, %v1290_v47  ;;  %v1518_v51 = vld [vmem:[#allocation2 + $0xd0] ss:$2 sm:$0xff]  ;;  %v1616_v52 = vld [vmem:[#allocation2 + $0xd1] ss:$2 sm:$0xff]  ;;  %7291 = vmatprep.mubr.msk.bf16.mxu0 %vm8362_vm1, %v8361_v1 }
 0x165   : > { %v1700_v55 = vmax.f32 %v1518_v51, %v1616_v52  ;;  %1390 = vst.msk [vmem:[#allocation2 + $0xe8] sm:$0xff] %vm1360_vm2, %v1291_v50 }
 0x166   : > { %v991_v56 = vpop.f32.mrb[60].mxu0 }
 0x167   : > { %v1785_v57 = vrot.slane %v1700_v55, 6  ;;  %v992_v58 = vadd.f32 %v8661_v34, %v991_v56  ;;  %v7185_v59 = vpop.f32.mrb[61].mxu0 }
 0x168   : > { %v994_v62 = vpop.f32.mrb[62].mxu0 }
 0x169   : > { %v1786_v63 = vsel %vm1739_vm3, %v1784_v41, %v1785_v57  ;;  %v1792_v0 = vmax.f32 %v1699_v39, %v1785_v57  ;;  %v1292_v2 = vmax.f32 %v992_v58, 0.0  ;;  %v995_v3 = vadd.f32 %v8661_v34, %v994_v62  ;;  %v7186_v4 = vpop.f32.mrb[63].mxu0  ;;  %v7993_v58 = vld [vmem:[%s8477_s27 + $0x170] sm:$0xff]  }
 0x16a   : > { %v1791_v5 = vmax.f32 %v1698_v61, %v1786_v63 }
 0x16b   : > { %1795 = vst.msk [vmem:[#allocation3 + $0x4d] sm:$0x3] %vm1766_vm6, %v1792_v0  ;;  %v1293_v6 = vmax.f32 %v995_v3, 0.0  ;;  %7292 = vmatmul.mubr.msk.bf16.gmra.mrb[168].mxu0 %vm689_vm0, %v7989_v60 }
 0x16c   : > { %1391 = vst.msk [vmem:[#allocation2 + $0xf0] sm:$0xff] %vm1360_vm2, %v1292_v2  ;;  %1794 = vst.msk [vmem:[#allocation3 + $0x45] sm:$0xff] %vm1360_vm2, %v1791_v5  ;;  %7295 = vmatprep.mubr.msk.bf16.mxu0 %vm8362_vm1, %v8361_v1  ;;  %v1520_v33 = vld [vmem:[#allocation2 + $0xe0] ss:$2 sm:$0xff]  ;;  %v1618_v35 = vld [vmem:[#allocation2 + $0xe1] ss:$2 sm:$0xff] }
 0x16d   : > { %1392 = vst.msk [vmem:[#allocation2 + $0xf8] sm:$0xff] %vm1360_vm2, %v1293_v6  ;;  %v1701_v43 = vmax.f32 %v1520_v33, %v1618_v35  ;;  %v7994_v6 = vld [vmem:[%s8477_s27 + $0x178] sm:$0xff]  }
 0x16e   : > { %v999_v7 = vpop.f32.mrb[64].mxu0 }
 0x16f   : > { %v1000_v8 = vadd.f32 %v8661_v34, %v999_v7  ;;  %v7189_v9 = vpop.f32.mrb[65].mxu0 }
 0x170   : > { %v1002_v11 = vpop.f32.mrb[66].mxu0 }
 0x171   : > { %v1294_v12 = vmax.f32 %v1000_v8, 0.0  ;;  %v1003_v13 = vadd.f32 %v8661_v34, %v1002_v11  ;;  %v7190_v14 = vpop.f32.mrb[67].mxu0 }
 0x173   : > { %1393 = vst.msk [vmem:[#allocation2 + $0x100] sm:$0xff] %vm1360_vm2, %v1294_v12  ;;  %v1295_v15 = vmax.f32 %v1003_v13, 0.0  ;;  %7296 = vmatmul.mubr.msk.bf16.gmra.mrb[172].mxu0 %vm689_vm0, %v7990_v10  ;;  %v1990_v16 = vld [vmem:[#allocation3 + $0x41] sm:$0xff]  ;;  %v1991_v17 = vld [vmem:[#allocation3 + $0x49] sm:$0xff] }
 0x174   : > { %v2014_v18 = vpack.c.bf16 %v1991_v17, %v1990_v16  ;;  %7299 = vmatprep.mubr.msk.bf16.mxu0 %vm8362_vm1, %v8361_v1  ;;  %v1522_v23 = vld [vmem:[#allocation2 + $0xf0] ss:$2 sm:$0xff]  ;;  %v1620_v24 = vld [vmem:[#allocation2 + $0xf1] ss:$2 sm:$0xff] }
 0x175   : > { %1394 = vst.msk [vmem:[#allocation2 + $0x108] sm:$0xff] %vm1360_vm2, %v1295_v15  ;;  %v1702_v29 = vmax.f32 %v1522_v23, %v1620_v24 }
 0x176   : > { %v1007_v19 = vpop.f32.mrb[68].mxu0  ;;  %7331 = vmatprep.mubr.msk.bf16.mxu1 %vm1360_vm2, %v2014_v18 }
 0x177   : > { %v1008_v20 = vadd.f32 %v8661_v34, %v1007_v19  ;;  %v7193_v21 = vpop.f32.mrb[69].mxu0  ;;  %v1799_v38 = vrot.slane %v1702_v29, 6 }
 0x178   : > { %v1010_v25 = vpop.f32.mrb[70].mxu0 }
 0x179   : > { %v1296_v26 = vmax.f32 %v1008_v20, 0.0  ;;  %v1011_v27 = vadd.f32 %v8661_v34, %v1010_v25  ;;  %v7194_v28 = vpop.f32.mrb[71].mxu0 }
 0x17b   : > { %1395 = vst.msk [vmem:[#allocation2 + $0x110] sm:$0xff] %vm1360_vm2, %v1296_v26  ;;  %v1297_v30 = vmax.f32 %v1011_v27, 0.0  ;;  %7300 = vmatmul.mubr.msk.bf16.gmra.mrb[176].mxu0 %vm689_vm0, %v7991_v22  ;;  %v7995_v22 = vld [vmem:[%s8477_s27 + $0x180] sm:$0xff]   ;;  %s8297_s27 = scalar_lea.vmem %s10164_s23, 16 }
 0x17c   : > { %v1524_v31 = vld [vmem:[#allocation2 + $0x100] ss:$2 sm:$0xff]  ;;  %v1622_v32 = vld [vmem:[#allocation2 + $0x101] ss:$2 sm:$0xff]  ;;  %7303 = vmatprep.mubr.msk.bf16.mxu0 %vm8362_vm1, %v8361_v1  ;;  %p8298_p11 = scmp.ne.s32.totalorder %s10164_s23, %s8297_s27  ;;  %p8305_p1 = scmp.lt.s32.totalorder %s8303_s14, %s8297_s27 }
 0x17d   : > { %v1703_v36 = vmax.f32 %v1524_v31, %v1622_v32  ;;  %1396 = vst.msk [vmem:[#allocation2 + $0x118] sm:$0xff] %vm1360_vm2, %v1297_v30 }
 0x17e   : > { %v1015_v37 = vpop.f32.mrb[72].mxu0  ;;  %p8299_p12 = pnand %p8298_p11, %p8456_p5  ;;  %p8306_p2 = por %p8305_p1, %p8304_p0 }
 0x17f   : > { %v1800_v39 = vrot.slane %v1703_v36, 6  ;;  %v1016_v40 = vadd.f32 %v8661_v34, %v1015_v37  ;;  %v7197_v41 = vpop.f32.mrb[73].mxu0 }
 0x180   : > { %v1018_v44 = vpop.f32.mrb[74].mxu0  ;;  %p8300_p13 = pneg %p8299_p12 }
 0x181   : > { %v1801_v45 = vsel %vm1739_vm3, %v1799_v38, %v1800_v39  ;;  %v1298_v46 = vmax.f32 %v1016_v40, 0.0  ;;  %v1019_v47 = vadd.f32 %v8661_v34, %v1018_v44  ;;  %v7198_v48 = vpop.f32.mrb[75].mxu0 }
 0x182   : > { %v1806_v49 = vmax.f32 %v1701_v43, %v1801_v45  ;;  %p8307_p3 = pnand %p8306_p2, %p8300_p13 }
 0x183   : > { %1397 = vst.msk [vmem:[#allocation2 + $0x120] sm:$0xff] %vm1360_vm2, %v1298_v46  ;;  %v1299_v50 = vmax.f32 %v1019_v47, 0.0  ;;  %7304 = vmatmul.mubr.msk.bf16.gmra.mrb[180].mxu0 %vm689_vm0, %v7992_v42 }
 0x184   : > { %1808 = vst.msk [vmem:[#allocation3 + $0x51] sm:$0xff] %vm1360_vm2, %v1806_v49  ;;  %v1526_v51 = vld [vmem:[#allocation2 + $0x110] ss:$2 sm:$0xff]  ;;  %v1624_v52 = vld [vmem:[#allocation2 + $0x111] ss:$2 sm:$0xff]  ;;  %7307 = vmatprep.mubr.msk.bf16.mxu0 %vm8362_vm1, %v8361_v1 }
 0x185   : > { %v1704_v53 = vmax.f32 %v1526_v51, %v1624_v52  ;;  %1398 = vst.msk [vmem:[#allocation2 + $0x128] sm:$0xff] %vm1360_vm2, %v1299_v50 }
 0x186   : > { %v1023_v54 = vpop.f32.mrb[76].mxu0 }
 0x187   : > { %v1802_v55 = vrot.slane %v1704_v53, 6  ;;  %v1024_v56 = vadd.f32 %v8661_v34, %v1023_v54  ;;  %v7201_v57 = vpop.f32.mrb[77].mxu0 }
 0x188   : > { %v1026_v59 = vpop.f32.mrb[78].mxu0 }
 0x189   : > { %v1803_v60 = vsel %vm1739_vm3, %v1800_v39, %v1802_v55  ;;  %v1300_v61 = vmax.f32 %v1024_v56, 0.0  ;;  %v1027_v62 = vadd.f32 %v8661_v34, %v1026_v59  ;;  %v7202_v63 = vpop.f32.mrb[79].mxu0 }
 0x18a   : > { %v1807_v0 = vmax.f32 %v1702_v29, %v1803_v60 }
 0x18b   : > { %1399 = vst.msk [vmem:[#allocation2 + $0x130] sm:$0xff] %vm1360_vm2, %v1300_v61  ;;  %v1301_v2 = vmax.f32 %v1027_v62, 0.0  ;;  %7308 = vmatmul.mubr.msk.bf16.gmra.mrb[184].mxu0 %vm689_vm0, %v7993_v58  ;;  %v1992_v12 = vld [vmem:[#allocation3 + $0x51] sm:$0xff] }
 0x18c   : > { %1809 = vst.msk [vmem:[#allocation3 + $0x59] sm:$0x3f] %vm1750_vm4, %v1807_v0  ;;  %7311 = vmatprep.mubr.msk.bf16.mxu0 %vm8362_vm1, %v8361_v1  ;;  %v1528_v31 = vld [vmem:[#allocation2 + $0x120] ss:$2 sm:$0xff]  ;;  %v1626_v32 = vld [vmem:[#allocation2 + $0x121] ss:$2 sm:$0xff] }
 0x18d   : > { %1400 = vst.msk [vmem:[#allocation2 + $0x138] sm:$0xff] %vm1360_vm2, %v1301_v2  ;;  %v1705_v39 = vmax.f32 %v1528_v31, %v1626_v32 }
 0x18e   : > { %v1031_v3 = vpop.f32.mrb[80].mxu0 }
 0x18f   : > { %v1032_v4 = vadd.f32 %v8661_v34, %v1031_v3  ;;  %v7205_v5 = vpop.f32.mrb[81].mxu0 }
 0x190   : > { %v1034_v7 = vpop.f32.mrb[82].mxu0 }
 0x191   : > { %v1302_v8 = vmax.f32 %v1032_v4, 0.0  ;;  %v1035_v9 = vadd.f32 %v8661_v34, %v1034_v7  ;;  %v7206_v10 = vpop.f32.mrb[83].mxu0 }
 0x193   : > { %1401 = vst.msk [vmem:[#allocation2 + $0x140] sm:$0xff] %vm1360_vm2, %v1302_v8  ;;  %v1303_v11 = vmax.f32 %v1035_v9, 0.0  ;;  %7312 = vmatmul.mubr.msk.bf16.gmra.mrb[188].mxu0 %vm689_vm0, %v7994_v6  ;;  %v1993_v13 = vld [vmem:[#allocation3 + $0x59] sm:$0xff] }
 0x194   : > { %v1530_v14 = vld [vmem:[#allocation2 + $0x130] ss:$2 sm:$0xff]  ;;  %v1628_v15 = vld [vmem:[#allocation2 + $0x131] ss:$2 sm:$0xff]  ;;  %v2015_v16 = vpack.c.bf16 %v1993_v13, %v1992_v12  ;;  %7315 = vmatprep.mubr.msk.bf16.mxu0 %vm8362_vm1, %v8361_v1 }
 0x195   : > { %v1706_v17 = vmax.f32 %v1530_v14, %v1628_v15  ;;  %1402 = vst.msk [vmem:[#allocation2 + $0x148] sm:$0xff] %vm1360_vm2, %v1303_v11 }
 0x196   : > { %v1039_v18 = vpop.f32.mrb[84].mxu0  ;;  %7332 = vmatmul.mubr.msk.bf16.gmra.mrb[8].mxu1 %vm1360_vm2, %v2015_v16 }
 0x197   : > { %v1812_v19 = vrot.slane %v1706_v17, 6  ;;  %v1040_v20 = vadd.f32 %v8661_v34, %v1039_v18  ;;  %v7209_v21 = vpop.f32.mrb[85].mxu0 }
 0x198   : > { %v1042_v23 = vpop.f32.mrb[86].mxu0 }
 0x199   : > { %v1818_v24 = vmax.f32 %v1704_v53, %v1812_v19  ;;  %v1304_v25 = vmax.f32 %v1040_v20, 0.0  ;;  %v1043_v26 = vadd.f32 %v8661_v34, %v1042_v23  ;;  %v7210_v27 = vpop.f32.mrb[87].mxu0 }
 0x19b   : > { %1821 = vst.msk [vmem:[#allocation3 + $0x5d] sm:$0xf0] %vm1763_vm5, %v1818_v24  ;;  %v1305_v28 = vmax.f32 %v1043_v26, 0.0  ;;  %7316 = vmatmul.mubr.msk.bf16.gmra.mrb[192].mxu0 %vm689_vm0, %v7995_v22 }
 0x19c   : > { %1403 = vst.msk [vmem:[#allocation2 + $0x150] sm:$0xff] %vm1360_vm2, %v1304_v25  ;;  %v1532_v29 = vld [vmem:[#allocation2 + $0x140] ss:$2 sm:$0xff]  ;;  %v1630_v30 = vld [vmem:[#allocation2 + $0x141] ss:$2 sm:$0xff] }
 0x19d   : > { %v1707_v33 = vmax.f32 %v1532_v29, %v1630_v30  ;;  %1404 = vst.msk [vmem:[#allocation2 + $0x158] sm:$0xff] %vm1360_vm2, %v1305_v28 }
 0x19e   : > { %v1047_v35 = vpop.f32.mrb[88].mxu0 }
 0x19f   : > { %v1813_v36 = vrot.slane %v1707_v33, 6  ;;  %v1048_v37 = vadd.f32 %v8661_v34, %v1047_v35  ;;  %v7213_v38 = vpop.f32.mrb[89].mxu0 }
 0x1a0   : > { %v1050_v40 = vpop.f32.mrb[90].mxu0 }
 0x1a1   : > { %v1814_v41 = vsel %vm1739_vm3, %v1812_v19, %v1813_v36  ;;  %v1820_v42 = vmax.f32 %v1706_v17, %v1813_v36  ;;  %v1306_v43 = vmax.f32 %v1048_v37, 0.0  ;;  %v1051_v44 = vadd.f32 %v8661_v34, %v1050_v40  ;;  %v7214_v45 = vpop.f32.mrb[91].mxu0 }
 0x1a2   : > { %v1819_v46 = vmax.f32 %v1705_v39, %v1814_v41 }
 0x1a3   : > { %1823 = vst.msk [vmem:[#allocation3 + $0x6d] sm:$0x3] %vm1766_vm6, %v1820_v42  ;;  %v1307_v47 = vmax.f32 %v1051_v44, 0.0 }
 0x1a4   : > { %1405 = vst.msk [vmem:[#allocation2 + $0x160] sm:$0xff] %vm1360_vm2, %v1306_v43  ;;  %1822 = vst.msk [vmem:[#allocation3 + $0x65] sm:$0xff] %vm1360_vm2, %v1819_v46  ;;  %v1534_v9 = vld [vmem:[#allocation2 + $0x150] ss:$2 sm:$0xff]  ;;  %v1632_v10 = vld [vmem:[#allocation2 + $0x151] ss:$2 sm:$0xff] }
 0x1a5   : > { %1406 = vst.msk [vmem:[#allocation2 + $0x168] sm:$0xff] %vm1360_vm2, %v1307_v47  ;;  %v1708_v17 = vmax.f32 %v1534_v9, %v1632_v10 }
 0x1a6   : > { %v1055_v48 = vpop.f32.mrb[92].mxu0 }
 0x1a7   : > { %v1056_v49 = vadd.f32 %v8661_v34, %v1055_v48  ;;  %v7217_v50 = vpop.f32.mrb[93].mxu0 }
 0x1a8   : > { %v1058_v51 = vpop.f32.mrb[94].mxu0 }
 0x1a9   : > { %v1308_v52 = vmax.f32 %v1056_v49, 0.0  ;;  %v1059_v53 = vadd.f32 %v8661_v34, %v1058_v51  ;;  %v7218_v54 = vpop.f32.mrb[95].mxu0 }
 0x1aa   : > { %v7996_v54 = vld [vmem:[%s10207_s3] sm:$0xff]  }
 0x1ab   : > { %1407 = vst.msk [vmem:[#allocation2 + $0x170] sm:$0xff] %vm1360_vm2, %v1308_v52  ;;  %v1309_v55 = vmax.f32 %v1059_v53, 0.0  ;;  %v1994_v56 = vld [vmem:[#allocation3 + $0x61] sm:$0xff]  ;;  %v1995_v57 = vld [vmem:[#allocation3 + $0x69] sm:$0xff]  ;;  %7351 = vmatprep.subr.bf16.mxu1 %v7996_v54 }
 0x1ac   : > { %v2016_v58 = vpack.c.bf16 %v1995_v57, %v1994_v56  ;;  %v1536_v62 = vld [vmem:[#allocation2 + $0x160] ss:$2 sm:$0xff]  ;;  %v1634_v63 = vld [vmem:[#allocation2 + $0x161] ss:$2 sm:$0xff]  ;;  %7352 = vmatpush3.bf16.msra.mxu1 %v7996_v54 }
 0x1ad   : > { %1408 = vst.msk [vmem:[#allocation2 + $0x178] sm:$0xff] %vm1360_vm2, %v1309_v55  ;;  %v1709_v5 = vmax.f32 %v1536_v62, %v1634_v63  ;;  %v8904_v56 = vld [vmem:[%s10206_s2] ss:$0 sm:$0xff] }
 0x1ae   : > { %v1063_v59 = vpop.f32.mrb[96].mxu0  ;;  %7335 = vmatprep.mubr.msk.bf16.mxu1 %vm1360_vm2, %v2016_v58 }
 0x1af   : > { %v1064_v60 = vadd.f32 %v8661_v34, %v1063_v59  ;;  %v7221_v61 = vpop.f32.mrb[97].mxu0  ;;  %v1827_v13 = vrot.slane %v1709_v5, 6 }
 0x1b0   : > { %v1066_v0 = vpop.f32.mrb[98].mxu0 }
 0x1b1   : > { %v1310_v2 = vmax.f32 %v1064_v60, 0.0  ;;  %v1067_v3 = vadd.f32 %v8661_v34, %v1066_v0  ;;  %v7222_v4 = vpop.f32.mrb[99].mxu0 }
 0x1b3   : > { %1409 = vst.msk [vmem:[#allocation2 + $0x180] sm:$0xff] %vm1360_vm2, %v1310_v2  ;;  %v1311_v6 = vmax.f32 %v1067_v3, 0.0 }
 0x1b4   : > { %v1538_v7 = vld [vmem:[#allocation2 + $0x170] ss:$2 sm:$0xff]  ;;  %v1636_v8 = vld [vmem:[#allocation2 + $0x171] ss:$2 sm:$0xff] }
 0x1b5   : > { %v1710_v11 = vmax.f32 %v1538_v7, %v1636_v8  ;;  %1410 = vst.msk [vmem:[#allocation2 + $0x188] sm:$0xff] %vm1360_vm2, %v1311_v6 }
 0x1b6   : > { %v1071_v12 = vpop.f32.mrb[100].mxu0 }
 0x1b7   : > { %v1828_v14 = vrot.slane %v1710_v11, 6  ;;  %v1072_v15 = vadd.f32 %v8661_v34, %v1071_v12  ;;  %v7225_v16 = vpop.f32.mrb[101].mxu0 }
 0x1b8   : > { %v1074_v18 = vpop.f32.mrb[102].mxu0 }
 0x1b9   : > { %v1829_v19 = vsel %vm1739_vm3, %v1827_v13, %v1828_v14  ;;  %v1312_v20 = vmax.f32 %v1072_v15, 0.0  ;;  %v1075_v21 = vadd.f32 %v8661_v34, %v1074_v18  ;;  %v7226_v22 = vpop.f32.mrb[103].mxu0 }
 0x1ba   : > { %v1834_v23 = vmax.f32 %v1708_v17, %v1829_v19 }
 0x1bb   : > { %1411 = vst.msk [vmem:[#allocation2 + $0x190] sm:$0xff] %vm1360_vm2, %v1312_v20  ;;  %v1313_v24 = vmax.f32 %v1075_v21, 0.0 }
 0x1bc   : > { %1836 = vst.msk [vmem:[#allocation3 + $0x71] sm:$0xff] %vm1360_vm2, %v1834_v23  ;;  %v1540_v25 = vld [vmem:[#allocation2 + $0x180] ss:$2 sm:$0xff]  ;;  %v1638_v26 = vld [vmem:[#allocation2 + $0x181] ss:$2 sm:$0xff] }
 0x1bd   : > { %v1711_v27 = vmax.f32 %v1540_v25, %v1638_v26  ;;  %1412 = vst.msk [vmem:[#allocation2 + $0x198] sm:$0xff] %vm1360_vm2, %v1313_v24 }
 0x1be   : > { %v1079_v28 = vpop.f32.mrb[104].mxu0 }
 0x1bf   : > { %v1830_v29 = vrot.slane %v1711_v27, 6  ;;  %v1080_v30 = vadd.f32 %v8661_v34, %v1079_v28  ;;  %v7229_v31 = vpop.f32.mrb[105].mxu0 }
 0x1c0   : > { %v1082_v32 = vpop.f32.mrb[106].mxu0 }
 0x1c1   : > { %v1831_v33 = vsel %vm1739_vm3, %v1828_v14, %v1830_v29  ;;  %v1314_v35 = vmax.f32 %v1080_v30, 0.0  ;;  %v1083_v36 = vadd.f32 %v8661_v34, %v1082_v32  ;;  %v7230_v37 = vpop.f32.mrb[107].mxu0 }
 0x1c2   : > { %v1835_v38 = vmax.f32 %v1709_v5, %v1831_v33 }
 0x1c3   : > { %1413 = vst.msk [vmem:[#allocation2 + $0x1a0] sm:$0xff] %vm1360_vm2, %v1314_v35  ;;  %v1315_v39 = vmax.f32 %v1083_v36, 0.0  ;;  %v1996_v48 = vld [vmem:[#allocation3 + $0x71] sm:$0xff] }
 0x1c4   : > { %1837 = vst.msk [vmem:[#allocation3 + $0x79] sm:$0x3f] %vm1750_vm4, %v1835_v38  ;;  %v1542_v4 = vld [vmem:[#allocation2 + $0x190] ss:$2 sm:$0xff]  ;;  %v1640_v5 = vld [vmem:[#allocation2 + $0x191] ss:$2 sm:$0xff] }
 0x1c5   : > { %1414 = vst.msk [vmem:[#allocation2 + $0x1a8] sm:$0xff] %vm1360_vm2, %v1315_v39  ;;  %v1712_v11 = vmax.f32 %v1542_v4, %v1640_v5 }
 0x1c6   : > { %v1087_v40 = vpop.f32.mrb[108].mxu0 }
 0x1c7   : > { %v1088_v41 = vadd.f32 %v8661_v34, %v1087_v40  ;;  %v7233_v42 = vpop.f32.mrb[109].mxu0 }
 0x1c8   : > { %v1090_v43 = vpop.f32.mrb[110].mxu0 }
 0x1c9   : > { %v1316_v44 = vmax.f32 %v1088_v41, 0.0  ;;  %v1091_v45 = vadd.f32 %v8661_v34, %v1090_v43  ;;  %v7234_v46 = vpop.f32.mrb[111].mxu0 }
 0x1cb   : > { %1415 = vst.msk [vmem:[#allocation2 + $0x1b0] sm:$0xff] %vm1360_vm2, %v1316_v44  ;;  %v1317_v47 = vmax.f32 %v1091_v45, 0.0  ;;  %v1997_v49 = vld [vmem:[#allocation3 + $0x79] sm:$0xff] }
 0x1cc   : > { %v1544_v50 = vld [vmem:[#allocation2 + $0x1a0] ss:$2 sm:$0xff]  ;;  %v1642_v51 = vld [vmem:[#allocation2 + $0x1a1] ss:$2 sm:$0xff]  ;;  %v2017_v52 = vpack.c.bf16 %v1997_v49, %v1996_v48 }
 0x1cd   : > { %v1713_v53 = vmax.f32 %v1544_v50, %v1642_v51  ;;  %1416 = vst.msk [vmem:[#allocation2 + $0x1b8] sm:$0xff] %vm1360_vm2, %v1317_v47  ;;  %v7997_v45 = vld [vmem:[%s10207_s3 + $0x8] sm:$0xff]  }
 0x1ce   : > { %v1095_v55 = vpop.f32.mrb[112].mxu0  ;;  %7336 = vmatmul.mubr.msk.bf16.gmra.mrb[12].mxu1 %vm1360_vm2, %v2017_v52  ;;  %7353 = vmatprep.subr.bf16.mxu1 %v7997_v45 }
 0x1cf   : > { %v1840_v34 = vrot.slane %v1713_v53, 6  ;;  %v1096_v57 = vadd.f32 %v8904_v56, %v1095_v55  ;;  %v7237_v58 = vpop.f32.mrb[113].mxu0  ;;  %7354 = vmatpush3.bf16.msra.mxu1 %v7997_v45 }
 0x1d0   : > { %v1098_v59 = vpop.f32.mrb[114].mxu0 }
 0x1d1   : > { %v1846_v60 = vmax.f32 %v1711_v27, %v1840_v34  ;;  %v1318_v61 = vmax.f32 %v1096_v57, 0.0  ;;  %v1099_v62 = vadd.f32 %v8904_v56, %v1098_v59  ;;  %v7238_v63 = vpop.f32.mrb[115].mxu0 }
 0x1d3   : > { %1849 = vst.msk [vmem:[#allocation3 + $0x7d] sm:$0xf0] %vm1763_vm5, %v1846_v60  ;;  %v1319_v0 = vmax.f32 %v1099_v62, 0.0 }
 0x1d4   : > { %1417 = vst.msk [vmem:[#allocation2 + $0x1c0] sm:$0xff] %vm1360_vm2, %v1318_v61  ;;  %v1546_v2 = vld [vmem:[#allocation2 + $0x1b0] ss:$2 sm:$0xff]  ;;  %v1644_v3 = vld [vmem:[#allocation2 + $0x1b1] ss:$2 sm:$0xff] }
 0x1d5   : > { %v1714_v6 = vmax.f32 %v1546_v2, %v1644_v3  ;;  %1418 = vst.msk [vmem:[#allocation2 + $0x1c8] sm:$0xff] %vm1360_vm2, %v1319_v0 }
 0x1d6   : > { %v1103_v7 = vpop.f32.mrb[116].mxu0 }
 0x1d7   : > { %v1841_v8 = vrot.slane %v1714_v6, 6  ;;  %v1104_v9 = vadd.f32 %v8904_v56, %v1103_v7  ;;  %v7241_v10 = vpop.f32.mrb[117].mxu0 }
 0x1d8   : > { %v1106_v12 = vpop.f32.mrb[118].mxu0 }
 0x1d9   : > { %v1842_v13 = vsel %vm1739_vm3, %v1840_v34, %v1841_v8  ;;  %v1848_v14 = vmax.f32 %v1713_v53, %v1841_v8  ;;  %v1320_v15 = vmax.f32 %v1104_v9, 0.0  ;;  %v1107_v16 = vadd.f32 %v8904_v56, %v1106_v12  ;;  %v7242_v17 = vpop.f32.mrb[119].mxu0 }
 0x1da   : > { %v1847_v18 = vmax.f32 %v1712_v11, %v1842_v13 }
 0x1db   : > { %1851 = vst.msk [vmem:[#allocation3 + $0x8d] sm:$0x3] %vm1766_vm6, %v1848_v14  ;;  %v1321_v19 = vmax.f32 %v1107_v16, 0.0 }
 0x1dc   : > { %1419 = vst.msk [vmem:[#allocation2 + $0x1d0] sm:$0xff] %vm1360_vm2, %v1320_v15  ;;  %1850 = vst.msk [vmem:[#allocation3 + $0x85] sm:$0xff] %vm1360_vm2, %v1847_v18  ;;  %v1548_v46 = vld [vmem:[#allocation2 + $0x1c0] ss:$2 sm:$0xff]  ;;  %v1646_v47 = vld [vmem:[#allocation2 + $0x1c1] ss:$2 sm:$0xff] }
 0x1dd   : > { %1420 = vst.msk [vmem:[#allocation2 + $0x1d8] sm:$0xff] %vm1360_vm2, %v1321_v19  ;;  %v1715_v54 = vmax.f32 %v1548_v46, %v1646_v47 }
 0x1de   : > { %v1111_v20 = vpop.f32.mrb[120].mxu0 }
 0x1df   : > { %v1112_v21 = vadd.f32 %v8904_v56, %v1111_v20  ;;  %v7245_v22 = vpop.f32.mrb[121].mxu0 }
 0x1e0   : > { %v1114_v23 = vpop.f32.mrb[122].mxu0 }
 0x1e1   : > { %v1322_v24 = vmax.f32 %v1112_v21, 0.0  ;;  %v1115_v25 = vadd.f32 %v8904_v56, %v1114_v23  ;;  %v7246_v26 = vpop.f32.mrb[123].mxu0 }
 0x1e2   : > { %v8950_v26 = vld [vmem:[%s10207_s3 + $0x20] sm:$0xff]  }
 0x1e3   : > { %1421 = vst.msk [vmem:[#allocation2 + $0x1e0] sm:$0xff] %vm1360_vm2, %v1322_v24  ;;  %v1323_v27 = vmax.f32 %v1115_v25, 0.0  ;;  %v1998_v28 = vld [vmem:[#allocation3 + $0x81] sm:$0xff]  ;;  %v1999_v29 = vld [vmem:[#allocation3 + $0x89] sm:$0xff]  ;;  %7383 = vmatprep.subr.bf16.mxu1 %v8950_v26 }
 0x1e4   : > { %v2018_v30 = vpack.c.bf16 %v1999_v29, %v1998_v28  ;;  %v1550_v35 = vld [vmem:[#allocation2 + $0x1d0] ss:$2 sm:$0xff]  ;;  %v1648_v36 = vld [vmem:[#allocation2 + $0x1d1] ss:$2 sm:$0xff] }
 0x1e5   : > { %1422 = vst.msk [vmem:[#allocation2 + $0x1e8] sm:$0xff] %vm1360_vm2, %v1323_v27  ;;  %v1716_v41 = vmax.f32 %v1550_v35, %v1648_v36 }
 0x1e6   : > { %v1119_v31 = vpop.f32.mrb[124].mxu0  ;;  %7339 = vmatprep.mubr.msk.bf16.mxu1 %vm1360_vm2, %v2018_v30 }
 0x1e7   : > { %v1120_v32 = vadd.f32 %v8904_v56, %v1119_v31  ;;  %v7249_v33 = vpop.f32.mrb[125].mxu0  ;;  %v1855_v50 = vrot.slane %v1716_v41, 6 }
 0x1e8   : > { %v1122_v37 = vpop.f32.mrb[126].mxu0 }
 0x1e9   : > { %v1324_v38 = vmax.f32 %v1120_v32, 0.0  ;;  %v1123_v39 = vadd.f32 %v8904_v56, %v1122_v37  ;;  %v7250_v40 = vpop.f32.mrb[127].mxu0 }
 0x1eb   : > { %1423 = vst.msk [vmem:[#allocation2 + $0x1f0] sm:$0xff] %vm1360_vm2, %v1324_v38  ;;  %v1325_v42 = vmax.f32 %v1123_v39, 0.0 }
 0x1ec   : > { %v1552_v43 = vld [vmem:[#allocation2 + $0x1e0] ss:$2 sm:$0xff]  ;;  %v1650_v44 = vld [vmem:[#allocation2 + $0x1e1] ss:$2 sm:$0xff] }
 0x1ed   : > { %v1717_v48 = vmax.f32 %v1552_v43, %v1650_v44  ;;  %1424 = vst.msk [vmem:[#allocation2 + $0x1f8] sm:$0xff] %vm1360_vm2, %v1325_v42 }
 0x1ee   : > { %v1127_v49 = vpop.f32.mrb[128].mxu0 }
 0x1ef   : > { %v1856_v51 = vrot.slane %v1717_v48, 6  ;;  %v1128_v52 = vadd.f32 %v8904_v56, %v1127_v49  ;;  %v7253_v53 = vpop.f32.mrb[129].mxu0 }
 0x1f0   : > { %v1130_v55 = vpop.f32.mrb[130].mxu0 }
 0x1f1   : > { %v1857_v34 = vsel %vm1739_vm3, %v1855_v50, %v1856_v51  ;;  %v1326_v57 = vmax.f32 %v1128_v52, 0.0  ;;  %v1131_v58 = vadd.f32 %v8904_v56, %v1130_v55  ;;  %v7254_v59 = vpop.f32.mrb[131].mxu0 }
 0x1f2   : > { %v1862_v60 = vmax.f32 %v1715_v54, %v1857_v34 }
 0x1f3   : > { %1425 = vst.msk [vmem:[#allocation2 + $0x200] sm:$0xff] %vm1360_vm2, %v1326_v57  ;;  %v1327_v61 = vmax.f32 %v1131_v58, 0.0 }
 0x1f4   : > { %1864 = vst.msk [vmem:[#allocation3 + $0x91] sm:$0xff] %vm1360_vm2, %v1862_v60  ;;  %v1554_v62 = vld [vmem:[#allocation2 + $0x1f0] ss:$2 sm:$0xff]  ;;  %v1652_v63 = vld [vmem:[#allocation2 + $0x1f1] ss:$2 sm:$0xff] }
 0x1f5   : > { %v1718_v0 = vmax.f32 %v1554_v62, %v1652_v63  ;;  %1426 = vst.msk [vmem:[#allocation2 + $0x208] sm:$0xff] %vm1360_vm2, %v1327_v61 }
 0x1f6   : > { %v1135_v2 = vpop.f32.mrb[132].mxu0 }
 0x1f7   : > { %v1858_v3 = vrot.slane %v1718_v0, 6  ;;  %v1136_v4 = vadd.f32 %v8904_v56, %v1135_v2  ;;  %v7257_v5 = vpop.f32.mrb[133].mxu0 }
 0x1f8   : > { %v1138_v6 = vpop.f32.mrb[134].mxu0 }
 0x1f9   : > { %v1859_v7 = vsel %vm1739_vm3, %v1856_v51, %v1858_v3  ;;  %v1328_v8 = vmax.f32 %v1136_v4, 0.0  ;;  %v1139_v9 = vadd.f32 %v8904_v56, %v1138_v6  ;;  %v7258_v10 = vpop.f32.mrb[135].mxu0 }
 0x1fa   : > { %v1863_v11 = vmax.f32 %v1716_v41, %v1859_v7 }
 0x1fb   : > { %1427 = vst.msk [vmem:[#allocation2 + $0x210] sm:$0xff] %vm1360_vm2, %v1328_v8  ;;  %v1329_v12 = vmax.f32 %v1139_v9, 0.0  ;;  %v2000_v21 = vld [vmem:[#allocation3 + $0x91] sm:$0xff] }
 0x1fc   : > { %1865 = vst.msk [vmem:[#allocation3 + $0x99] sm:$0x3f] %vm1750_vm4, %v1863_v11  ;;  %v1556_v41 = vld [vmem:[#allocation2 + $0x200] ss:$2 sm:$0xff]  ;;  %v1654_v42 = vld [vmem:[#allocation2 + $0x201] ss:$2 sm:$0xff] }
 0x1fd   : > { %1428 = vst.msk [vmem:[#allocation2 + $0x218] sm:$0xff] %vm1360_vm2, %v1329_v12  ;;  %v1719_v48 = vmax.f32 %v1556_v41, %v1654_v42 }
 0x1fe   : > { %v1143_v13 = vpop.f32.mrb[136].mxu0 }
 0x1ff   : > { %v1144_v14 = vadd.f32 %v8904_v56, %v1143_v13  ;;  %v7261_v15 = vpop.f32.mrb[137].mxu0 }
 0x200   : > { %v1146_v16 = vpop.f32.mrb[138].mxu0 }
 0x201   : > { %v1330_v17 = vmax.f32 %v1144_v14, 0.0  ;;  %v1147_v18 = vadd.f32 %v8904_v56, %v1146_v16  ;;  %v7262_v19 = vpop.f32.mrb[139].mxu0 }
 0x203   : > { %1429 = vst.msk [vmem:[#allocation2 + $0x220] sm:$0xff] %vm1360_vm2, %v1330_v17  ;;  %v1331_v20 = vmax.f32 %v1147_v18, 0.0  ;;  %v2001_v22 = vld [vmem:[#allocation3 + $0x99] sm:$0xff] }
 0x204   : > { %v1558_v23 = vld [vmem:[#allocation2 + $0x210] ss:$2 sm:$0xff]  ;;  %v1656_v24 = vld [vmem:[#allocation2 + $0x211] ss:$2 sm:$0xff]  ;;  %v8945_v25 = vpack.c.bf16 %v2001_v22, %v2000_v21 }
 0x205   : > { %v1720_v27 = vmax.f32 %v1558_v23, %v1656_v24  ;;  %1430 = vst.msk [vmem:[#allocation2 + $0x228] sm:$0xff] %vm1360_vm2, %v1331_v20 }
 0x206   : > { %v1151_v28 = vpop.f32.mrb[140].mxu0  ;;  %7340 = vmatmul.mubr.msk.bf16.gmra.mrb[16].mxu1 %vm1360_vm2, %v8945_v25 }
 0x207   : > { %v1868_v29 = vrot.slane %v1720_v27, 6  ;;  %v1152_v30 = vadd.f32 %v8904_v56, %v1151_v28  ;;  %v7265_v31 = vpop.f32.mrb[141].mxu0 }
 0x208   : > { %v1154_v32 = vpop.f32.mrb[142].mxu0 }
 0x209   : > { %v1874_v33 = vmax.f32 %v1718_v0, %v1868_v29  ;;  %v1332_v35 = vmax.f32 %v1152_v30, 0.0  ;;  %v1155_v36 = vadd.f32 %v8904_v56, %v1154_v32  ;;  %v7266_v37 = vpop.f32.mrb[143].mxu0 }
 0x20b   : > { %1877 = vst.msk [vmem:[#allocation3 + $0x9d] sm:$0xf0] %vm1763_vm5, %v1874_v33  ;;  %v1333_v38 = vmax.f32 %v1155_v36, 0.0 }
 0x20c   : > { %1431 = vst.msk [vmem:[#allocation2 + $0x230] sm:$0xff] %vm1360_vm2, %v1332_v35  ;;  %v1560_v39 = vld [vmem:[#allocation2 + $0x220] ss:$2 sm:$0xff]  ;;  %v1658_v40 = vld [vmem:[#allocation2 + $0x221] ss:$2 sm:$0xff] }
 0x20d   : > { %v1721_v43 = vmax.f32 %v1560_v39, %v1658_v40  ;;  %1432 = vst.msk [vmem:[#allocation2 + $0x238] sm:$0xff] %vm1360_vm2, %v1333_v38 }
 0x20e   : > { %v1159_v44 = vpop.f32.mrb[144].mxu0 }
 0x20f   : > { %v1869_v45 = vrot.slane %v1721_v43, 6  ;;  %v1160_v46 = vadd.f32 %v8904_v56, %v1159_v44  ;;  %v7269_v47 = vpop.f32.mrb[145].mxu0 }
 0x210   : > { %v1162_v49 = vpop.f32.mrb[146].mxu0 }
 0x211   : > { %v1870_v50 = vsel %vm1739_vm3, %v1868_v29, %v1869_v45  ;;  %v1876_v51 = vmax.f32 %v1720_v27, %v1869_v45  ;;  %v1334_v52 = vmax.f32 %v1160_v46, 0.0  ;;  %v1163_v53 = vadd.f32 %v8904_v56, %v1162_v49  ;;  %v7270_v54 = vpop.f32.mrb[147].mxu0 }
 0x212   : > { %v1875_v55 = vmax.f32 %v1719_v48, %v1870_v50 }
 0x213   : > { %1879 = vst.msk [vmem:[#allocation3 + $0xad] sm:$0x3] %vm1766_vm6, %v1876_v51  ;;  %v1335_v34 = vmax.f32 %v1163_v53, 0.0 }
 0x214   : > { %1433 = vst.msk [vmem:[#allocation2 + $0x240] sm:$0xff] %vm1360_vm2, %v1334_v52  ;;  %1878 = vst.msk [vmem:[#allocation3 + $0xa5] sm:$0xff] %vm1360_vm2, %v1875_v55  ;;  %v1562_v18 = vld [vmem:[#allocation2 + $0x230] ss:$2 sm:$0xff]  ;;  %v1660_v19 = vld [vmem:[#allocation2 + $0x231] ss:$2 sm:$0xff] }
 0x215   : > { %1434 = vst.msk [vmem:[#allocation2 + $0x248] sm:$0xff] %vm1360_vm2, %v1335_v34  ;;  %v1722_v28 = vmax.f32 %v1562_v18, %v1660_v19 }
 0x216   : > { %v1167_v57 = vpop.f32.mrb[148].mxu0 }
 0x217   : > { %v1168_v58 = vadd.f32 %v8904_v56, %v1167_v57  ;;  %v7273_v59 = vpop.f32.mrb[149].mxu0 }
 0x218   : > { %v1170_v60 = vpop.f32.mrb[150].mxu0 }
 0x219   : > { %v1336_v61 = vmax.f32 %v1168_v58, 0.0  ;;  %v1171_v62 = vadd.f32 %v8904_v56, %v1170_v60  ;;  %v7274_v63 = vpop.f32.mrb[151].mxu0 }
 0x21b   : > { %1435 = vst.msk [vmem:[#allocation2 + $0x250] sm:$0xff] %vm1360_vm2, %v1336_v61  ;;  %v1337_v0 = vmax.f32 %v1171_v62, 0.0  ;;  %v2002_v2 = vld [vmem:[#allocation3 + $0xa1] sm:$0xff]  ;;  %v2003_v3 = vld [vmem:[#allocation3 + $0xa9] sm:$0xff] }
 0x21c   : > { %v8971_v4 = vpack.c.bf16 %v2003_v3, %v2002_v2  ;;  %v1564_v8 = vld [vmem:[#allocation2 + $0x240] ss:$2 sm:$0xff]  ;;  %v1662_v9 = vld [vmem:[#allocation2 + $0x241] ss:$2 sm:$0xff] }
 0x21d   : > { %1436 = vst.msk [vmem:[#allocation2 + $0x258] sm:$0xff] %vm1360_vm2, %v1337_v0  ;;  %v1723_v14 = vmax.f32 %v1564_v8, %v1662_v9 }
 0x21e   : > { %v1175_v5 = vpop.f32.mrb[152].mxu0  ;;  %7343 = vmatprep.mubr.msk.bf16.mxu1 %vm1360_vm2, %v8971_v4 }
 0x21f   : > { %v1176_v6 = vadd.f32 %v8904_v56, %v1175_v5  ;;  %v7277_v7 = vpop.f32.mrb[153].mxu0  ;;  %v1883_v22 = vrot.slane %v1723_v14, 6 }
 0x220   : > { %v1178_v10 = vpop.f32.mrb[154].mxu0 }
 0x221   : > { %v1338_v11 = vmax.f32 %v1176_v6, 0.0  ;;  %v1179_v12 = vadd.f32 %v8904_v56, %v1178_v10  ;;  %v7278_v13 = vpop.f32.mrb[155].mxu0 }
 0x223   : > { %1437 = vst.msk [vmem:[#allocation2 + $0x260] sm:$0xff] %vm1360_vm2, %v1338_v11  ;;  %v1339_v15 = vmax.f32 %v1179_v12, 0.0 }
 0x224   : > { %v1566_v16 = vld [vmem:[#allocation2 + $0x250] ss:$2 sm:$0xff]  ;;  %v1664_v17 = vld [vmem:[#allocation2 + $0x251] ss:$2 sm:$0xff] }
 0x225   : > { %v1724_v20 = vmax.f32 %v1566_v16, %v1664_v17  ;;  %1438 = vst.msk [vmem:[#allocation2 + $0x268] sm:$0xff] %vm1360_vm2, %v1339_v15 }
 0x226   : > { %v1183_v21 = vpop.f32.mrb[156].mxu0 }
 0x227   : > { %v1884_v23 = vrot.slane %v1724_v20, 6  ;;  %v1184_v24 = vadd.f32 %v8904_v56, %v1183_v21  ;;  %v7281_v27 = vpop.f32.mrb[157].mxu0 }
 0x228   : > { %v1186_v29 = vpop.f32.mrb[158].mxu0 }
 0x229   : > { %v1885_v30 = vsel %vm1739_vm3, %v1883_v22, %v1884_v23  ;;  %v1340_v31 = vmax.f32 %v1184_v24, 0.0  ;;  %v1187_v32 = vadd.f32 %v8904_v56, %v1186_v29  ;;  %v7282_v33 = vpop.f32.mrb[159].mxu0 }
 0x22a   : > { %v1890_v35 = vmax.f32 %v1722_v28, %v1885_v30 }
 0x22b   : > { %1439 = vst.msk [vmem:[#allocation2 + $0x270] sm:$0xff] %vm1360_vm2, %v1340_v31  ;;  %v1341_v36 = vmax.f32 %v1187_v32, 0.0 }
 0x22c   : > { %1892 = vst.msk [vmem:[#allocation3 + $0xb1] sm:$0xff] %vm1360_vm2, %v1890_v35  ;;  %v1568_v37 = vld [vmem:[#allocation2 + $0x260] ss:$2 sm:$0xff]  ;;  %v1666_v38 = vld [vmem:[#allocation2 + $0x261] ss:$2 sm:$0xff] }
 0x22d   : > { %v1725_v39 = vmax.f32 %v1568_v37, %v1666_v38  ;;  %1440 = vst.msk [vmem:[#allocation2 + $0x278] sm:$0xff] %vm1360_vm2, %v1341_v36 }
 0x22e   : > { %v1191_v40 = vpop.f32.mrb[160].mxu0 }
 0x22f   : > { %v1886_v41 = vrot.slane %v1725_v39, 6  ;;  %v1192_v42 = vadd.f32 %v8904_v56, %v1191_v40  ;;  %v7285_v43 = vpop.f32.mrb[161].mxu0 }
 0x230   : > { %v1194_v44 = vpop.f32.mrb[162].mxu0 }
 0x231   : > { %v1887_v45 = vsel %vm1739_vm3, %v1884_v23, %v1886_v41  ;;  %v1342_v46 = vmax.f32 %v1192_v42, 0.0  ;;  %v1195_v47 = vadd.f32 %v8904_v56, %v1194_v44  ;;  %v7286_v48 = vpop.f32.mrb[163].mxu0 }
 0x232   : > { %v1891_v49 = vmax.f32 %v1723_v14, %v1887_v45 }
 0x233   : > { %1441 = vst.msk [vmem:[#allocation2 + $0x280] sm:$0xff] %vm1360_vm2, %v1342_v46  ;;  %v1343_v50 = vmax.f32 %v1195_v47, 0.0  ;;  %v2004_v59 = vld [vmem:[#allocation3 + $0xb1] sm:$0xff] }
 0x234   : > { %1893 = vst.msk [vmem:[#allocation3 + $0xb9] sm:$0x3f] %vm1750_vm4, %v1891_v49  ;;  %v1570_v15 = vld [vmem:[#allocation2 + $0x270] ss:$2 sm:$0xff]  ;;  %v1668_v16 = vld [vmem:[#allocation2 + $0x271] ss:$2 sm:$0xff] }
 0x235   : > { %1442 = vst.msk [vmem:[#allocation2 + $0x288] sm:$0xff] %vm1360_vm2, %v1343_v50  ;;  %v1726_v22 = vmax.f32 %v1570_v15, %v1668_v16 }
 0x236   : > { %v1199_v51 = vpop.f32.mrb[164].mxu0 }
 0x237   : > { %v1200_v52 = vadd.f32 %v8904_v56, %v1199_v51  ;;  %v7289_v53 = vpop.f32.mrb[165].mxu0 }
 0x238   : > { %v1202_v54 = vpop.f32.mrb[166].mxu0 }
 0x239   : > { %v1344_v55 = vmax.f32 %v1200_v52, 0.0  ;;  %v1203_v34 = vadd.f32 %v8904_v56, %v1202_v54  ;;  %v7290_v57 = vpop.f32.mrb[167].mxu0 }
 0x23b   : > { %1443 = vst.msk [vmem:[#allocation2 + $0x290] sm:$0xff] %vm1360_vm2, %v1344_v55  ;;  %v1345_v58 = vmax.f32 %v1203_v34, 0.0  ;;  %v2005_v60 = vld [vmem:[#allocation3 + $0xb9] sm:$0xff] }
 0x23c   : > { %v1572_v61 = vld [vmem:[#allocation2 + $0x280] ss:$2 sm:$0xff]  ;;  %v1670_v62 = vld [vmem:[#allocation2 + $0x281] ss:$2 sm:$0xff]  ;;  %v8995_v63 = vpack.c.bf16 %v2005_v60, %v2004_v59 }
 0x23d   : > { %v1727_v0 = vmax.f32 %v1572_v61, %v1670_v62  ;;  %1444 = vst.msk [vmem:[#allocation2 + $0x298] sm:$0xff] %vm1360_vm2, %v1345_v58 }
 0x23e   : > { %v1207_v2 = vpop.f32.mrb[168].mxu0  ;;  %7344 = vmatmul.mubr.msk.bf16.gmra.mrb[20].mxu1 %vm1360_vm2, %v8995_v63 }
 0x23f   : > { %v1896_v3 = vrot.slane %v1727_v0, 6  ;;  %v1208_v5 = vadd.f32 %v8904_v56, %v1207_v2  ;;  %v7293_v6 = vpop.f32.mrb[169].mxu0 }
 0x240   : > { %v1210_v7 = vpop.f32.mrb[170].mxu0 }
 0x241   : > { %v1902_v8 = vmax.f32 %v1725_v39, %v1896_v3  ;;  %v1346_v9 = vmax.f32 %v1208_v5, 0.0  ;;  %v1211_v10 = vadd.f32 %v8904_v56, %v1210_v7  ;;  %v7294_v11 = vpop.f32.mrb[171].mxu0 }
 0x243   : > { %1905 = vst.msk [vmem:[#allocation3 + $0xbd] sm:$0xf0] %vm1763_vm5, %v1902_v8  ;;  %v1347_v12 = vmax.f32 %v1211_v10, 0.0 }
 0x244   : > { %1445 = vst.msk [vmem:[#allocation2 + $0x2a0] sm:$0xff] %vm1360_vm2, %v1346_v9  ;;  %v1574_v13 = vld [vmem:[#allocation2 + $0x290] ss:$2 sm:$0xff]  ;;  %v1672_v14 = vld [vmem:[#allocation2 + $0x291] ss:$2 sm:$0xff] }
 0x245   : > { %v1728_v17 = vmax.f32 %v1574_v13, %v1672_v14  ;;  %1446 = vst.msk [vmem:[#allocation2 + $0x2a8] sm:$0xff] %vm1360_vm2, %v1347_v12 }
 0x246   : > { %v1215_v18 = vpop.f32.mrb[172].mxu0 }
 0x247   : > { %v1897_v19 = vrot.slane %v1728_v17, 6  ;;  %v1216_v20 = vadd.f32 %v8904_v56, %v1215_v18  ;;  %v7297_v21 = vpop.f32.mrb[173].mxu0 }
 0x248   : > { %v1218_v23 = vpop.f32.mrb[174].mxu0 }
 0x249   : > { %v1898_v24 = vsel %vm1739_vm3, %v1896_v3, %v1897_v19  ;;  %v1904_v27 = vmax.f32 %v1727_v0, %v1897_v19  ;;  %v1348_v28 = vmax.f32 %v1216_v20, 0.0  ;;  %v1219_v29 = vadd.f32 %v8904_v56, %v1218_v23  ;;  %v7298_v30 = vpop.f32.mrb[175].mxu0 }
 0x24a   : > { %v1903_v31 = vmax.f32 %v1726_v22, %v1898_v24 }
 0x24b   : > { %1907 = vst.msk [vmem:[#allocation3 + $0xcd] sm:$0x3] %vm1766_vm6, %v1904_v27  ;;  %v1349_v32 = vmax.f32 %v1219_v29, 0.0 }
 0x24c   : > { %1447 = vst.msk [vmem:[#allocation2 + $0x2b0] sm:$0xff] %vm1360_vm2, %v1348_v28  ;;  %1906 = vst.msk [vmem:[#allocation3 + $0xc5] sm:$0xff] %vm1360_vm2, %v1903_v31  ;;  %v1576_v58 = vld [vmem:[#allocation2 + $0x2a0] ss:$2 sm:$0xff]  ;;  %v1674_v59 = vld [vmem:[#allocation2 + $0x2a1] ss:$2 sm:$0xff] }
 0x24d   : > { %1448 = vst.msk [vmem:[#allocation2 + $0x2b8] sm:$0xff] %vm1360_vm2, %v1349_v32  ;;  %v1729_v5 = vmax.f32 %v1576_v58, %v1674_v59  ;;  %v7999_v58 = vld [vmem:[%s10207_s3 + $0x28] sm:$0xff]  }
 0x24e   : > { %v1223_v33 = vpop.f32.mrb[176].mxu0 }
 0x24f   : > { %v1224_v35 = vadd.f32 %v8904_v56, %v1223_v33  ;;  %v7301_v36 = vpop.f32.mrb[177].mxu0  ;;  %v1936_v33 = vld [vmem:[#allocation3] sm:$0xff] }
 0x250   : > { %v1226_v37 = vpop.f32.mrb[178].mxu0 }
 0x251   : > { %v1350_v38 = vmax.f32 %v1224_v35, 0.0  ;;  %v1227_v39 = vadd.f32 %v8904_v56, %v1226_v37  ;;  %v7302_v40 = vpop.f32.mrb[179].mxu0  ;;  %v1937_v35 = vld [vmem:[#allocation3 + $0x8] sm:$0xff] }
 0x253   : > { %1449 = vst.msk [vmem:[#allocation2 + $0x2c0] sm:$0xff] %vm1360_vm2, %v1350_v38  ;;  %v1351_v41 = vmax.f32 %v1227_v39, 0.0  ;;  %v2006_v42 = vld [vmem:[#allocation3 + $0xc1] sm:$0xff]  ;;  %v2007_v43 = vld [vmem:[#allocation3 + $0xc9] sm:$0xff] }
 0x254   : > { %v9015_v44 = vpack.c.bf16 %v2007_v43, %v2006_v42  ;;  %v1578_v48 = vld [vmem:[#allocation2 + $0x2b0] ss:$2 sm:$0xff]  ;;  %v1676_v49 = vld [vmem:[#allocation2 + $0x2b1] ss:$2 sm:$0xff]  ;;  %v1964_v42 = vpack.c.bf16 %v1937_v35, %v1936_v33  ;;  %v1958_v35 = vld [vmem:[#allocation3 + $0xb0] sm:$0xff] }
 0x255   : > { %1450 = vst.msk [vmem:[#allocation2 + $0x2c8] sm:$0xff] %vm1360_vm2, %v1351_v41  ;;  %v1730_v54 = vmax.f32 %v1578_v48, %v1676_v49  ;;  %v1939_v49 = vld [vmem:[#allocation3 + $0x18] sm:$0xff]  ;;  %v1961_v33 = vld [vmem:[#allocation3 + $0xc8] sm:$0xff] }
 0x256   : > { %v1231_v45 = vpop.f32.mrb[180].mxu0  ;;  %7347 = vmatprep.mubr.msk.bf16.mxu1 %vm1360_vm2, %v9015_v44 }
 0x257   : > { %v1232_v46 = vadd.f32 %v8904_v56, %v1231_v45  ;;  %v7305_v47 = vpop.f32.mrb[181].mxu0  ;;  %v1911_v62 = vrot.slane %v1730_v54, 6 }
 0x258   : > { %v1234_v50 = vpop.f32.mrb[182].mxu0 }
 0x259   : > { %v1352_v51 = vmax.f32 %v1232_v46, 0.0  ;;  %v1235_v52 = vadd.f32 %v8904_v56, %v1234_v50  ;;  %v7306_v53 = vpop.f32.mrb[183].mxu0  ;;  %v1940_v50 = vld [vmem:[#allocation3 + $0x20] sm:$0xff] }
 0x25b   : > { %1451 = vst.msk [vmem:[#allocation2 + $0x2d0] sm:$0xff] %vm1360_vm2, %v1352_v51  ;;  %v1353_v55 = vmax.f32 %v1235_v52, 0.0  ;;  %v1941_v51 = vld [vmem:[#allocation3 + $0x28] sm:$0xff] }
 0x25c   : > { %v1580_v34 = vld [vmem:[#allocation2 + $0x2c0] ss:$2 sm:$0xff]  ;;  %v1678_v57 = vld [vmem:[#allocation2 + $0x2c1] ss:$2 sm:$0xff] }
 0x25d   : > { %v1731_v60 = vmax.f32 %v1580_v34, %v1678_v57  ;;  %1452 = vst.msk [vmem:[#allocation2 + $0x2d8] sm:$0xff] %vm1360_vm2, %v1353_v55 }
 0x25e   : > { %v1239_v61 = vpop.f32.mrb[184].mxu0 }
 0x25f   : > { %v1912_v0 = vrot.slane %v1731_v60, 6  ;;  %v1240_v2 = vadd.f32 %v8904_v56, %v1239_v61  ;;  %v7309_v3 = vpop.f32.mrb[185].mxu0  ;;  %v9051_v60 = vpack.c.bf16 %v1941_v51, %v1940_v50  ;;  %v8001_v50 = vld [vmem:[%s10207_s3 + $0x38] sm:$0xff]  }
 0x260   : > { %v1242_v6 = vpop.f32.mrb[186].mxu0 }
 0x261   : > { %v1913_v7 = vsel %vm1739_vm3, %v1911_v62, %v1912_v0  ;;  %v1354_v8 = vmax.f32 %v1240_v2, 0.0  ;;  %v1243_v9 = vadd.f32 %v8904_v56, %v1242_v6  ;;  %v7310_v10 = vpop.f32.mrb[187].mxu0 }
 0x262   : > { %v1918_v11 = vmax.f32 %v1729_v5, %v1913_v7  ;;  %v1943_v5 = vld [vmem:[#allocation3 + $0x38] sm:$0xff]  ;;  %v1944_v7 = vld [vmem:[#allocation3 + $0x40] sm:$0xff] }
 0x263   : > { %1453 = vst.msk [vmem:[#allocation2 + $0x2e0] sm:$0xff] %vm1360_vm2, %v1354_v8  ;;  %v1355_v12 = vmax.f32 %v1243_v9, 0.0  ;;  %v1945_v8 = vld [vmem:[#allocation3 + $0x48] sm:$0xff]  ;;  %v1942_v9 = vld [vmem:[#allocation3 + $0x30] sm:$0xff] }
 0x264   : > { %1920 = vst.msk [vmem:[#allocation3 + $0xd1] sm:$0xff] %vm1360_vm2, %v1918_v11  ;;  %v1582_v13 = vld [vmem:[#allocation2 + $0x2d0] ss:$2 sm:$0xff]  ;;  %v1680_v14 = vld [vmem:[#allocation2 + $0x2d1] ss:$2 sm:$0xff]  ;;  %v9069_v10 = vpack.c.bf16 %v1945_v8, %v1944_v7  ;;  %v1947_v11 = vld [vmem:[#allocation3 + $0x58] sm:$0xff] }
 0x265   : > { %v1732_v15 = vmax.f32 %v1582_v13, %v1680_v14  ;;  %1454 = vst.msk [vmem:[#allocation2 + $0x2e8] sm:$0xff] %vm1360_vm2, %v1355_v12  ;;  %v1948_v12 = vld [vmem:[#allocation3 + $0x60] sm:$0xff]  ;;  %v1949_v13 = vld [vmem:[#allocation3 + $0x68] sm:$0xff]  ;;  %v1946_v14 = vld [vmem:[#allocation3 + $0x50] sm:$0xff] }
 0x266   : > { %v1247_v16 = vpop.f32.mrb[188].mxu0  ;;  %v2444_v7 = vld [vmem:[#allocation3 + $0x8a] sm:$0xff]  ;;  %v2441_v8 = vld [vmem:[#allocation3 + $0x72] sm:$0xff] }
 0x267   : > { %v1914_v17 = vrot.slane %v1732_v15, 6  ;;  %v1248_v18 = vadd.f32 %v8904_v56, %v1247_v16  ;;  %v7313_v19 = vpop.f32.mrb[189].mxu0  ;;  %v9077_v16 = vpack.c.bf16 %v1949_v13, %v1948_v12  ;;  %v2446_v13 = vld [vmem:[#allocation3 + $0x9a] sm:$0xff] }
 0x268   : > { %v1250_v20 = vpop.f32.mrb[190].mxu0  ;;  %v1953_v19 = vld [vmem:[#allocation3 + $0x88] sm:$0xff] }
 0x269   : > { %v1915_v21 = vsel %vm1739_vm3, %v1912_v0, %v1914_v17  ;;  %v1356_v22 = vmax.f32 %v1248_v18, 0.0  ;;  %v1251_v23 = vadd.f32 %v8904_v56, %v1250_v20  ;;  %v7314_v24 = vpop.f32.mrb[191].mxu0  ;;  %v9061_v0 = vld [vmem:[%s10207_s3 + $0x30] sm:$0xff]   ;;  %v1951_v17 = vld [vmem:[#allocation3 + $0x78] sm:$0xff]  ;;  %v1950_v20 = vld [vmem:[#allocation3 + $0x70] sm:$0xff] }
 0x26a   : > { %v1919_v27 = vmax.f32 %v1730_v54, %v1915_v21  ;;  %v1938_v54 = vld [vmem:[#allocation3 + $0x10] sm:$0xff]  ;;  %v1952_v18 = vld [vmem:[#allocation3 + $0x80] sm:$0xff]  ;;  %v9083_v21 = vpack.c.bf16 %v1951_v17, %v1950_v20 }
 0x26b   : > { %1455 = vst.msk [vmem:[#allocation2 + $0x2f0] sm:$0xff] %vm1360_vm2, %v1356_v22  ;;  %v1357_v28 = vmax.f32 %v1251_v23, 0.0  ;;  %v2008_v40 = vld [vmem:[#allocation3 + $0xd1] sm:$0xff]  ;;  %v9046_v57 = vpack.c.bf16 %v1939_v49, %v1938_v54  ;;  %v9085_v22 = vpack.c.bf16 %v1953_v19, %v1952_v18  ;;  %v1956_v24 = vld [vmem:[#allocation3 + $0xa0] sm:$0xff] }
 0x26c   : > { %1921 = vst.msk [vmem:[#allocation3 + $0xd9] sm:$0x3f] %vm1750_vm4, %v1919_v27  ;;  %v1584_v52 = vld [vmem:[#allocation2 + $0x2e0] ss:$2 sm:$0xff]  ;;  %v1682_v53 = vld [vmem:[#allocation2 + $0x2e1] ss:$2 sm:$0xff] }
 0x26d   : > { %1456 = vst.msk [vmem:[#allocation2 + $0x2f8] sm:$0xff] %vm1360_vm2, %v1357_v28  ;;  %v1733_v61 = vmax.f32 %v1584_v52, %v1682_v53  ;;  %v1955_v23 = vld [vmem:[#allocation3 + $0x98] sm:$0xff]  ;;  %v1957_v27 = vld [vmem:[#allocation3 + $0xa8] sm:$0xff]  ;;  %v1954_v28 = vld [vmem:[#allocation3 + $0x90] sm:$0xff] }
 0x26e   : > { %v1255_v29 = vpop.f32.mrb[192].mxu0  ;;  %v2431_v49 = vld [vmem:[#allocation3 + $0x22] sm:$0xff]  ;;  %v8002_v52 = vld [vmem:[%s10207_s3 + $0x40] sm:$0xff]   ;;  %v2434_v53 = vld [vmem:[#allocation3 + $0x3a] sm:$0xff] }
 0x26f   : > { %v1256_v30 = vadd.f32 %v8904_v56, %v1255_v29  ;;  %v7317_v31 = vpop.f32.mrb[193].mxu0  ;;  %v9091_v29 = vpack.c.bf16 %v1955_v23, %v1954_v28  ;;  %v2436_v54 = vld [vmem:[#allocation3 + $0x4a] sm:$0xff]  ;;  %v2445_v17 = vld [vmem:[#allocation3 + $0x92] sm:$0xff]  ;;  %v2447_v19 = vld [vmem:[#allocation3 + $0xa2] sm:$0xff] }
 0x270   : > { %v1258_v32 = vpop.f32.mrb[194].mxu0  ;;  %v1959_v31 = vld [vmem:[#allocation3 + $0xb8] sm:$0xff]  ;;  %v9151_v18 = vpack.c.bf16 %v2446_v13, %v2445_v17  ;;  %v2986_v13 = vld [vmem:[#allocation3 + $0x69] sm:$0xff] }
 0x271   : > { %v1358_v36 = vmax.f32 %v1256_v30, 0.0  ;;  %v1259_v37 = vadd.f32 %v8904_v56, %v1258_v32  ;;  %v7318_v38 = vpop.f32.mrb[195].mxu0  ;;  %v9093_v30 = vpack.c.bf16 %v1957_v27, %v1956_v24  ;;  %v1960_v32 = vld [vmem:[#allocation3 + $0xc0] sm:$0xff]  ;;  %v2452_v24 = vld [vmem:[#allocation3 + $0xca] sm:$0xff]  ;;  %v2449_v27 = vld [vmem:[#allocation3 + $0xb2] sm:$0xff] }
 0x272   : > { %v2450_v23 = vld [vmem:[#allocation3 + $0xba] sm:$0xff] }
 0x273   : > { %1457 = vst.msk [vmem:[#allocation2 + $0x300] sm:$0xff] %vm1360_vm2, %v1358_v36  ;;  %v1359_v39 = vmax.f32 %v1259_v37, 0.0  ;;  %v2009_v41 = vld [vmem:[#allocation3 + $0xd9] sm:$0xff]  ;;  %v9099_v36 = vpack.c.bf16 %v1959_v31, %v1958_v35  ;;  %v9101_v37 = vpack.c.bf16 %v1961_v33, %v1960_v32  ;;  %v9159_v28 = vpack.c.bf16 %v2450_v23, %v2449_v27  ;;  %v2451_v31 = vld [vmem:[#allocation3 + $0xc2] sm:$0xff] }
 0x274   : > { %v1586_v43 = vld [vmem:[#allocation2 + $0x2f0] ss:$2 sm:$0xff]  ;;  %v1684_v45 = vld [vmem:[#allocation2 + $0x2f1] ss:$2 sm:$0xff]  ;;  %v9039_v46 = vpack.c.bf16 %v2009_v41, %v2008_v40  ;;  %v1963_v38 = vld [vmem:[#allocation3 + $0xd8] sm:$0xff]  ;;  %v9161_v32 = vpack.c.bf16 %v2452_v24, %v2451_v31 }
 0x275   : > { %v1734_v47 = vmax.f32 %v1586_v43, %v1684_v45  ;;  %1458 = vst.msk [vmem:[#allocation2 + $0x308] sm:$0xff] %vm1360_vm2, %v1359_v39  ;;  %v2427_v39 = vld [vmem:[#allocation3 + $0x2] sm:$0xff]  ;;  %v2428_v40 = vld [vmem:[#allocation3 + $0xa] sm:$0xff]  ;;  %v2430_v45 = vld [vmem:[#allocation3 + $0x1a] sm:$0xff] }
 0x276   : > { %7348 = vmatmul.mubr.msk.bf16.gmra.mrb[24].mxu1 %vm1360_vm2, %v9039_v46  ;;  %v1962_v41 = vld [vmem:[#allocation3 + $0xd0] sm:$0xff]  ;;  %v2455_v43 = vpack.c.bf16 %v2428_v40, %v2427_v39  ;;  %v8003_v39 = vld [vmem:[%s10207_s3 + $0x48] sm:$0xff]   ;;  %v8004_v40 = vld [vmem:[%s10207_s3 + $0x50] sm:$0xff]  }
 0x277   : > { %v1924_v48 = vrot.slane %v1734_v47, 6  ;;  %7355 = vmatprep.mubr.msk.bf16.mxu1 %vm1360_vm2, %v1964_v42  ;;  %v9107_v42 = vpack.c.bf16 %v1963_v38, %v1962_v41  ;;  %v2453_v35 = vld [vmem:[#allocation3 + $0xd2] sm:$0xff]  ;;  %v2989_v24 = vld [vmem:[#allocation3 + $0x81] sm:$0xff]  ;;  %v2990_v27 = vld [vmem:[#allocation3 + $0x89] sm:$0xff] }
 0x278   : > { %v9238_v31 = vpack.c.bf16 %v2990_v27, %v2989_v24  ;;  %v8056_v24 = vld [vmem:[%s10209_s5 + $0x14] ss:$28 sps:$4 sm:$0xff]   ;;  %v8059_v27 = vld [vmem:[%s10209_s5 + $0x4c] ss:$28 sps:$4 sm:$0xff]  }
 0x279   : > { %v1930_v56 = vmax.f32 %v1732_v15, %v1924_v48  ;;  %v9075_v15 = vpack.c.bf16 %v1947_v11, %v1946_v14  ;;  %v2443_v11 = vld [vmem:[#allocation3 + $0x82] sm:$0xff]  ;;  %v2448_v14 = vld [vmem:[#allocation3 + $0xaa] sm:$0xff] }
 0x27a   : > { %v9145_v12 = vpack.c.bf16 %v2444_v7, %v2443_v11  ;;  %v9153_v20 = vpack.c.bf16 %v2448_v14, %v2447_v19  ;;  %v2983_v7 = vld [vmem:[#allocation3 + $0x51] sm:$0xff]  ;;  %v2985_v11 = vld [vmem:[#allocation3 + $0x61] sm:$0xff]  ;;  %v2988_v14 = vld [vmem:[#allocation3 + $0x79] sm:$0xff] }
 0x27b   : > { %1933 = vst.msk [vmem:[#allocation3 + $0xdd] sm:$0xf0] %vm1763_vm5, %v1930_v56  ;;  %v9230_v17 = vpack.c.bf16 %v2986_v13, %v2985_v11  ;;  %v2987_v19 = vld [vmem:[#allocation3 + $0x71] sm:$0xff] }
 0x27c   : > { %v1588_v55 = vld [vmem:[#allocation2 + $0x300] ss:$2 sm:$0xff]  ;;  %v1686_v34 = vld [vmem:[#allocation2 + $0x301] ss:$2 sm:$0xff]  ;;  %v9232_v23 = vpack.c.bf16 %v2988_v14, %v2987_v19 }
 0x27d   : > { %v1735_v59 = vmax.f32 %v1588_v55, %v1686_v34  ;;  %v2433_v55 = vld [vmem:[#allocation3 + $0x32] sm:$0xff] }
 0x27e   : > { %7356 = vmatmul.mubr.msk.bf16.vlgmr.msra.gmra.mrb[0].mxu1 %vm1360_vm2, %v9046_v57  ;;  %v9127_v34 = vpack.c.bf16 %v2434_v53, %v2433_v55  ;;  %v8005_v55 = vld [vmem:[%s10207_s3 + $0x58] sm:$0xff]   ;;  %v3815_v11 = vld [vmem:[#allocation3 + $0xb1] sm:$0xff]  ;;  %v3824_v19 = vld [vmem:[#allocation3 + $0xf9] sm:$0xff] }
 0x27f   : > { %v1925_v62 = vrot.slane %v1735_v59, 6  ;;  %7384 = vmatpush3.bf16.msra.mxu1 %v8950_v26  ;;  %7359 = vmatprep.mubr.msk.bf16.mxu1 %vm1360_vm2, %v9051_v60  ;;  %v9066_v26 = vpack.c.bf16 %v1943_v5, %v1942_v9 }
 0x280   : > { %7385 = vmatprep.subr.bf16.mxu1 %v7999_v58 }
 0x281   : > { %v1926_v2 = vsel %vm1739_vm3, %v1924_v48, %v1925_v62  ;;  %v1932_v3 = vmax.f32 %v1734_v47, %v1925_v62  ;;  %v2432_v47 = vld [vmem:[#allocation3 + $0x2a] sm:$0xff]  ;;  %v2429_v48 = vld [vmem:[#allocation3 + $0x12] sm:$0xff] }
 0x282   : > { %v1931_v6 = vmax.f32 %v1733_v61, %v1926_v2  ;;  %v9112_v56 = vpack.c.bf16 %v2430_v45, %v2429_v48  ;;  %v9117_v51 = vpack.c.bf16 %v2432_v47, %v2431_v49  ;;  %v2438_v61 = vld [vmem:[#allocation3 + $0x5a] sm:$0xff]  ;;  %v2440_v62 = vld [vmem:[#allocation3 + $0x6a] sm:$0xff] }
 0x283   : > { %1935 = vst.msk [vmem:[#allocation3 + $0xed] sm:$0x3] %vm1766_vm6, %v1932_v3  ;;  %7386 = vmatpush3.bf16.msra.mxu1 %v7999_v58  ;;  %v2435_v58 = vld [vmem:[#allocation3 + $0x42] sm:$0xff]  ;;  %v2454_v33 = vld [vmem:[#allocation3 + $0xda] sm:$0xff]  ;;  %v2975_v47 = vld [vmem:[#allocation3 + $0x11] sm:$0xff] }
 0x284   : > { %1934 = vst.msk [vmem:[#allocation3 + $0xe5] sm:$0xff] %vm1360_vm2, %v1931_v6  ;;  %7415 = vmatprep.subr.bf16.mxu1 %v9061_v0  ;;  %v9129_v59 = vpack.c.bf16 %v2436_v54, %v2435_v58  ;;  %v2439_v3 = vld [vmem:[#allocation3 + $0x62] sm:$0xff]  ;;  %v2442_v6 = vld [vmem:[#allocation3 + $0x7a] sm:$0xff]  ;;  %v9167_v38 = vpack.c.bf16 %v2454_v33, %v2453_v35  ;;  %v2979_v54 = vld [vmem:[#allocation3 + $0x31] sm:$0xff] }
 0x285   : > { %v9137_v5 = vpack.c.bf16 %v2440_v62, %v2439_v3  ;;  %v9143_v9 = vpack.c.bf16 %v2442_v6, %v2441_v8  ;;  %v2977_v49 = vld [vmem:[#allocation3 + $0x21] sm:$0xff]  ;;  %v2984_v3 = vld [vmem:[#allocation3 + $0x59] sm:$0xff] }
 0x286   : > { %7360 = vmatmul.mubr.msk.bf16.gmra.mrb[4].mxu1 %vm1360_vm2, %v9066_v26  ;;  %v2981_v62 = vld [vmem:[#allocation3 + $0x41] sm:$0xff]  ;;  %v9224_v8 = vpack.c.bf16 %v2984_v3, %v2983_v7 }
 0x287   : > { %7363 = vmatprep.mubr.msk.bf16.mxu1 %vm1360_vm2, %v9069_v10  ;;  %v3817_v7 = vld [vmem:[#allocation3 + $0xc1] sm:$0xff] }
 0x28b   : > { %v2728_v41 = vld [vmem:[#allocation3 + $0xe8] sm:$0xff] }
 0x28c   : > { %v3001_v33 = vld [vmem:[#allocation3 + $0xe1] sm:$0xff]  ;;  %v3002_v35 = vld [vmem:[#allocation3 + $0xe9] sm:$0xff] }
 0x28e   : > { %7364 = vmatmul.mubr.msk.bf16.gmra.mrb[8].mxu1 %vm1360_vm2, %v9075_v15 }
 0x28f   : > { %7367 = vmatprep.mubr.msk.bf16.mxu1 %vm1360_vm2, %v9077_v16 }
 0x296   : > { %7368 = vmatmul.mubr.msk.bf16.gmra.mrb[12].mxu1 %vm1360_vm2, %v9083_v21 }
 0x297   : > { %7371 = vmatprep.mubr.msk.bf16.mxu1 %vm1360_vm2, %v9085_v22 }
 0x29e   : > { %7372 = vmatmul.mubr.msk.bf16.gmra.mrb[16].mxu1 %vm1360_vm2, %v9091_v29 }
 0x29f   : > { %7375 = vmatprep.mubr.msk.bf16.mxu1 %vm1360_vm2, %v9093_v30 }
 0x2a6   : > { %7376 = vmatmul.mubr.msk.bf16.gmra.mrb[20].mxu1 %vm1360_vm2, %v9099_v36 }
 0x2a7   : > { %7379 = vmatprep.mubr.msk.bf16.mxu1 %vm1360_vm2, %v9101_v37 }
 0x2ae   : > { %7380 = vmatmul.mubr.msk.bf16.gmra.mrb[24].mxu1 %vm1360_vm2, %v9107_v42 }
 0x2af   : > { %7387 = vmatprep.mubr.msk.bf16.mxu1 %vm1360_vm2, %v2455_v43  ;;  %v2976_v43 = vld [vmem:[#allocation3 + $0x19] sm:$0xff] }
 0x2b0   : > { %v3003_v48 = vpack.c.bf16 %v2976_v43, %v2975_v47  ;;  %v8017_v43 = vld [vmem:[%s10209_s5 + $0x3c] ss:$28 sps:$4 sm:$0xff]  }
 0x2b1   : > { %v8009_v47 = vld [vmem:[%s10207_s3 + $0x78] sm:$0xff]  }
 0x2b6   : > { %7388 = vmatmul.mubr.msk.bf16.vlgmr.msra.gmra.mrb[0].mxu1 %vm1360_vm2, %v9112_v56 }
 0x2b7   : > { %7416 = vmatpush3.bf16.msra.mxu1 %v9061_v0  ;;  %7391 = vmatprep.mubr.msk.bf16.mxu1 %vm1360_vm2, %v9117_v51  ;;  %v2437_v0 = vld [vmem:[#allocation3 + $0x52] sm:$0xff] }
 0x2b8   : > { %7417 = vmatprep.subr.bf16.mxu1 %v8001_v50  ;;  %v9135_v2 = vpack.c.bf16 %v2438_v61, %v2437_v0  ;;  %v8006_v61 = vld [vmem:[%s10207_s3 + $0x60] sm:$0xff]  }
 0x2b9   : > { %v2982_v0 = vld [vmem:[#allocation3 + $0x49] sm:$0xff] }
 0x2ba   : > { %v9222_v6 = vpack.c.bf16 %v2982_v0, %v2981_v62  ;;  %v3811_v62 = vld [vmem:[#allocation3 + $0x91] sm:$0xff] }
 0x2bb   : > { %7418 = vmatpush3.bf16.msra.mxu1 %v8001_v50  ;;  %v2978_v50 = vld [vmem:[#allocation3 + $0x29] sm:$0xff] }
 0x2bc   : > { %7447 = vmatprep.subr.bf16.mxu1 %v8002_v52  ;;  %v9208_v53 = vpack.c.bf16 %v2978_v50, %v2977_v49  ;;  %v8030_v49 = vld [vmem:[%s10209_s5 + $0x150] ss:$28 sps:$4 sm:$0xff]  }
 0x2be   : > { %7392 = vmatmul.mubr.msk.bf16.gmra.mrb[4].mxu1 %vm1360_vm2, %v9127_v34 }
 0x2bf   : > { %7395 = vmatprep.mubr.msk.bf16.mxu1 %vm1360_vm2, %v9129_v59 }
 0x2c6   : > { %7396 = vmatmul.mubr.msk.bf16.gmra.mrb[8].mxu1 %vm1360_vm2, %v9135_v2 }
 0x2c7   : > { %7399 = vmatprep.mubr.msk.bf16.mxu1 %vm1360_vm2, %v9137_v5 }
 0x2ce   : > { %7400 = vmatmul.mubr.msk.bf16.gmra.mrb[12].mxu1 %vm1360_vm2, %v9143_v9 }
 0x2cf   : > { %7403 = vmatprep.mubr.msk.bf16.mxu1 %vm1360_vm2, %v9145_v12 }
 0x2d6   : > { %7404 = vmatmul.mubr.msk.bf16.gmra.mrb[16].mxu1 %vm1360_vm2, %v9151_v18 }
 0x2d7   : > { %7407 = vmatprep.mubr.msk.bf16.mxu1 %vm1360_vm2, %v9153_v20 }
 0x2de   : > { %7408 = vmatmul.mubr.msk.bf16.gmra.mrb[20].mxu1 %vm1360_vm2, %v9159_v28 }
 0x2df   : > { %7411 = vmatprep.mubr.msk.bf16.mxu1 %vm1360_vm2, %v9161_v32 }
 0x2e6   : > { %7412 = vmatmul.mubr.msk.bf16.gmra.mrb[24].mxu1 %vm1360_vm2, %v9167_v38 }
 0x2e7   : > { %7419 = vmatprep.mubr.msk.bf16.mxu1 %vm1360_vm2, %v9046_v57  ;;  %v2727_v57 = vld [vmem:[#allocation3 + $0xe0] sm:$0xff] }
 0x2e8   : > { %v9203_v45 = vpack.c.bf16 %v2728_v41, %v2727_v57  ;;  %v8015_v41 = vld [vmem:[%s10209_s5 + $0x38] ss:$28 sps:$4 sm:$0xff]  }
 0x2ee   : > { %7420 = vmatmul.mubr.msk.bf16.vlgmr.msra.gmra.mrb[0].mxu1 %vm1360_vm2, %v9051_v60 }
 0x2ef   : > { %7448 = vmatpush3.bf16.msra.mxu1 %v8002_v52  ;;  %7423 = vmatprep.mubr.msk.bf16.mxu1 %vm1360_vm2, %v9066_v26  ;;  %v2980_v52 = vld [vmem:[#allocation3 + $0x39] sm:$0xff] }
 0x2f0   : > { %7449 = vmatprep.subr.bf16.mxu1 %v8003_v39  ;;  %v9213_v58 = vpack.c.bf16 %v2980_v52, %v2979_v54  ;;  %v8033_v52 = vld [vmem:[%s10209_s5 + $0x188] ss:$28 sps:$4 sm:$0xff]   ;;  %v8036_v54 = vld [vmem:[%s10209_s5 + $0x1c0] ss:$28 sps:$4 sm:$0xff]  }
 0x2f3   : > { %7450 = vmatpush3.bf16.msra.mxu1 %v8003_v39  ;;  %v9252_v39 = vpack.c.bf16 %v3002_v35, %v3001_v33  ;;  %v8057_v33 = vld [vmem:[%s10209_s5 + $0x48] ss:$28 sps:$4 sm:$0xff]   ;;  %v8068_v35 = vld [vmem:[%s10209_s5 + $0x314] ss:$28 sps:$4 sm:$0xff]  }
 0x2f4   : > { %7479 = vmatprep.subr.bf16.mxu1 %v8004_v40 }
 0x2f6   : > { %7424 = vmatmul.mubr.msk.bf16.gmra.mrb[4].mxu1 %vm1360_vm2, %v9069_v10 }
 0x2f7   : > { %7427 = vmatprep.mubr.msk.bf16.mxu1 %vm1360_vm2, %v9075_v15 }
 0x2fe   : > { %7428 = vmatmul.mubr.msk.bf16.gmra.mrb[8].mxu1 %vm1360_vm2, %v9077_v16 }
 0x2ff   : > { %7431 = vmatprep.mubr.msk.bf16.mxu1 %vm1360_vm2, %v9083_v21 }
 0x306   : > { %7432 = vmatmul.mubr.msk.bf16.gmra.mrb[12].mxu1 %vm1360_vm2, %v9085_v22 }
 0x307   : > { %7435 = vmatprep.mubr.msk.bf16.mxu1 %vm1360_vm2, %v9091_v29 }
 0x30e   : > { %7436 = vmatmul.mubr.msk.bf16.gmra.mrb[16].mxu1 %vm1360_vm2, %v9093_v30 }
 0x30f   : > { %7439 = vmatprep.mubr.msk.bf16.mxu1 %vm1360_vm2, %v9099_v36 }
 0x316   : > { %7440 = vmatmul.mubr.msk.bf16.gmra.mrb[20].mxu1 %vm1360_vm2, %v9101_v37 }
 0x317   : > { %7443 = vmatprep.mubr.msk.bf16.mxu1 %vm1360_vm2, %v9107_v42 }
 0x31e   : > { %7444 = vmatmul.mubr.msk.bf16.gmra.mrb[24].mxu1 %vm1360_vm2, %v9203_v45 }
 0x31f   : > { %7451 = vmatprep.mubr.msk.bf16.mxu1 %vm1360_vm2, %v3003_v48  ;;  %v3550_v48 = vld [vmem:[#allocation3 + $0xf8] sm:$0xff] }
 0x326   : > { %7452 = vmatmul.mubr.msk.bf16.vlgmr.msra.gmra.mrb[0].mxu1 %vm1360_vm2, %v9208_v53 }
 0x327   : > { %7480 = vmatpush3.bf16.msra.mxu1 %v8004_v40  ;;  %7455 = vmatprep.mubr.msk.bf16.mxu1 %vm1360_vm2, %v9213_v58  ;;  %v3276_v40 = vld [vmem:[#allocation3 + $0xea] sm:$0xff] }
 0x328   : > { %7481 = vmatprep.subr.bf16.mxu1 %v8005_v55 }
 0x32b   : > { %7482 = vmatpush3.bf16.msra.mxu1 %v8005_v55  ;;  %v8011_v55 = vld [vmem:[%s10207_s3 + $0x88] sm:$0xff]  }
 0x32c   : > { %7511 = vmatprep.subr.bf16.mxu1 %v8006_v61 }
 0x32e   : > { %7456 = vmatmul.mubr.msk.bf16.gmra.mrb[4].mxu1 %vm1360_vm2, %v9222_v6 }
 0x32f   : > { %7459 = vmatprep.mubr.msk.bf16.mxu1 %vm1360_vm2, %v9224_v8 }
 0x336   : > { %7460 = vmatmul.mubr.msk.bf16.gmra.mrb[8].mxu1 %vm1360_vm2, %v9230_v17 }
 0x337   : > { %7463 = vmatprep.mubr.msk.bf16.mxu1 %vm1360_vm2, %v9232_v23 }
 0x33e   : > { %7464 = vmatmul.mubr.msk.bf16.gmra.mrb[12].mxu1 %vm1360_vm2, %v9238_v31 }
 0x33f   : > { %7467 = vmatprep.mubr.msk.bf16.mxu1 %vm1360_vm2, %v8945_v25  ;;  %v8007_v25 = vld [vmem:[%s10207_s3 + $0x68] sm:$0xff]  }
 0x346   : > { %7468 = vmatmul.mubr.msk.bf16.gmra.mrb[16].mxu1 %vm1360_vm2, %v8971_v4  ;;  %v8008_v4 = vld [vmem:[%s10207_s3 + $0x70] sm:$0xff]  }
 0x347   : > { %7471 = vmatprep.mubr.msk.bf16.mxu1 %vm1360_vm2, %v8995_v63  ;;  %v8012_v63 = vld [vmem:[%s10209_s5] ss:$28 sps:$4 sm:$0xff]  }
 0x34e   : > { %7472 = vmatmul.mubr.msk.bf16.gmra.mrb[20].mxu1 %vm1360_vm2, %v9015_v44  ;;  %v8014_v44 = vld [vmem:[%s10209_s5 + $0x4] ss:$28 sps:$4 sm:$0xff]  }
 0x34f   : > { %7475 = vmatprep.mubr.msk.bf16.mxu1 %vm1360_vm2, %v9039_v46  ;;  %5797 = vmatprep.subr.bf16.mxu0 %v8014_v44  ;;  %v8063_v44 = vld [vmem:[%s10209_s5 + $0xb8] ss:$28 sps:$4 sm:$0xff]  }
 0x350   : > { %5798 = vmatpush1.bf16.msra.mxu0 %v8012_v63  ;;  %v8065_v63 = vld [vmem:[%s10209_s5 + $0xbc] ss:$28 sps:$4 sm:$0xff]  }
 0x351   : > { %5799 = vmatprep.subr.bf16.mxu0 %v8017_v43  ;;  %v8077_v43 = vld [vmem:[%s10209_s5 + $0x164] ss:$28 sps:$4 sm:$0xff]  }
 0x354   : > { %5800 = vmatpush1.bf16.msra.mxu0 %v8015_v41  ;;  %v8072_v41 = vld [vmem:[%s10209_s5 + $0x128] ss:$28 sps:$4 sm:$0xff]  }
 0x356   : > { %7476 = vmatmul.mubr.msk.bf16.gmra.mrb[24].mxu1 %vm1360_vm2, %v9252_v39 }
 0x357   : > { %7483 = vmatprep.mubr.msk.bf16.mxu1 %vm1360_vm2, %v9112_v56  ;;  %v3275_v56 = vld [vmem:[#allocation3 + $0xe2] sm:$0xff] }
 0x358   : > { %v9294_v57 = vpack.c.bf16 %v3276_v40, %v3275_v56  ;;  %v8071_v56 = vld [vmem:[%s10209_s5 + $0xf4] ss:$28 sps:$4 sm:$0xff]  }
 0x359   : > { %v8069_v40 = vld [vmem:[%s10209_s5 + $0xf0] ss:$28 sps:$4 sm:$0xff]  }
 0x35e   : > { %7484 = vmatmul.mubr.msk.bf16.vlgmr.msra.gmra.mrb[0].mxu1 %vm1360_vm2, %v9117_v51 }
 0x35f   : > { %7512 = vmatpush3.bf16.msra.mxu1 %v8006_v61  ;;  %7487 = vmatprep.mubr.msk.bf16.mxu1 %vm1360_vm2, %v9127_v34  ;;  %v3814_v61 = vld [vmem:[#allocation3 + $0xa9] sm:$0xff] }
 0x360   : > { %7513 = vmatprep.subr.bf16.mxu1 %v8007_v25 }
 0x363   : > { %7514 = vmatpush3.bf16.msra.mxu1 %v8007_v25  ;;  %v8066_v25 = vld [vmem:[%s10209_s5 + $0x310] ss:$28 sps:$4 sm:$0xff]  }
 0x364   : > { %7543 = vmatprep.subr.bf16.mxu1 %v8008_v4 }
 0x366   : > { %7488 = vmatmul.mubr.msk.bf16.gmra.mrb[4].mxu1 %vm1360_vm2, %v9129_v59 }
 0x367   : > { %7491 = vmatprep.mubr.msk.bf16.mxu1 %vm1360_vm2, %v9135_v2 }
 0x36e   : > { %7492 = vmatmul.mubr.msk.bf16.gmra.mrb[8].mxu1 %vm1360_vm2, %v9137_v5 }
 0x36f   : > { %7495 = vmatprep.mubr.msk.bf16.mxu1 %vm1360_vm2, %v9143_v9 }
 0x376   : > { %7496 = vmatmul.mubr.msk.bf16.gmra.mrb[12].mxu1 %vm1360_vm2, %v9145_v12 }
 0x377   : > { %7499 = vmatprep.mubr.msk.bf16.mxu1 %vm1360_vm2, %v9151_v18 }
 0x37e   : > { %7500 = vmatmul.mubr.msk.bf16.gmra.mrb[16].mxu1 %vm1360_vm2, %v9153_v20 }
 0x37f   : > { %7503 = vmatprep.mubr.msk.bf16.mxu1 %vm1360_vm2, %v9159_v28 }
 0x386   : > { %7504 = vmatmul.mubr.msk.bf16.gmra.mrb[20].mxu1 %vm1360_vm2, %v9161_v32 }
 0x387   : > { %7507 = vmatprep.mubr.msk.bf16.mxu1 %vm1360_vm2, %v9167_v38 }
 0x38e   : > { %7508 = vmatmul.mubr.msk.bf16.gmra.mrb[24].mxu1 %vm1360_vm2, %v9294_v57 }
 0x38f   : > { %7515 = vmatprep.mubr.msk.bf16.mxu1 %vm1360_vm2, %v9051_v60  ;;  %v8010_v60 = vld [vmem:[%s10207_s3 + $0x80] sm:$0xff]  }
 0x396   : > { %7516 = vmatmul.mubr.msk.bf16.vlgmr.msra.gmra.mrb[0].mxu1 %vm1360_vm2, %v9066_v26  ;;  %v8018_v26 = vld [vmem:[%s10209_s5 + $0x70] ss:$28 sps:$4 sm:$0xff]  }
 0x397   : > { %7544 = vmatpush3.bf16.msra.mxu1 %v8008_v4  ;;  %7519 = vmatprep.mubr.msk.bf16.mxu1 %vm1360_vm2, %v9069_v10  ;;  %v8020_v10 = vld [vmem:[%s10209_s5 + $0x74] ss:$28 sps:$4 sm:$0xff]   ;;  %v8060_v4 = vld [vmem:[%s10209_s5 + $0x80] ss:$28 sps:$4 sm:$0xff]  }
 0x398   : > { %7545 = vmatprep.subr.bf16.mxu1 %v8009_v47  ;;  %5801 = vmatprep.subr.bf16.mxu0 %v8020_v10  ;;  %v8083_v10 = vld [vmem:[%s10209_s5 + $0x1d4] ss:$28 sps:$4 sm:$0xff]  }
 0x399   : > { %5802 = vmatpush1.bf16.msra.mxu0 %v8018_v26  ;;  %v8078_v26 = vld [vmem:[%s10209_s5 + $0x198] ss:$28 sps:$4 sm:$0xff]  }
 0x39b   : > { %7546 = vmatpush3.bf16.msra.mxu1 %v8009_v47  ;;  %v8075_v47 = vld [vmem:[%s10209_s5 + $0x160] ss:$28 sps:$4 sm:$0xff]  }
 0x39c   : > { %7575 = vmatprep.subr.bf16.mxu1 %v8010_v60 }
 0x39e   : > { %7520 = vmatmul.mubr.msk.bf16.gmra.mrb[4].mxu1 %vm1360_vm2, %v9075_v15  ;;  %v8021_v15 = vld [vmem:[%s10209_s5 + $0xa8] ss:$28 sps:$4 sm:$0xff]  }
 0x39f   : > { %7523 = vmatprep.mubr.msk.bf16.mxu1 %vm1360_vm2, %v9077_v16  ;;  %v8023_v16 = vld [vmem:[%s10209_s5 + $0xac] ss:$28 sps:$4 sm:$0xff]  }
 0x3a0   : > { %5803 = vmatprep.subr.bf16.mxu0 %v8023_v16  ;;  %v8086_v16 = vld [vmem:[%s10209_s5 + $0x20c] ss:$28 sps:$4 sm:$0xff]  }
 0x3a1   : > { %5804 = vmatpush1.bf16.msra.mxu0 %v8021_v15  ;;  %v8081_v15 = vld [vmem:[%s10209_s5 + $0x1d0] ss:$28 sps:$4 sm:$0xff]  }
 0x3a6   : > { %7524 = vmatmul.mubr.msk.bf16.gmra.mrb[8].mxu1 %vm1360_vm2, %v9083_v21  ;;  %v8026_v21 = vld [vmem:[%s10209_s5 + $0xe4] ss:$28 sps:$4 sm:$0xff]  }
 0x3a7   : > { %7527 = vmatprep.mubr.msk.bf16.mxu1 %vm1360_vm2, %v9085_v22  ;;  %v8024_v22 = vld [vmem:[%s10209_s5 + $0xe0] ss:$28 sps:$4 sm:$0xff]   ;;  %5805 = vmatprep.subr.bf16.mxu0 %v8026_v21  ;;  %v8084_v21 = vld [vmem:[%s10209_s5 + $0x208] ss:$28 sps:$4 sm:$0xff]  }
 0x3a8   : > { %5806 = vmatpush1.bf16.msra.mxu0 %v8024_v22  ;;  %v9531_v22 = vld [vmem:[%s10208_s4] ss:$0 sm:$0xff] }
 0x3ae   : > { %7528 = vmatmul.mubr.msk.bf16.gmra.mrb[12].mxu1 %vm1360_vm2, %v9091_v29  ;;  %v8029_v29 = vld [vmem:[%s10209_s5 + $0x11c] ss:$28 sps:$4 sm:$0xff]  }
 0x3af   : > { %7531 = vmatprep.mubr.msk.bf16.mxu1 %vm1360_vm2, %v9093_v30  ;;  %v8027_v30 = vld [vmem:[%s10209_s5 + $0x118] ss:$28 sps:$4 sm:$0xff]   ;;  %5807 = vmatprep.subr.bf16.mxu0 %v8029_v29 }
 0x3b0   : > { %5808 = vmatpush1.bf16.msra.mxu0 %v8027_v30 }
 0x3b6   : > { %7532 = vmatmul.mubr.msk.bf16.gmra.mrb[16].mxu1 %vm1360_vm2, %v9099_v36  ;;  %v8032_v36 = vld [vmem:[%s10209_s5 + $0x154] ss:$28 sps:$4 sm:$0xff]  }
 0x3b7   : > { %7535 = vmatprep.mubr.msk.bf16.mxu1 %vm1360_vm2, %v9101_v37  ;;  %v3549_v37 = vld [vmem:[#allocation3 + $0xf0] sm:$0xff]  ;;  %5809 = vmatprep.subr.bf16.mxu0 %v8032_v36 }
 0x3b8   : > { %v3564_v50 = vpack.c.bf16 %v3550_v48, %v3549_v37  ;;  %5810 = vmatpush1.bf16.msra.mxu0 %v8030_v49 }
 0x3be   : > { %7536 = vmatmul.mubr.msk.bf16.gmra.mrb[20].mxu1 %vm1360_vm2, %v9107_v42  ;;  %v8035_v42 = vld [vmem:[%s10209_s5 + $0x18c] ss:$28 sps:$4 sm:$0xff]  }
 0x3bf   : > { %7539 = vmatprep.mubr.msk.bf16.mxu1 %vm1360_vm2, %v9203_v45  ;;  %5811 = vmatprep.subr.bf16.mxu0 %v8035_v42  ;;  %v8038_v45 = vld [vmem:[%s10209_s5 + $0x1c4] ss:$28 sps:$4 sm:$0xff]  }
 0x3c0   : > { %5812 = vmatpush1.bf16.msra.mxu0 %v8033_v52 }
 0x3c1   : > { %5813 = vmatprep.subr.bf16.mxu0 %v8038_v45 }
 0x3c4   : > { %5814 = vmatpush1.bf16.msra.mxu0 %v8036_v54 }
 0x3c6   : > { %7540 = vmatmul.mubr.msk.bf16.gmra.mrb[24].mxu1 %vm1360_vm2, %v3564_v50 }
 0x3c7   : > { %7547 = vmatprep.mubr.msk.bf16.mxu1 %vm1360_vm2, %v9208_v53  ;;  %v3812_v53 = vld [vmem:[#allocation3 + $0x99] sm:$0xff] }
 0x3c8   : > { %v3832_v0 = vpack.c.bf16 %v3812_v53, %v3811_v62 }
 0x3ce   : > { %7548 = vmatmul.mubr.msk.bf16.vlgmr.msra.gmra.mrb[0].mxu1 %vm1360_vm2, %v9213_v58  ;;  %v3813_v58 = vld [vmem:[#allocation3 + $0xa1] sm:$0xff] }
 0x3cf   : > { %7576 = vmatpush3.bf16.msra.mxu1 %v8010_v60  ;;  %7551 = vmatprep.mubr.msk.bf16.mxu1 %vm1360_vm2, %v9222_v6  ;;  %v3833_v3 = vpack.c.bf16 %v3814_v61, %v3813_v58  ;;  %v3816_v6 = vld [vmem:[#allocation3 + $0xb9] sm:$0xff]  ;;  %v8080_v60 = vld [vmem:[%s10209_s5 + $0x19c] ss:$28 sps:$4 sm:$0xff]  }
 0x3d0   : > { %7577 = vmatprep.subr.bf16.mxu1 %v8011_v55  ;;  %v3834_v13 = vpack.c.bf16 %v3816_v6, %v3815_v11 }
 0x3d3   : > { %7578 = vmatpush3.bf16.msra.mxu1 %v8011_v55 }
 0x3d4   : > { %5961 = vmatprep.subr.bf16.mxu1 %v8056_v24 }
 0x3d6   : > { %7552 = vmatmul.mubr.msk.bf16.gmra.mrb[4].mxu1 %vm1360_vm2, %v9224_v8  ;;  %v3818_v8 = vld [vmem:[#allocation3 + $0xc9] sm:$0xff] }
 0x3d7   : > { %7555 = vmatprep.mubr.msk.bf16.mxu1 %vm1360_vm2, %v9230_v17  ;;  %v3835_v14 = vpack.c.bf16 %v3818_v8, %v3817_v7  ;;  %v3823_v17 = vld [vmem:[#allocation3 + $0xf1] sm:$0xff] }
 0x3de   : > { %7556 = vmatmul.mubr.msk.bf16.gmra.mrb[8].mxu1 %vm1360_vm2, %v9232_v23  ;;  %v3838_v23 = vpack.c.bf16 %v3824_v19, %v3823_v17 }
 0x3df   : > { %7559 = vmatprep.mubr.msk.bf16.mxu1 %vm1360_vm2, %v9238_v31  ;;  %v8051_v31 = vld [vmem:[%s10209_s5 + $0x2d8] ss:$28 sps:$4 sm:$0xff]  }
 0x3e6   : > { %7560 = vmatmul.mubr.msk.bf16.gmra.mrb[12].mxu1 %vm1360_vm2, %v3832_v0 }
 0x3e7   : > { %7563 = vmatprep.mubr.msk.bf16.mxu1 %vm1360_vm2, %v3833_v3 }
 0x3ee   : > { %7564 = vmatmul.mubr.msk.bf16.gmra.mrb[16].mxu1 %vm1360_vm2, %v3834_v13 }
 0x3ef   : > { %7567 = vmatprep.mubr.msk.bf16.mxu1 %vm1360_vm2, %v3835_v14 }
 0x3f6   : > { %7568 = vmatmul.mubr.msk.bf16.gmra.mrb[20].mxu1 %vm1360_vm2, %v9039_v46  ;;  %v4097_v46 = vld [vmem:[#allocation3 + $0xf2] sm:$0xff] }
 0x3f7   : > { %7571 = vmatprep.mubr.msk.bf16.mxu1 %vm1360_vm2, %v9252_v39  ;;  %v8062_v39 = vld [vmem:[%s10209_s5 + $0x84] ss:$28 sps:$4 sm:$0xff]  }
 0x3fe   : > { %7572 = vmatmul.mubr.msk.bf16.gmra.mrb[24].mxu1 %vm1360_vm2, %v3838_v23 }
 0x3ff   : > { %7579 = vmatprep.mubr.msk.bf16.mxu1 %vm1360_vm2, %v9117_v51  ;;  %v4098_v51 = vld [vmem:[#allocation3 + $0xfa] sm:$0xff] }
 0x406   : > { %7580 = vmatmul.mubr.msk.bf16.vlgmr.msra.gmra.mrb[0].mxu1 %vm1360_vm2, %v9127_v34  ;;  %v4112_v34 = vpack.c.bf16 %v4098_v51, %v4097_v46 }
 0x407   : > { %7583 = vmatprep.mubr.msk.bf16.mxu1 %vm1360_vm2, %v9129_v59  ;;  %v8039_v59 = vld [vmem:[%s10209_s5 + $0x1f8] ss:$28 sps:$4 sm:$0xff]  }
 0x40e   : > { %7584 = vmatmul.mubr.msk.bf16.gmra.mrb[4].mxu1 %vm1360_vm2, %v9135_v2  ;;  %v8041_v2 = vld [vmem:[%s10209_s5 + $0x1fc] ss:$28 sps:$4 sm:$0xff]  }
 0x40f   : > { %7587 = vmatprep.mubr.msk.bf16.mxu1 %vm1360_vm2, %v9137_v5  ;;  %5815 = vmatprep.subr.bf16.mxu0 %v8041_v2  ;;  %v8042_v5 = vld [vmem:[%s10209_s5 + $0x230] ss:$28 sps:$4 sm:$0xff]  }
 0x410   : > { %5816 = vmatpush1.bf16.msra.mxu0 %v8039_v59 }
 0x416   : > { %7588 = vmatmul.mubr.msk.bf16.gmra.mrb[8].mxu1 %vm1360_vm2, %v9143_v9  ;;  %v8044_v9 = vld [vmem:[%s10209_s5 + $0x234] ss:$28 sps:$4 sm:$0xff]  }
 0x417   : > { %7591 = vmatprep.mubr.msk.bf16.mxu1 %vm1360_vm2, %v9145_v12  ;;  %5817 = vmatprep.subr.bf16.mxu0 %v8044_v9  ;;  %v8045_v12 = vld [vmem:[%s10209_s5 + $0x268] ss:$28 sps:$4 sm:$0xff]  }
 0x418   : > { %5818 = vmatpush1.bf16.msra.mxu0 %v8042_v5  ;;  %v8087_v9 = vld [vmem:[%s10209_s5 + $0x348] ss:$28 sps:$4 sm:$0xff]  }
 0x41e   : > { %7592 = vmatmul.mubr.msk.bf16.gmra.mrb[12].mxu1 %vm1360_vm2, %v9151_v18  ;;  %v8047_v18 = vld [vmem:[%s10209_s5 + $0x26c] ss:$28 sps:$4 sm:$0xff]  }
 0x41f   : > { %7595 = vmatprep.mubr.msk.bf16.mxu1 %vm1360_vm2, %v9153_v20  ;;  %5819 = vmatprep.subr.bf16.mxu0 %v8047_v18  ;;  %v8048_v20 = vld [vmem:[%s10209_s5 + $0x2a0] ss:$28 sps:$4 sm:$0xff]  }
 0x420   : > { %5820 = vmatpush1.bf16.msra.mxu0 %v8045_v12  ;;  %v8089_v12 = vld [vmem:[%s10209_s5 + $0x34c] ss:$28 sps:$4 sm:$0xff]  }
 0x426   : > { %7596 = vmatmul.mubr.msk.bf16.gmra.mrb[16].mxu1 %vm1360_vm2, %v9159_v28  ;;  %v8050_v28 = vld [vmem:[%s10209_s5 + $0x2a4] ss:$28 sps:$4 sm:$0xff]  }
 0x427   : > { %7599 = vmatprep.mubr.msk.bf16.mxu1 %vm1360_vm2, %v9161_v32  ;;  %v8053_v32 = vld [vmem:[%s10209_s5 + $0x2dc] ss:$28 sps:$4 sm:$0xff]   ;;  %5821 = vmatprep.subr.bf16.mxu0 %v8050_v28 }
 0x428   : > { %5822 = vmatpush1.bf16.msra.mxu0 %v8048_v20 }
 0x429   : > { %5823 = vmatprep.subr.bf16.mxu0 %v8053_v32  ;;  %v8090_v32 = vld [vmem:[%s10209_s5 + $0x240] ss:$28 sps:$4 sm:$0xff]  }
 0x42c   : > { %5824 = vmatpush1.bf16.msra.mxu0 %v8051_v31 }
 0x42d   : > { %5825 = vmatprep.subr.bf16.mxu0 %v8068_v35 }
 0x42e   : > { %7600 = vmatmul.mubr.msk.bf16.gmra.mrb[20].mxu1 %vm1360_vm2, %v9167_v38  ;;  %v8054_v38 = vld [vmem:[%s10209_s5 + $0x10] ss:$28 sps:$4 sm:$0xff]  }
 0x42f   : > { %7603 = vmatprep.mubr.msk.bf16.mxu1 %vm1360_vm2, %v9294_v57  ;;  %5962 = vmatpush1.bf16.msra.mxu1 %v8054_v38  ;;  %v8074_v57 = vld [vmem:[%s10209_s5 + $0x12c] ss:$28 sps:$4 sm:$0xff]   ;;  %v8092_v38 = vld [vmem:[%s10209_s5 + $0x244] ss:$28 sps:$4 sm:$0xff]  }
 0x430   : > { %5963 = vmatprep.subr.bf16.mxu1 %v8059_v27  ;;  %5826 = vmatpush1.bf16.msra.mxu0 %v8066_v25 }
 0x431   : > { %5827 = vmatprep.subr.bf16.mxu0 %v8089_v12  ;;  %v8105_v12 = vld [vmem:[%s10209_s5 + $0x358] ss:$28 sps:$4 sm:$0xff]  }
 0x433   : > { %5964 = vmatpush1.bf16.msra.mxu1 %v8057_v33  ;;  %v8095_v33 = vld [vmem:[%s10209_s5 + $0x27c] ss:$28 sps:$4 sm:$0xff]  }
 0x434   : > { %5965 = vmatprep.subr.bf16.mxu1 %v8062_v39  ;;  %5828 = vmatpush1.bf16.msra.mxu0 %v8087_v9 }
 0x436   : > { %7604 = vmatmul.mubr.msk.bf16.gmra.mrb[24].mxu1 %vm1360_vm2, %v4112_v34 }
 0x437   : > { %5966 = vmatpush1.bf16.msra.mxu1 %v8060_v4 }
 0x438   : > { %5967 = vmatprep.subr.bf16.mxu1 %v8065_v63  ;;  %v8093_v63 = vld [vmem:[%s10209_s5 + $0x278] ss:$28 sps:$4 sm:$0xff]  }
 0x43b   : > { %5968 = vmatpush1.bf16.msra.mxu1 %v8063_v44  ;;  %v8098_v44 = vld [vmem:[%s10209_s5 + $0x2b4] ss:$28 sps:$4 sm:$0xff]  }
 0x43c   : > { %5969 = vmatprep.subr.bf16.mxu1 %v8071_v56 }
 0x43f   : > { %5970 = vmatpush1.bf16.msra.mxu1 %v8069_v40 }
 0x440   : > { %5971 = vmatprep.subr.bf16.mxu1 %v8074_v57 }
 0x443   : > { %5972 = vmatpush1.bf16.msra.mxu1 %v8072_v41 }
 0x444   : > { %5973 = vmatprep.subr.bf16.mxu1 %v8077_v43 }
 0x447   : > { %5974 = vmatpush1.bf16.msra.mxu1 %v8075_v47 }
 0x448   : > { %5975 = vmatprep.subr.bf16.mxu1 %v8080_v60 }
 0x44b   : > { %5976 = vmatpush1.bf16.msra.mxu1 %v8078_v26 }
 0x44c   : > { %5977 = vmatprep.subr.bf16.mxu1 %v8083_v10 }
 0x44f   : > { %5978 = vmatpush1.bf16.msra.mxu1 %v8081_v15 }
 0x450   : > { %5979 = vmatprep.subr.bf16.mxu1 %v8086_v16  ;;  %v8096_v16 = vld [vmem:[%s10209_s5 + $0x2b0] ss:$28 sps:$4 sm:$0xff]  }
 0x453   : > { %5980 = vmatpush1.bf16.msra.mxu1 %v8084_v21 }
 0x454   : > { %5981 = vmatprep.subr.bf16.mxu1 %v8092_v38 }
 0x457   : > { %5982 = vmatpush1.bf16.msra.mxu1 %v8090_v32 }
 0x458   : > { %5983 = vmatprep.subr.bf16.mxu1 %v8095_v33 }
 0x45b   : > { %5984 = vmatpush1.bf16.msra.mxu1 %v8093_v63 }
 0x45c   : > { %5985 = vmatprep.subr.bf16.mxu1 %v8098_v44 }
 0x45f   : > { %5986 = vmatpush1.bf16.msra.mxu1 %v8096_v16 }
 0x4d9   : > { %v7581_v29 = vpop.f32.mrb[0].mxu1 }
 0x4da   : > { %v4354_v30 = vadd.f32 %v7581_v29, %v9531_v22  ;;  %v4206_v36 = vpop.f32.mrb[1].mxu1 }
 0x4db   : > { %v4352_v37 = vadd.f32 %v9531_v22, %v4206_v36  ;;  %v7582_v48 = vpop.f32.mrb[2].mxu1  ;;  %v8101_v36 = vld [vmem:[%s10209_s5 + $0x2ec] ss:$28 sps:$4 sm:$0xff]  }
 0x4dc   : > { %v4382_v49 = vmax.f32 %v4354_v30, 0.0  ;;  %v4355_v50 = vadd.f32 %v7582_v48, %v9531_v22  ;;  %v4209_v42 = vpop.f32.mrb[3].mxu1  ;;  %5987 = vmatprep.subr.bf16.mxu1 %v8101_v36 }
 0x4dd   : > { %v4380_v52 = vmax.f32 %v4352_v37, 0.0  ;;  %v4353_v45 = vadd.f32 %v9531_v22, %v4209_v42 }
 0x4de   : > { %4411 = vst.msk [vmem:[#allocation4 + $0x10] sm:$0xff] %vm4408_vm7, %v4382_v49  ;;  %v4383_v54 = vmax.f32 %v4355_v50, 0.0 }
 0x4df   : > { %4409 = vst.msk [vmem:[#allocation4] sm:$0xff] %vm4408_vm7, %v4380_v52  ;;  %v4381_v55 = vmax.f32 %v4353_v45, 0.0 }
 0x4e0   : > { %4412 = vst.msk [vmem:[#allocation4 + $0x18] sm:$0xff] %vm4408_vm7, %v4383_v54  ;;  %v8099_v54 = vld [vmem:[%s10209_s5 + $0x2e8] ss:$28 sps:$4 sm:$0xff]  }
 0x4e1   : > { %4410 = vst.msk [vmem:[#allocation4 + $0x8] sm:$0xff] %vm4408_vm7, %v4381_v55  ;;  %v7585_v53 = vpop.f32.mrb[4].mxu1  ;;  %5988 = vmatpush1.bf16.msra.mxu1 %v8099_v54 }
 0x4e2   : > { %v4358_v58 = vadd.f32 %v7585_v53, %v9531_v22  ;;  %v4222_v61 = vpop.f32.mrb[5].mxu1 }
 0x4e3   : > { %v4356_v62 = vadd.f32 %v9531_v22, %v4222_v61  ;;  %v7586_v0 = vpop.f32.mrb[6].mxu1 }
 0x4e4   : > { %v4386_v3 = vmax.f32 %v4358_v58, 0.0  ;;  %v4359_v6 = vadd.f32 %v7586_v0, %v9531_v22  ;;  %v4225_v7 = vpop.f32.mrb[7].mxu1 }
 0x4e5   : > { %v4384_v8 = vmax.f32 %v4356_v62, 0.0  ;;  %v4357_v11 = vadd.f32 %v9531_v22, %v4225_v7 }
 0x4e6   : > { %4415 = vst.msk [vmem:[#allocation4 + $0x30] sm:$0xff] %vm4408_vm7, %v4386_v3  ;;  %v4387_v13 = vmax.f32 %v4359_v6, 0.0 }
 0x4e7   : > { %4413 = vst.msk [vmem:[#allocation4 + $0x20] sm:$0xff] %vm4408_vm7, %v4384_v8  ;;  %v4385_v14 = vmax.f32 %v4357_v11, 0.0  ;;  %v4439_v17 = vld [vmem:[#allocation4 + $0x10] ss:$2 sm:$0xff]  ;;  %v4467_v19 = vld [vmem:[#allocation4 + $0x11] ss:$2 sm:$0xff] }
 0x4e8   : > { %4416 = vst.msk [vmem:[#allocation4 + $0x38] sm:$0xff] %vm4408_vm7, %v4387_v13  ;;  %v4437_v23 = vld [vmem:[#allocation4] ss:$2 sm:$0xff]  ;;  %v4465_v46 = vld [vmem:[#allocation4 + $0x1] ss:$2 sm:$0xff]  ;;  %v4493_v51 = vmax.f32 %v4439_v17, %v4467_v19 }
 0x4e9   : > { %4414 = vst.msk [vmem:[#allocation4 + $0x28] sm:$0xff] %vm4408_vm7, %v4385_v14  ;;  %v7589_v34 = vpop.f32.mrb[8].mxu1  ;;  %v4492_v59 = vmax.f32 %v4437_v23, %v4465_v46  ;;  %v8102_v11 = vld [vmem:[%s10209_s5 + $0x320] ss:$28 sps:$4 sm:$0xff]  }
 0x4ea   : > { %v4362_v2 = vadd.f32 %v7589_v34, %v9531_v22  ;;  %v4238_v5 = vpop.f32.mrb[9].mxu1  ;;  %v8104_v13 = vld [vmem:[%s10209_s5 + $0x324] ss:$28 sps:$4 sm:$0xff]   ;;  %v8107_v23 = vld [vmem:[%s10209_s5 + $0x35c] ss:$28 sps:$4 sm:$0xff]  }
 0x4eb   : > { %v4360_v18 = vadd.f32 %v9531_v22, %v4238_v5  ;;  %v7590_v20 = vpop.f32.mrb[10].mxu1  ;;  %v4506_v28 = vmax.f32 %v4492_v59, %v4493_v51  ;;  %5989 = vmatprep.subr.bf16.mxu1 %v8104_v13 }
 0x4ec   : > { %v4390_v24 = vmax.f32 %v4362_v2, 0.0  ;;  %v4363_v27 = vadd.f32 %v7590_v20, %v9531_v22  ;;  %v4241_v31 = vpop.f32.mrb[11].mxu1  ;;  %5990 = vmatpush1.bf16.msra.mxu1 %v8102_v11 }
 0x4ed   : > { %v4388_v35 = vmax.f32 %v4360_v18, 0.0  ;;  %v4361_v39 = vadd.f32 %v9531_v22, %v4241_v31  ;;  %v4507_v25 = vpack.c.bf16 %v4506_v28, %v4506_v28  ;;  %5991 = vmatprep.subr.bf16.mxu1 %v8107_v23 }
 0x4ee   : > { %4419 = vst.msk [vmem:[#allocation4 + $0x50] sm:$0xff] %vm4408_vm7, %v4390_v24  ;;  %v4391_v4 = vmax.f32 %v4363_v27, 0.0 }
 0x4ef   : > { %4417 = vst.msk [vmem:[#allocation4 + $0x40] sm:$0xff] %vm4408_vm7, %v4388_v35  ;;  %v4389_v56 = vmax.f32 %v4361_v39, 0.0  ;;  %v4443_v40 = vld [vmem:[#allocation4 + $0x30] ss:$2 sm:$0xff]  ;;  %v4471_v57 = vld [vmem:[#allocation4 + $0x31] ss:$2 sm:$0xff] }
 0x4f0   : > { %4509 = vst.msk [vmem:[#allocation5] sm:$0xf] %vm4508_vm8, %v4507_v25  ;;  %v4441_v41 = vld [vmem:[#allocation4 + $0x20] ss:$2 sm:$0xff]  ;;  %v4469_v43 = vld [vmem:[#allocation4 + $0x21] ss:$2 sm:$0xff]  ;;  %v4495_v47 = vmax.f32 %v4443_v40, %v4471_v57  ;;  %5992 = vmatpush1.bf16.msra.mxu1 %v8105_v12 }
 0x4f1   : > { %4420 = vst.msk [vmem:[#allocation4 + $0x58] sm:$0xff] %vm4408_vm7, %v4391_v4  ;;  %4418 = vst.msk [vmem:[#allocation4 + $0x48] sm:$0xff] %vm4408_vm7, %v4389_v56  ;;  %v7593_v60 = vpop.f32.mrb[12].mxu1  ;;  %v4494_v26 = vmax.f32 %v4441_v41, %v4469_v43  ;;  %v8112_v40 = vld [vmem:[%s10209_s5 + $0x384] ss:$28 sps:$4 sm:$0xff]  }
 0x4f2   : > { %v4366_v10 = vadd.f32 %v7593_v60, %v9531_v22  ;;  %v4254_v15 = vpop.f32.mrb[13].mxu1  ;;  %5838 = vmatprep.subr.bf16.mxu0 %v8112_v40  ;;  %v8136_v40 = vld [vmem:[%s10209_s5 + $0x464] ss:$28 sps:$4 sm:$0xff]  }
 0x4f3   : > { %v4364_v21 = vadd.f32 %v9531_v22, %v4254_v15  ;;  %v7594_v29 = vpop.f32.mrb[14].mxu1  ;;  %v4510_v30 = vmax.f32 %v4494_v26, %v4495_v47  ;;  %v8115_v47 = vld [vmem:[%s10209_s5 + $0x394] ss:$28 sps:$4 sm:$0xff]  }
 0x4f4   : > { %v4394_v37 = vmax.f32 %v4366_v10, 0.0  ;;  %v4367_v48 = vadd.f32 %v7594_v29, %v9531_v22  ;;  %v4257_v49 = vpop.f32.mrb[15].mxu1  ;;  %6002 = vmatprep.subr.bf16.mxu1 %v8115_v47 }
 0x4f5   : > { %v4392_v50 = vmax.f32 %v4364_v21, 0.0  ;;  %v4365_v42 = vadd.f32 %v9531_v22, %v4257_v49  ;;  %v6885_v52 = vpack.c.bf16 %v4510_v30, %v4510_v30 }
 0x4f6   : > { %4423 = vst.msk [vmem:[#allocation4 + $0x70] sm:$0xff] %vm4408_vm7, %v4394_v37  ;;  %v4395_v45 = vmax.f32 %v4367_v48, 0.0 }
 0x4f7   : > { %4421 = vst.msk [vmem:[#allocation4 + $0x60] sm:$0xff] %vm4408_vm7, %v4392_v50  ;;  %v4393_v55 = vmax.f32 %v4365_v42, 0.0  ;;  %4515 = vrot.lane.b32.xlu0 %v6885_v52, %s8363_s22 }
 0x4f8   : > { %v4447_v53 = vld [vmem:[#allocation4 + $0x50] ss:$2 sm:$0xff]  ;;  %v4475_v58 = vld [vmem:[#allocation4 + $0x51] ss:$2 sm:$0xff]  ;;  %4424 = vst.msk [vmem:[#allocation4 + $0x78] sm:$0xff] %vm4408_vm7, %v4395_v45 }
 0x4f9   : > { %v4445_v61 = vld [vmem:[#allocation4 + $0x40] ss:$2 sm:$0xff]  ;;  %v4473_v62 = vld [vmem:[#allocation4 + $0x41] ss:$2 sm:$0xff]  ;;  %v4497_v0 = vmax.f32 %v4447_v53, %v4475_v58  ;;  %4422 = vst.msk [vmem:[#allocation4 + $0x68] sm:$0xff] %vm4408_vm7, %v4393_v55  ;;  %v7597_v3 = vpop.f32.mrb[16].mxu1 }
 0x4fa   : > { %v4496_v6 = vmax.f32 %v4445_v61, %v4473_v62  ;;  %v4370_v7 = vadd.f32 %v7597_v3, %v9531_v22  ;;  %v4270_v8 = vpop.f32.mrb[17].mxu1 }
 0x4fb   : > { %v4368_v14 = vadd.f32 %v9531_v22, %v4270_v8  ;;  %v7598_v17 = vpop.f32.mrb[18].mxu1 }
 0x4fc   : > { %v4520_v19 = vmax.f32 %v4496_v6, %v4497_v0  ;;  %v4398_v46 = vmax.f32 %v4370_v7, 0.0  ;;  %v4371_v51 = vadd.f32 %v7598_v17, %v9531_v22  ;;  %v4273_v34 = vpop.f32.mrb[19].mxu1 }
 0x4fd   : > { %v4396_v59 = vmax.f32 %v4368_v14, 0.0  ;;  %v4369_v2 = vadd.f32 %v9531_v22, %v4273_v34 }
 0x4fe   : > { %v4521_v5 = vpack.c.bf16 %v4520_v19, %v4520_v19  ;;  %4427 = vst.msk [vmem:[#allocation4 + $0x90] sm:$0xff] %vm4408_vm7, %v4398_v46  ;;  %v4399_v9 = vmax.f32 %v4371_v51, 0.0 }
 0x4ff   : > { %4425 = vst.msk [vmem:[#allocation4 + $0x80] sm:$0xff] %vm4408_vm7, %v4396_v59  ;;  %v4397_v18 = vmax.f32 %v4369_v2, 0.0  ;;  %v4451_v20 = vld [vmem:[#allocation4 + $0x70] ss:$2 sm:$0xff]  ;;  %v4479_v28 = vld [vmem:[#allocation4 + $0x71] ss:$2 sm:$0xff] }
 0x500   : > { %4522 = vst.msk [vmem:[#allocation5 + $0x4] sm:$0xf] %vm4508_vm8, %v4521_v5  ;;  %v4449_v32 = vld [vmem:[#allocation4 + $0x60] ss:$2 sm:$0xff]  ;;  %v4477_v38 = vld [vmem:[#allocation4 + $0x61] ss:$2 sm:$0xff]  ;;  %v4499_v24 = vmax.f32 %v4451_v20, %v4479_v28 }
 0x501   : > { %4428 = vst.msk [vmem:[#allocation4 + $0x98] sm:$0xff] %vm4408_vm7, %v4399_v9  ;;  %4426 = vst.msk [vmem:[#allocation4 + $0x88] sm:$0xff] %vm4408_vm7, %v4397_v18  ;;  %v7601_v27 = vpop.f32.mrb[20].mxu1  ;;  %v4498_v31 = vmax.f32 %v4449_v32, %v4477_v38  ;;  %v8110_v20 = vld [vmem:[%s10209_s5 + $0x380] ss:$28 sps:$4 sm:$0xff]  }
 0x502   : > { %v4374_v33 = vadd.f32 %v7601_v27, %v9531_v22  ;;  %v4286_v35 = vpop.f32.mrb[21].mxu1  ;;  %v8113_v28 = vld [vmem:[%s10209_s5 + $0x390] ss:$28 sps:$4 sm:$0xff]   ;;  %v8118_v32 = vld [vmem:[%s10209_s5 + $0x3bc] ss:$28 sps:$4 sm:$0xff]  }
 0x503   : > { %v4372_v39 = vadd.f32 %v9531_v22, %v4286_v35  ;;  %v7602_v25 = vpop.f32.mrb[22].mxu1  ;;  %v4523_v4 = vmax.f32 %v4498_v31, %v4499_v24  ;;  %v8121_v38 = vld [vmem:[%s10209_s5 + $0x3cc] ss:$28 sps:$4 sm:$0xff]   ;;  %v8116_v24 = vld [vmem:[%s10209_s5 + $0x3b8] ss:$28 sps:$4 sm:$0xff]  }
 0x504   : > { %v4402_v63 = vmax.f32 %v4374_v33, 0.0  ;;  %v4375_v44 = vadd.f32 %v7602_v25, %v9531_v22  ;;  %v4289_v56 = vpop.f32.mrb[23].mxu1  ;;  %v8119_v27 = vld [vmem:[%s10209_s5 + $0x3c8] ss:$28 sps:$4 sm:$0xff]   ;;  %v8124_v31 = vld [vmem:[%s10209_s5 + $0x3f4] ss:$28 sps:$4 sm:$0xff]  }
 0x505   : > { %v4400_v57 = vmax.f32 %v4372_v39, 0.0  ;;  %v4373_v41 = vadd.f32 %v9531_v22, %v4289_v56  ;;  %v6886_v43 = vpack.c.bf16 %v4523_v4, %v4523_v4  ;;  %v8127_v33 = vld [vmem:[%s10209_s5 + $0x404] ss:$28 sps:$4 sm:$0xff]   ;;  %v8122_v39 = vld [vmem:[%s10209_s5 + $0x3f0] ss:$28 sps:$4 sm:$0xff]  }
 0x506   : > { %4431 = vst.msk [vmem:[#allocation4 + $0xb0] sm:$0xff] %vm4408_vm7, %v4402_v63  ;;  %v4403_v60 = vmax.f32 %v4375_v44, 0.0  ;;  %v8125_v25 = vld [vmem:[%s10209_s5 + $0x400] ss:$28 sps:$4 sm:$0xff]   ;;  %v8130_v4 = vld [vmem:[%s10209_s5 + $0x42c] ss:$28 sps:$4 sm:$0xff]  }
 0x507   : > { %4429 = vst.msk [vmem:[#allocation4 + $0xa0] sm:$0xff] %vm4408_vm7, %v4400_v57  ;;  %v4401_v26 = vmax.f32 %v4373_v41, 0.0  ;;  %4528 = vrot.lane.b32.xlu0 %v6886_v43, %s8363_s22  ;;  %v8133_v63 = vld [vmem:[%s10209_s5 + $0x43c] ss:$28 sps:$4 sm:$0xff]   ;;  %v8128_v44 = vld [vmem:[%s10209_s5 + $0x428] ss:$28 sps:$4 sm:$0xff]  }
 0x508   : > { %4432 = vst.msk [vmem:[#allocation4 + $0xb8] sm:$0xff] %vm4408_vm7, %v4403_v60  ;;  %v4453_v10 = vld [vmem:[#allocation4 + $0x80] ss:$2 sm:$0xff]  ;;  %v4455_v15 = vld [vmem:[#allocation4 + $0x90] ss:$2 sm:$0xff] }
 0x509   : > { %v4481_v16 = vld [vmem:[#allocation4 + $0x81] ss:$2 sm:$0xff]  ;;  %4430 = vst.msk [vmem:[#allocation4 + $0xa8] sm:$0xff] %vm4408_vm7, %v4401_v26  ;;  %v7605_v21 = vpop.f32.mrb[24].mxu1  ;;  %v4483_v29 = vld [vmem:[#allocation4 + $0x91] ss:$2 sm:$0xff] }
 0x50a   : > { %v4500_v30 = vmax.f32 %v4453_v10, %v4481_v16  ;;  %v4378_v36 = vadd.f32 %v7605_v21, %v9531_v22  ;;  %v4302_v37 = vpop.f32.mrb[25].mxu1  ;;  %v4501_v48 = vmax.f32 %v4455_v15, %v4483_v29  ;;  %v8131_v56 = vld [vmem:[%s10209_s5 + $0x438] ss:$28 sps:$4 sm:$0xff]   ;;  %v8134_v43 = vld [vmem:[%s10209_s5 + $0x460] ss:$28 sps:$4 sm:$0xff]  }
 0x50b   : > { %v4376_v49 = vadd.f32 %v9531_v22, %v4302_v37  ;;  %v7606_v50 = vpop.f32.mrb[26].mxu1  ;;  %v8140_v57 = vld [vmem:[%s10209_s5 + $0x474] ss:$28 sps:$4 sm:$0xff]   ;;  %v8143_v26 = vld [vmem:[%s10209_s5 + $0x49c] ss:$28 sps:$4 sm:$0xff]  }
 0x50c   : > { %v4406_v42 = vmax.f32 %v4378_v36, 0.0  ;;  %v4379_v52 = vadd.f32 %v7606_v50, %v9531_v22  ;;  %v4305_v45 = vpop.f32.mrb[27].mxu1  ;;  %v4532_v54 = vmax.f32 %v4500_v30, %v4501_v48  ;;  %v8138_v60 = vld [vmem:[%s10209_s5 + $0x470] ss:$28 sps:$4 sm:$0xff]   ;;  %v8141_v15 = vld [vmem:[%s10209_s5 + $0x498] ss:$28 sps:$4 sm:$0xff]  }
 0x50d   : > { %v4404_v55 = vmax.f32 %v4376_v49, 0.0  ;;  %v4377_v53 = vadd.f32 %v9531_v22, %v4305_v45  ;;  %v8146_v10 = vld [vmem:[%s10209_s5 + $0x4ac] ss:$28 sps:$4 sm:$0xff]   ;;  %v8149_v21 = vld [vmem:[%s10209_s5 + $0x4d4] ss:$28 sps:$4 sm:$0xff]  }
 0x50e   : > { %4435 = vst.msk [vmem:[#allocation4 + $0xd0] sm:$0xff] %vm4408_vm7, %v4406_v42  ;;  %v4407_v58 = vmax.f32 %v4379_v52, 0.0  ;;  %v4533_v61 = vpack.c.bf16 %v4532_v54, %v4532_v54  ;;  %v8144_v16 = vld [vmem:[%s10209_s5 + $0x4a8] ss:$28 sps:$4 sm:$0xff]   ;;  %v8147_v30 = vld [vmem:[%s10209_s5 + $0x4d0] ss:$28 sps:$4 sm:$0xff]  }
 0x50f   : > { %4433 = vst.msk [vmem:[#allocation4 + $0xc0] sm:$0xff] %vm4408_vm7, %v4404_v55  ;;  %v4405_v62 = vmax.f32 %v4377_v53, 0.0  ;;  %v4459_v0 = vld [vmem:[#allocation4 + $0xb0] ss:$2 sm:$0xff]  ;;  %v4487_v3 = vld [vmem:[#allocation4 + $0xb1] ss:$2 sm:$0xff] }
 0x510   : > { %4436 = vst.msk [vmem:[#allocation4 + $0xd8] sm:$0xff] %vm4408_vm7, %v4407_v58  ;;  %v4457_v6 = vld [vmem:[#allocation4 + $0xa0] ss:$2 sm:$0xff]  ;;  %v4485_v7 = vld [vmem:[#allocation4 + $0xa1] ss:$2 sm:$0xff]  ;;  %v4503_v8 = vmax.f32 %v4459_v0, %v4487_v3 }
 0x511   : > { %4534 = vst.msk [vmem:[#allocation5 + $0x8] sm:$0xf] %vm4508_vm8, %v4533_v61  ;;  %v4502_v11 = vmax.f32 %v4457_v6, %v4485_v7  ;;  %v8152_v29 = vld [vmem:[%s10209_s5 + $0x4e4] ss:$28 sps:$4 sm:$0xff]   ;;  %v8155_v37 = vld [vmem:[%s10209_s5 + $0x50c] ss:$28 sps:$4 sm:$0xff]  }
 0x512   : > { %4434 = vst.msk [vmem:[#allocation4 + $0xc8] sm:$0xff] %vm4408_vm7, %v4405_v62  ;;  %v8150_v36 = vld [vmem:[%s10209_s5 + $0x4e0] ss:$28 sps:$4 sm:$0xff]   ;;  %v8153_v49 = vld [vmem:[%s10209_s5 + $0x508] ss:$28 sps:$4 sm:$0xff]  }
 0x513   : > { %v4535_v22 = vmax.f32 %v4502_v11, %v4503_v8  ;;  %v8158_v48 = vld [vmem:[%s10209_s5 + $0x51c] ss:$28 sps:$4 sm:$0xff]   ;;  %v8161_v42 = vld [vmem:[%s10209_s5 + $0x544] ss:$28 sps:$4 sm:$0xff]   ;;  %v8164_v52 = vld [vmem:[%s10209_s5 + $0x554] ss:$28 sps:$4 sm:$0xff]  }
 0x514   : > { %v8156_v50 = vld [vmem:[%s10209_s5 + $0x518] ss:$28 sps:$4 sm:$0xff]   ;;  %v8159_v45 = vld [vmem:[%s10209_s5 + $0x540] ss:$28 sps:$4 sm:$0xff]   ;;  %v8162_v54 = vld [vmem:[%s10209_s5 + $0x550] ss:$28 sps:$4 sm:$0xff]  }
 0x515   : > { %v6887_v13 = vpack.c.bf16 %v4535_v22, %v4535_v22  ;;  %v8167_v55 = vld [vmem:[%s10209_s5 + $0x57c] ss:$28 sps:$4 sm:$0xff]   ;;  %v8170_v53 = vld [vmem:[%s10209_s5 + $0x58c] ss:$28 sps:$4 sm:$0xff]   ;;  %v8173_v62 = vld [vmem:[%s10209_s5 + $0x5b4] ss:$28 sps:$4 sm:$0xff]  }
 0x516   : > { %v8165_v58 = vld [vmem:[%s10209_s5 + $0x578] ss:$28 sps:$4 sm:$0xff]   ;;  %v8168_v61 = vld [vmem:[%s10209_s5 + $0x588] ss:$28 sps:$4 sm:$0xff]   ;;  %v8171_v3 = vld [vmem:[%s10209_s5 + $0x5b0] ss:$28 sps:$4 sm:$0xff]  }
 0x517   : > { %4540 = vrot.lane.b32.xlu1 %v6887_v13, %s8363_s22  ;;  %v4463_v14 = vld [vmem:[#allocation4 + $0xd0] ss:$2 sm:$0xff]  ;;  %v4491_v17 = vld [vmem:[#allocation4 + $0xd1] ss:$2 sm:$0xff]  ;;  %v8176_v0 = vld [vmem:[%s10209_s5 + $0x5c4] ss:$28 sps:$4 sm:$0xff]  }
 0x518   : > { %v4505_v46 = vmax.f32 %v4463_v14, %v4491_v17  ;;  %v8174_v6 = vld [vmem:[%s10209_s5 + $0x5c0] ss:$28 sps:$4 sm:$0xff]   ;;  %v8179_v7 = vld [vmem:[%s10209_s5 + $0x5ec] ss:$28 sps:$4 sm:$0xff]   ;;  %v8180_v22 = vld [vmem:[%s10209_s5 + $0x5f8] ss:$28 sps:$4 sm:$0xff]  }
 0x519   : > { %v4461_v19 = vld [vmem:[#allocation4 + $0xc0] ss:$2 sm:$0xff]  ;;  %v4489_v23 = vld [vmem:[#allocation4 + $0xc1] ss:$2 sm:$0xff]  ;;  %v8186_v13 = vld [vmem:[%s10209_s5 + $0xc] ss:$28 sps:$4 sm:$0xff]  }
 0x51a   : > { %v4504_v51 = vmax.f32 %v4461_v19, %v4489_v23  ;;  %v8182_v8 = vld [vmem:[%s10209_s5 + $0x5fc] ss:$28 sps:$4 sm:$0xff]   ;;  %v8177_v11 = vld [vmem:[%s10209_s5 + $0x5e8] ss:$28 sps:$4 sm:$0xff]   ;;  %v8364_v19 = vmov 0  }
 0x51b   : > { %v8184_v14 = vld [vmem:[%s10209_s5 + $0x8] ss:$28 sps:$4 sm:$0xff]   ;;  %v8187_v23 = vld [vmem:[%s10209_s5 + $0x398] ss:$28 sps:$4 sm:$0xff]  }
 0x51c   : > { %v4544_v34 = vmax.f32 %v4504_v51, %v4505_v46  ;;  %v8190_v46 = vld [vmem:[%s10209_s5 + $0x44] ss:$28 sps:$4 sm:$0xff]  }
 0x51d   : > { %v8188_v51 = vld [vmem:[%s10209_s5 + $0x40] ss:$28 sps:$4 sm:$0xff]  }
 0x51e   : > { %v4545_v59 = vpack.c.bf16 %v4544_v34, %v4544_v34  ;;  %v8191_v34 = vld [vmem:[%s10209_s5 + $0x3d0] ss:$28 sps:$4 sm:$0xff]  }
 0x520   : > { %4546 = vst.msk [vmem:[#allocation5 + $0xc] sm:$0xf] %vm4508_vm8, %v4545_v59  ;;  %v8194_v59 = vld [vmem:[%s10209_s5 + $0x7c] ss:$28 sps:$4 sm:$0xff]  }
 0x569   : > { %v4516_v2 = vpop.permute.xlu0 %4515 }
 0x56a   : > { %4519 = vst.msk [vmem:[#allocation5] sm:$0xf] %vm4518_vm9, %v4516_v2  ;;  %v8192_v2 = vld [vmem:[%s10209_s5 + $0x78] ss:$28 sps:$4 sm:$0xff]  }
 0x579   : > { %v4529_v5 = vpop.permute.xlu0 %4528 }
 0x57a   : > { %4531 = vst.msk [vmem:[#allocation5 + $0x4] sm:$0xf] %vm4518_vm9, %v4529_v5  ;;  %v8195_v5 = vld [vmem:[%s10209_s5 + $0x408] ss:$28 sps:$4 sm:$0xff]  }
 0x581   : > { %v4547_v9 = vld [vmem:[#allocation5] sm:$0xff] }
 0x582   : > { %v9646_v12 = vcombine.low %v4547_v9, %v4547_v9  ;;  %v9648_v18 = vcombine.high %v4547_v9, %v4547_v9  ;;  %v8198_v9 = vld [vmem:[%s10209_s5 + $0xb4] ss:$28 sps:$4 sm:$0xff]  }
 0x584   : > { %5829 = vmatprep.mubr.bf16.mxu0 %v9648_v18  ;;  %5993 = vmatprep.mubr.bf16.mxu1 %v9648_v18 }
 0x585   : > { %5830 = vmatmul.mubr.bf16.vlgmr.msra.gmra.mrb[196].mxu0 %v9646_v12  ;;  %5994 = vmatmul.mubr.bf16.vlgmr.msra.gmra.mrb[28].mxu1 %v9646_v12 }
 0x586   : > { %5839 = vmatpush1.bf16.msra.mxu0 %v8110_v20  ;;  %6003 = vmatpush1.bf16.msra.mxu1 %v8113_v28  ;;  %v8196_v20 = vld [vmem:[%s10209_s5 + $0xb0] ss:$28 sps:$4 sm:$0xff]   ;;  %v8199_v28 = vld [vmem:[%s10209_s5 + $0x440] ss:$28 sps:$4 sm:$0xff]  }
 0x587   : > { %5840 = vmatprep.subr.bf16.mxu0 %v8118_v32  ;;  %6004 = vmatprep.subr.bf16.mxu1 %v8121_v38  ;;  %v8202_v32 = vld [vmem:[%s10209_s5 + $0xec] ss:$28 sps:$4 sm:$0xff]  }
 0x588   : > { %v8200_v38 = vld [vmem:[%s10209_s5 + $0xe8] ss:$28 sps:$4 sm:$0xff]  }
 0x589   : > { %v4541_v35 = vpop.permute.xlu1 %4540 }
 0x58a   : > { %5841 = vmatpush1.bf16.msra.mxu0 %v8116_v24  ;;  %6005 = vmatpush1.bf16.msra.mxu1 %v8119_v27  ;;  %4543 = vst.msk [vmem:[#allocation5 + $0x8] sm:$0xf] %vm4518_vm9, %v4541_v35  ;;  %v8203_v24 = vld [vmem:[%s10209_s5 + $0x478] ss:$28 sps:$4 sm:$0xff]   ;;  %v8206_v27 = vld [vmem:[%s10209_s5 + $0x124] ss:$28 sps:$4 sm:$0xff]  }
 0x58b   : > { %5842 = vmatprep.subr.bf16.mxu0 %v8124_v31  ;;  %6006 = vmatprep.subr.bf16.mxu1 %v8127_v33  ;;  %v8204_v31 = vld [vmem:[%s10209_s5 + $0x120] ss:$28 sps:$4 sm:$0xff]   ;;  %v8207_v33 = vld [vmem:[%s10209_s5 + $0x4b0] ss:$28 sps:$4 sm:$0xff]  }
 0x58c   : > { %v8210_v35 = vld [vmem:[%s10209_s5 + $0x15c] ss:$28 sps:$4 sm:$0xff]  }
 0x58e   : > { %5843 = vmatpush1.bf16.msra.mxu0 %v8122_v39  ;;  %6007 = vmatpush1.bf16.msra.mxu1 %v8125_v25  ;;  %v8208_v39 = vld [vmem:[%s10209_s5 + $0x158] ss:$28 sps:$4 sm:$0xff]   ;;  %v8211_v25 = vld [vmem:[%s10209_s5 + $0x4e8] ss:$28 sps:$4 sm:$0xff]  }
 0x58f   : > { %5844 = vmatprep.subr.bf16.mxu0 %v8130_v4  ;;  %6008 = vmatprep.subr.bf16.mxu1 %v8133_v63  ;;  %v8214_v4 = vld [vmem:[%s10209_s5 + $0x194] ss:$28 sps:$4 sm:$0xff]  }
 0x590   : > { %v8212_v63 = vld [vmem:[%s10209_s5 + $0x190] ss:$28 sps:$4 sm:$0xff]  }
 0x591   : > { %v9703_v41 = vld [vmem:[#allocation5 + $0x8] sm:$0xff] }
 0x592   : > { %5845 = vmatpush1.bf16.msra.mxu0 %v8128_v44  ;;  %6009 = vmatpush1.bf16.msra.mxu1 %v8131_v56  ;;  %v9710_v47 = vcombine.high %v9703_v41, %v9703_v41  ;;  %v9811_v17 = vcombine.low %v9703_v41, %v9703_v41  ;;  %v8215_v44 = vld [vmem:[%s10209_s5 + $0x520] ss:$28 sps:$4 sm:$0xff]   ;;  %v8218_v56 = vld [vmem:[%s10209_s5 + $0x1cc] ss:$28 sps:$4 sm:$0xff]  }
 0x593   : > { %5846 = vmatprep.subr.bf16.mxu0 %v8136_v40  ;;  %6010 = vmatprep.subr.bf16.mxu1 %v8140_v57  ;;  %v8216_v40 = vld [vmem:[%s10209_s5 + $0x1c8] ss:$28 sps:$4 sm:$0xff]   ;;  %v8219_v57 = vld [vmem:[%s10209_s5 + $0x558] ss:$28 sps:$4 sm:$0xff]  }
 0x594   : > { %6878 = vmatprep.mubr.msk.bf16.mxu0 %vm4408_vm7, %v9710_v47  ;;  %6880 = vmatprep.mubr.msk.bf16.mxu1 %vm4408_vm7, %v9710_v47  ;;  %v8222_v41 = vld [vmem:[%s10209_s5 + $0x204] ss:$28 sps:$4 sm:$0xff]  }
 0x596   : > { %5847 = vmatpush1.bf16.msra.mxu0 %v8134_v43  ;;  %6011 = vmatpush1.bf16.msra.mxu1 %v8138_v60  ;;  %v8220_v43 = vld [vmem:[%s10209_s5 + $0x200] ss:$28 sps:$4 sm:$0xff]   ;;  %v8223_v60 = vld [vmem:[%s10209_s5 + $0x590] ss:$28 sps:$4 sm:$0xff]  }
 0x597   : > { %5848 = vmatprep.subr.bf16.mxu0 %v8143_v26  ;;  %6012 = vmatprep.subr.bf16.mxu1 %v8146_v10  ;;  %v8226_v26 = vld [vmem:[%s10209_s5 + $0x23c] ss:$28 sps:$4 sm:$0xff]  }
 0x598   : > { %v8224_v10 = vld [vmem:[%s10209_s5 + $0x238] ss:$28 sps:$4 sm:$0xff]  }
 0x59a   : > { %5849 = vmatpush1.bf16.msra.mxu0 %v8141_v15  ;;  %6013 = vmatpush1.bf16.msra.mxu1 %v8144_v16  ;;  %v8227_v15 = vld [vmem:[%s10209_s5 + $0x5c8] ss:$28 sps:$4 sm:$0xff]   ;;  %v8230_v16 = vld [vmem:[%s10209_s5 + $0x274] ss:$28 sps:$4 sm:$0xff]  }
 0x59b   : > { %5850 = vmatprep.subr.bf16.mxu0 %v8149_v21  ;;  %6014 = vmatprep.subr.bf16.mxu1 %v8152_v29  ;;  %v8228_v21 = vld [vmem:[%s10209_s5 + $0x270] ss:$28 sps:$4 sm:$0xff]   ;;  %v8231_v29 = vld [vmem:[%s10209_s5 + $0x600] ss:$28 sps:$4 sm:$0xff]  }
 0x59e   : > { %5851 = vmatpush1.bf16.msra.mxu0 %v8147_v30  ;;  %6015 = vmatpush1.bf16.msra.mxu1 %v8150_v36  ;;  %v8234_v30 = vld [vmem:[%s10209_s5 + $0x2ac] ss:$28 sps:$4 sm:$0xff]  }
 0x59f   : > { %5852 = vmatprep.subr.bf16.mxu0 %v8155_v37  ;;  %6016 = vmatprep.subr.bf16.mxu1 %v8158_v48  ;;  %v8232_v36 = vld [vmem:[%s10209_s5 + $0x2a8] ss:$28 sps:$4 sm:$0xff]   ;;  %v8235_v48 = vld [vmem:[%s10209_s5 + $0x2e0] ss:$28 sps:$4 sm:$0xff]  }
 0x5a0   : > { %v8237_v37 = vld [vmem:[%s10209_s5 + $0x2e4] ss:$28 sps:$4 sm:$0xff]  }
 0x5a2   : > { %5853 = vmatpush1.bf16.msra.mxu0 %v8153_v49  ;;  %6017 = vmatpush1.bf16.msra.mxu1 %v8156_v50  ;;  %v8240_v49 = vld [vmem:[%s10209_s5 + $0x31c] ss:$28 sps:$4 sm:$0xff]  }
 0x5a3   : > { %5854 = vmatprep.subr.bf16.mxu0 %v8161_v42  ;;  %6018 = vmatprep.subr.bf16.mxu1 %v8164_v52  ;;  %v8238_v50 = vld [vmem:[%s10209_s5 + $0x318] ss:$28 sps:$4 sm:$0xff]   ;;  %v8241_v52 = vld [vmem:[%s10209_s5 + $0x350] ss:$28 sps:$4 sm:$0xff]  }
 0x5a4   : > { %v8243_v42 = vld [vmem:[%s10209_s5 + $0x354] ss:$28 sps:$4 sm:$0xff]  }
 0x5a6   : > { %5855 = vmatpush1.bf16.msra.mxu0 %v8159_v45  ;;  %6019 = vmatpush1.bf16.msra.mxu1 %v8162_v54  ;;  %v8246_v45 = vld [vmem:[%s10209_s5 + $0x38c] ss:$28 sps:$4 sm:$0xff]  }
 0x5a7   : > { %5856 = vmatprep.subr.bf16.mxu0 %v8167_v55  ;;  %6020 = vmatprep.subr.bf16.mxu1 %v8170_v53  ;;  %v8244_v54 = vld [vmem:[%s10209_s5 + $0x388] ss:$28 sps:$4 sm:$0xff]   ;;  %v8247_v53 = vld [vmem:[%s10209_s5 + $0x3c0] ss:$28 sps:$4 sm:$0xff]  }
 0x5a8   : > { %v8249_v55 = vld [vmem:[%s10209_s5 + $0x3c4] ss:$28 sps:$4 sm:$0xff]  }
 0x5aa   : > { %5857 = vmatpush1.bf16.msra.mxu0 %v8165_v58  ;;  %6021 = vmatpush1.bf16.msra.mxu1 %v8168_v61  ;;  %v8252_v58 = vld [vmem:[%s10209_s5 + $0x3fc] ss:$28 sps:$4 sm:$0xff]  }
 0x5ab   : > { %5858 = vmatprep.subr.bf16.mxu0 %v8173_v62  ;;  %6022 = vmatprep.subr.bf16.mxu1 %v8176_v0  ;;  %v8250_v61 = vld [vmem:[%s10209_s5 + $0x3f8] ss:$28 sps:$4 sm:$0xff]   ;;  %v8258_v0 = vld [vmem:[%s10209_s5 + $0x46c] ss:$28 sps:$4 sm:$0xff]  }
 0x5ac   : > { %v8255_v62 = vld [vmem:[%s10209_s5 + $0x434] ss:$28 sps:$4 sm:$0xff]  }
 0x5ae   : > { %5859 = vmatpush1.bf16.msra.mxu0 %v8171_v3  ;;  %6023 = vmatpush1.bf16.msra.mxu1 %v8174_v6  ;;  %v8256_v3 = vld [vmem:[%s10209_s5 + $0x468] ss:$28 sps:$4 sm:$0xff]  }
 0x5af   : > { %5860 = vmatprep.subr.bf16.mxu0 %v8179_v7  ;;  %6024 = vmatprep.subr.bf16.mxu1 %v8182_v8  ;;  %v8261_v6 = vld [vmem:[%s10209_s5 + $0x4a4] ss:$28 sps:$4 sm:$0xff]   ;;  %v8264_v8 = vld [vmem:[%s10209_s5 + $0x4dc] ss:$28 sps:$4 sm:$0xff]  }
 0x5b0   : > { %v8259_v7 = vld [vmem:[%s10209_s5 + $0x4a0] ss:$28 sps:$4 sm:$0xff]  }
 0x5b2   : > { %5861 = vmatpush1.bf16.msra.mxu0 %v8177_v11  ;;  %6025 = vmatpush1.bf16.msra.mxu1 %v8180_v22  ;;  %v8262_v11 = vld [vmem:[%s10209_s5 + $0x4d8] ss:$28 sps:$4 sm:$0xff]  }
 0x5b3   : > { %5879 = vmatprep.subr.bf16.mxu0 %v8186_v13  ;;  %6083 = vmatprep.subr.bf16.mxu1 %v8364_v19  ;;  %v8267_v22 = vld [vmem:[%s10209_s5 + $0x514] ss:$28 sps:$4 sm:$0xff]  }
 0x5b4   : > { %v8265_v13 = vld [vmem:[%s10209_s5 + $0x510] ss:$28 sps:$4 sm:$0xff]  }
 0x5b5   : > { %5871 = vmatmul.mubr.bf16.vlgmr.msra.gmra.mrb[200].mxu0 %v9811_v17  ;;  %6035 = vmatmul.mubr.bf16.vlgmr.msra.gmra.mrb[28].mxu1 %v9811_v17 }
 0x5b6   : > { %5880 = vmatpush1.bf16.msra.mxu0 %v8184_v14  ;;  %5911 = vmatprep.mubr.bf16.mxu0 %v9648_v18  ;;  %v8270_v14 = vld [vmem:[%s10209_s5 + $0x54c] ss:$28 sps:$4 sm:$0xff]  }
 0x5b7   : > { %6084 = vmatpush1.bf16.msra.mxu1 %v8187_v23  ;;  %6881 = vmatprep.mubr.msk.bf16.mxu1 %vm4408_vm7, %v9710_v47  ;;  %v8273_v23 = vld [vmem:[%s10209_s5 + $0x584] ss:$28 sps:$4 sm:$0xff]  }
 0x5b8   : > { %5881 = vmatprep.subr.bf16.mxu0 %v8190_v46  ;;  %6085 = vmatprep.subr.bf16.mxu1 %v8364_v19  ;;  %v8271_v46 = vld [vmem:[%s10209_s5 + $0x580] ss:$28 sps:$4 sm:$0xff]  }
 0x5ba   : > { %5882 = vmatpush1.bf16.msra.mxu0 %v8188_v51  ;;  %v8276_v51 = vld [vmem:[%s10209_s5 + $0x5bc] ss:$28 sps:$4 sm:$0xff]  }
 0x5bb   : > { %6086 = vmatpush1.bf16.msra.mxu1 %v8191_v34  ;;  %5883 = vmatprep.subr.bf16.mxu0 %v8194_v59  ;;  %v8274_v34 = vld [vmem:[%s10209_s5 + $0x5b8] ss:$28 sps:$4 sm:$0xff]  }
 0x5bc   : > { %6087 = vmatprep.subr.bf16.mxu1 %v8364_v19  ;;  %v8279_v59 = vld [vmem:[%s10209_s5 + $0x5f4] ss:$28 sps:$4 sm:$0xff]  }
 0x5be   : > { %5884 = vmatpush1.bf16.msra.mxu0 %v8192_v2  ;;  %v8277_v2 = vld [vmem:[%s10209_s5 + $0x5f0] ss:$28 sps:$4 sm:$0xff]  }
 0x5bf   : > { %6088 = vmatpush1.bf16.msra.mxu1 %v8195_v5  ;;  %5885 = vmatprep.subr.bf16.mxu0 %v8198_v9  ;;  %v8280_v5 = vld [vmem:[%s10209_s5 + $0x1d8] ss:$28 sps:$4 sm:$0xff]  }
 0x5c0   : > { %6089 = vmatprep.subr.bf16.mxu1 %v8364_v19  ;;  %v8281_v9 = vld [vmem:[%s10209_s5 + $0x18] ss:$28 sps:$4 sm:$0xff]  }
 0x5c2   : > { %5886 = vmatpush1.bf16.msra.mxu0 %v8196_v20  ;;  %v8282_v20 = vld [vmem:[%s10209_s5 + $0x210] ss:$28 sps:$4 sm:$0xff]  }
 0x5c3   : > { %6090 = vmatpush1.bf16.msra.mxu1 %v8199_v28  ;;  %5887 = vmatprep.subr.bf16.mxu0 %v8202_v32  ;;  %v8283_v28 = vld [vmem:[%s10209_s5 + $0x50] ss:$28 sps:$4 sm:$0xff]   ;;  %v8284_v32 = vld [vmem:[%s10209_s5 + $0x248] ss:$28 sps:$4 sm:$0xff]  }
 0x5c4   : > { %6091 = vmatprep.subr.bf16.mxu1 %v8364_v19 }
 0x5c6   : > { %5888 = vmatpush1.bf16.msra.mxu0 %v8200_v38  ;;  %v8285_v38 = vld [vmem:[%s10209_s5 + $0x88] ss:$28 sps:$4 sm:$0xff]  }
 0x5c7   : > { %6092 = vmatpush1.bf16.msra.mxu1 %v8203_v24  ;;  %5889 = vmatprep.subr.bf16.mxu0 %v8206_v27  ;;  %v8288_v24 = vld [vmem:[%s10209_s5 + $0x2b8] ss:$28 sps:$4 sm:$0xff]  }
 0x5c8   : > { %6093 = vmatprep.subr.bf16.mxu1 %v8364_v19  ;;  %v8289_v27 = vld [vmem:[%s10209_s5 + $0xf8] ss:$28 sps:$4 sm:$0xff]  }
 0x5ca   : > { %5890 = vmatpush1.bf16.msra.mxu0 %v8204_v31  ;;  %v8290_v31 = vld [vmem:[%s10209_s5 + $0x2f0] ss:$28 sps:$4 sm:$0xff]  }
 0x5cb   : > { %6094 = vmatpush1.bf16.msra.mxu1 %v8207_v33  ;;  %5891 = vmatprep.subr.bf16.mxu0 %v8210_v35  ;;  %v8291_v33 = vld [vmem:[%s10209_s5 + $0x130] ss:$28 sps:$4 sm:$0xff]   ;;  %v8292_v35 = vld [vmem:[%s10209_s5 + $0x328] ss:$28 sps:$4 sm:$0xff]  }
 0x5cc   : > { %6095 = vmatprep.subr.bf16.mxu1 %v8364_v19 }
 0x5ce   : > { %5892 = vmatpush1.bf16.msra.mxu0 %v8208_v39  ;;  %v8293_v39 = vld [vmem:[%s10209_s5 + $0x168] ss:$28 sps:$4 sm:$0xff]  }
 0x5cf   : > { %6096 = vmatpush1.bf16.msra.mxu1 %v8211_v25  ;;  %5893 = vmatprep.subr.bf16.mxu0 %v8214_v4  ;;  %v8294_v25 = vld [vmem:[%s10209_s5 + $0x360] ss:$28 sps:$4 sm:$0xff]  }
 0x5d0   : > { %6097 = vmatprep.subr.bf16.mxu1 %v8364_v19  ;;  %v8295_v4 = vld [vmem:[%s10209_s5 + $0x1a0] ss:$28 sps:$4 sm:$0xff]  }
 0x5d2   : > { %5894 = vmatpush1.bf16.msra.mxu0 %v8212_v63 }
 0x5d3   : > { %6098 = vmatpush1.bf16.msra.mxu1 %v8215_v44  ;;  %5895 = vmatprep.subr.bf16.mxu0 %v8218_v56 }
 0x5d4   : > { %6099 = vmatprep.subr.bf16.mxu1 %v8364_v19 }
 0x5d6   : > { %5896 = vmatpush1.bf16.msra.mxu0 %v8216_v40 }
 0x5d7   : > { %6100 = vmatpush1.bf16.msra.mxu1 %v8219_v57  ;;  %5897 = vmatprep.subr.bf16.mxu0 %v8222_v41  ;;  %v8365_v57 = vmov 1966171168  }
 0x5d8   : > { %6101 = vmatprep.subr.bf16.mxu1 %v8364_v19  ;;  %v6127_v41 = vunpack.c.l.s4 %v8365_v57 }
 0x5da   : > { %5898 = vmatpush1.bf16.msra.mxu0 %v8220_v43  ;;  %v6129_v43 = vlaneseq }
 0x5db   : > { %6102 = vmatpush1.bf16.msra.mxu1 %v8223_v60  ;;  %5899 = vmatprep.subr.bf16.mxu0 %v8226_v26  ;;  %v6128_v60 = vunpack.c.0.s8 %v6127_v41 }
 0x5dc   : > { %6103 = vmatprep.subr.bf16.mxu1 %v8364_v19  ;;  %v6130_v26 = vshrl.u32 %v6129_v43, 7 }
 0x5de   : > { %5900 = vmatpush1.bf16.msra.mxu0 %v8224_v10  ;;  %v6237_v10 = vld [vmem:[%s10211_s7] sm:$0xff] }
 0x5df   : > { %6104 = vmatpush1.bf16.msra.mxu1 %v8227_v15  ;;  %5901 = vmatprep.subr.bf16.mxu0 %v8230_v16  ;;  %v8366_v15 = vmov 0.0|0.0  }
 0x5e0   : > { %6105 = vmatprep.subr.bf16.mxu1 %v8364_v19  ;;  %v8268_v19 = vld [vmem:[%s10209_s5 + $0x548] ss:$28 sps:$4 sm:$0xff]  }
 0x5e2   : > { %5902 = vmatpush1.bf16.msra.mxu0 %v8228_v21  ;;  %v6240_v21 = vld [vmem:[%s10211_s7 + $0x18] sm:$0xff] }
 0x5e3   : > { %6106 = vmatpush1.bf16.msra.mxu1 %v8231_v29  ;;  %5903 = vmatprep.subr.bf16.mxu0 %v8234_v30 }
 0x5e6   : > { %6116 = vmatmul.mubr.bf16.vlgmr.msra.gmra.mrb[32].mxu1 %v9811_v17  ;;  %5904 = vmatpush1.bf16.msra.mxu0 %v8232_v36  ;;  %v10099_v36 = vsub.s32 %v6128_v60, %v6130_v26 }
 0x5e7   : > { %5905 = vmatprep.subr.bf16.mxu0 %v8237_v37 }
 0x5ea   : > { %5906 = vmatpush1.bf16.msra.mxu0 %v8235_v48 }
 0x5eb   : > { %5907 = vmatprep.subr.bf16.mxu0 %v8240_v49 }
 0x5ee   : > { %5908 = vmatpush1.bf16.msra.mxu0 %v8238_v50 }
 0x5ef   : > { %5909 = vmatprep.subr.bf16.mxu0 %v8243_v42 }
 0x5f2   : > { %5910 = vmatpush1.bf16.msra.mxu0 %v8241_v52 }
 0x5f3   : > { %5920 = vmatprep.subr.bf16.mxu0 %v8246_v45 }
 0x5f5   : > { %5912 = vmatmul.mubr.bf16.vlgmr.msra.gmra.mrb[204].mxu0 %v9646_v12 }
 0x5f6   : > { %5921 = vmatpush1.bf16.msra.mxu0 %v8244_v54  ;;  %6879 = vmatprep.mubr.msk.bf16.mxu0 %vm4408_vm7, %v9710_v47  ;;  %v8253_v47 = vld [vmem:[%s10209_s5 + $0x430] ss:$28 sps:$4 sm:$0xff]   ;;  %v6241_v54 = vld [vmem:[%s10211_s7 + $0x20] sm:$0xff] }
 0x5f7   : > { %5922 = vmatprep.subr.bf16.mxu0 %v8249_v55  ;;  %v6242_v55 = vld [vmem:[%s10211_s7 + $0x28] sm:$0xff] }
 0x5fa   : > { %5923 = vmatpush1.bf16.msra.mxu0 %v8247_v53 }
 0x5fb   : > { %5924 = vmatprep.subr.bf16.mxu0 %v8252_v58 }
 0x5fe   : > { %5925 = vmatpush1.bf16.msra.mxu0 %v8250_v61 }
 0x5ff   : > { %5926 = vmatprep.subr.bf16.mxu0 %v8255_v62  ;;  %v6123_v62 = vld [vmem:[%s10210_s6] sm:$0x1] }
 0x602   : > { %5927 = vmatpush1.bf16.msra.mxu0 %v8253_v47  ;;  %v7649_v47 = vpack.c.bf16 %v6242_v55, %v6241_v54  ;;  %v6253_v55 = vld [vmem:[%s10212_s8] sm:$0x1] }
 0x603   : > { %5928 = vmatprep.subr.bf16.mxu0 %v8258_v0 }
 0x606   : > { %5929 = vmatpush1.bf16.msra.mxu0 %v8256_v3  ;;  %v6243_v3 = vld [vmem:[%s10211_s7 + $0x30] sm:$0xff] }
 0x607   : > { %5930 = vmatprep.subr.bf16.mxu0 %v8261_v6  ;;  %v6244_v6 = vld [vmem:[%s10211_s7 + $0x38] sm:$0xff] }
 0x60a   : > { %5931 = vmatpush1.bf16.msra.mxu0 %v8259_v7 }
 0x60b   : > { %5932 = vmatprep.subr.bf16.mxu0 %v8264_v8 }
 0x60e   : > { %5933 = vmatpush1.bf16.msra.mxu0 %v8262_v11  ;;  %v7652_v11 = vpack.c.bf16 %v6244_v6, %v6243_v3 }
 0x60f   : > { %5934 = vmatprep.subr.bf16.mxu0 %v8267_v22 }
 0x612   : > { %5935 = vmatpush1.bf16.msra.mxu0 %v8265_v13  ;;  %v6245_v13 = vld [vmem:[%s10211_s7 + $0x40] sm:$0xff] }
 0x613   : > { %5936 = vmatprep.subr.bf16.mxu0 %v8270_v14  ;;  %v6246_v14 = vld [vmem:[%s10211_s7 + $0x48] sm:$0xff] }
 0x616   : > { %5937 = vmatpush1.bf16.msra.mxu0 %v8268_v19  ;;  %v7655_v19 = vpack.c.bf16 %v6246_v14, %v6245_v13 }
 0x617   : > { %5938 = vmatprep.subr.bf16.mxu0 %v8273_v23  ;;  %v6247_v23 = vld [vmem:[%s10211_s7 + $0x50] sm:$0xff] }
 0x61a   : > { %5939 = vmatpush1.bf16.msra.mxu0 %v8271_v46  ;;  %v6248_v46 = vld [vmem:[%s10211_s7 + $0x58] sm:$0xff] }
 0x61b   : > { %5940 = vmatprep.subr.bf16.mxu0 %v8276_v51  ;;  %v7658_v51 = vpack.c.bf16 %v6248_v46, %v6247_v23 }
 0x61e   : > { %5941 = vmatpush1.bf16.msra.mxu0 %v8274_v34  ;;  %v6249_v34 = vld [vmem:[%s10211_s7 + $0x60] sm:$0xff] }
 0x61f   : > { %5942 = vmatprep.subr.bf16.mxu0 %v8279_v59  ;;  %v6250_v59 = vld [vmem:[%s10211_s7 + $0x68] sm:$0xff] }
 0x622   : > { %5943 = vmatpush1.bf16.msra.mxu0 %v8277_v2  ;;  %v7661_v2 = vpack.c.bf16 %v6250_v59, %v6249_v34 }
 0x623   : > { %7082 = vmatprep.subr.bf16.mxu0 %v8280_v5  ;;  %v6251_v5 = vld [vmem:[%s10211_s7 + $0x70] sm:$0xff] }
 0x625   : > { %5953 = vmatmul.mubr.bf16.vlgmr.msra.gmra.mrb[204].mxu0 %v9811_v17  ;;  %v8286_v17 = vld [vmem:[%s10209_s5 + $0x280] ss:$28 sps:$4 sm:$0xff]  }
 0x626   : > { %7083 = vmatpush3.bf16.msra.mxu0 %v8281_v9  ;;  %6075 = vmatprep.mubr.bf16.mxu0 %v9648_v18  ;;  %v8287_v18 = vld [vmem:[%s10209_s5 + $0xc0] ss:$28 sps:$4 sm:$0xff]  }
 0x627   : > { %7084 = vmatprep.subr.bf16.mxu0 %v8282_v20  ;;  %v6252_v9 = vld [vmem:[%s10211_s7 + $0x78] sm:$0xff] }
 0x628   : > { %v7664_v20 = vpack.c.bf16 %v6252_v9, %v6251_v5 }
 0x62a   : > { %7085 = vmatpush3.bf16.msra.mxu0 %v8283_v28 }
 0x62b   : > { %7086 = vmatprep.subr.bf16.mxu0 %v8284_v32 }
 0x62e   : > { %7087 = vmatpush3.bf16.msra.mxu0 %v8285_v38 }
 0x62f   : > { %7088 = vmatprep.subr.bf16.mxu0 %v8286_v17 }
 0x632   : > { %7089 = vmatpush3.bf16.msra.mxu0 %v8287_v18 }
 0x633   : > { %7090 = vmatprep.subr.bf16.mxu0 %v8288_v24 }
 0x636   : > { %7091 = vmatpush3.bf16.msra.mxu0 %v8289_v27 }
 0x637   : > { %7092 = vmatprep.subr.bf16.mxu0 %v8290_v31 }
 0x63a   : > { %7093 = vmatpush3.bf16.msra.mxu0 %v8291_v33 }
 0x63b   : > { %7094 = vmatprep.subr.bf16.mxu0 %v8292_v35 }
 0x63e   : > { %7095 = vmatpush3.bf16.msra.mxu0 %v8293_v39 }
 0x63f   : > { %7096 = vmatprep.subr.bf16.mxu0 %v8294_v25 }
 0x642   : > { %7097 = vmatpush3.bf16.msra.mxu0 %v8295_v4 }
 0x643   : > { %7642 = vmatprep.subr.bf16.mxu0 %v8366_v15 }
 0x645   : > { %6076 = vmatmul.mubr.bf16.vlgmr.msra.gmra.mrb[208].mxu0 %v9646_v12  ;;  %v6238_v12 = vld [vmem:[%s10211_s7 + $0x8] sm:$0xff] }
 0x646   : > { %7639 = vmatprep.mubr.msk.f32.mxu0 %vm8362_vm1, %v8361_v1  ;;  %v6239_v1 = vld [vmem:[%s10211_s7 + $0x10] sm:$0xff]  ;;  %v7643_v16 = vpack.c.bf16 %v6238_v12, %v6237_v10 }
 0x647   : > { %v7646_v50 = vpack.c.bf16 %v6240_v21, %v6239_v1 }
 0x648   : > { %7644 = vmatpush3.bf16.msra.mxu0 %v7643_v16 }
 0x649   : > { %7645 = vmatprep.subr.bf16.mxu0 %v8366_v15 }
 0x64c   : > { %7647 = vmatpush3.bf16.msra.mxu0 %v7646_v50 }
 0x64d   : > { %7648 = vmatprep.subr.bf16.mxu0 %v8366_v15 }
 0x650   : > { %7650 = vmatpush3.bf16.msra.mxu0 %v7649_v47 }
 0x651   : > { %7651 = vmatprep.subr.bf16.mxu0 %v8366_v15 }
 0x654   : > { %7653 = vmatpush3.bf16.msra.mxu0 %v7652_v11 }
 0x655   : > { %7654 = vmatprep.subr.bf16.mxu0 %v8366_v15 }
 0x658   : > { %v5831_v63 = vpop.f32.mrb[196].mxu0  ;;  %7656 = vmatpush3.bf16.msra.mxu0 %v7655_v19 }
 0x659   : > { %v5833_v44 = vpop.f32.mrb[197].mxu0  ;;  %7657 = vmatprep.subr.bf16.mxu0 %v8366_v15 }
 0x65a   : > { %v5835_v56 = vpop.f32.mrb[198].mxu0 }
 0x65b   : > { %v5836_v40 = vpop.f32.mrb[199].mxu0 }
 0x65c   : > { %7659 = vmatpush3.bf16.msra.mxu0 %v7658_v51 }
 0x65d   : > { %7660 = vmatprep.subr.bf16.mxu0 %v8366_v15 }
 0x660   : > { %7662 = vmatpush3.bf16.msra.mxu0 %v7661_v2 }
 0x661   : > { %7663 = vmatprep.subr.bf16.mxu0 %v8366_v15 }
 0x664   : > { %7665 = vmatpush3.bf16.msra.mxu0 %v7664_v20 }
 0x688   : > { %v5872_v29 = vpop.f32.mrb[200].mxu0  ;;  %v10097_v30 = vpop.f32.mrb[28].mxu1 }
 0x689   : > { %v5873_v37 = vadd.f32 %v5872_v29, %v5831_v63  ;;  %v5874_v48 = vpop.f32.mrb[201].mxu0  ;;  %v6038_v49 = vpop.f32.mrb[29].mxu1  ;;  %v6181_v33 = vcombine.high %v10097_v30, %v10097_v30 }
 0x68a   : > { %v5875_v42 = vadd.f32 %v5874_v48, %v5833_v44  ;;  %v5876_v52 = vpop.f32.mrb[202].mxu0  ;;  %v6040_v45 = vpop.f32.mrb[30].mxu1  ;;  %v6199_v18 = vcombine.high %v6038_v49, %v6038_v49 }
 0x68b   : > { %v5877_v53 = vpop.f32.mrb[203].mxu0  ;;  %v6041_v58 = vpop.f32.mrb[31].mxu1  ;;  %v6124_v7 = vadd.f32 %v6123_v62, %v5873_v37  ;;  %v6188_v40 = vrot.slane %v6181_v33, %v10099_v36 }
 0x68c   : > { %v6132_v61 = vrot.slane %v5875_v42, %v10099_v36  ;;  %v6206_v63 = vrot.slane %v6199_v18, %v10099_v36 }
 0x68d   : > { %v6195_v26 = vrot.slane %v6188_v40, %v10099_v36 }
 0x68e   : > { %v6133_v0 = vcombine.high %v6132_v61, %v6132_v61  ;;  %v6207_v43 = vcombine.high %v6206_v63, %v6206_v63 }
 0x690   : > { %v6140_v8 = vrot.slane %v6133_v0, %v10099_v36  ;;  %v6214_v12 = vrot.slane %v6207_v43, %v10099_v36 }
 0x692   : > { %v6142_v22 = vadd.f32 %v6140_v8, %v6124_v7 }
 0x6b9   : > { %v6117_v28 = vpop.f32.mrb[32].mxu1 }
 0x6ba   : > { %v6119_v32 = vpop.f32.mrb[33].mxu1 }
 0x6bb   : > { %v6120_v38 = vpop.f32.mrb[34].mxu1 }
 0x6bc   : > { %v6121_v17 = vpop.f32.mrb[35].mxu1 }
 0x6f8   : > { %v5954_v24 = vpop.f32.mrb[204].mxu0 }
 0x6f9   : > { %v6150_v27 = vrot.slane %v5954_v24, %v10099_v36  ;;  %v5956_v31 = vpop.f32.mrb[205].mxu0 }
 0x6fa   : > { %v6168_v35 = vrot.slane %v5956_v31, %v10099_v36  ;;  %v5958_v39 = vpop.f32.mrb[206].mxu0 }
 0x6fb   : > { %v6157_v25 = vrot.slane %v6150_v27, %v10099_v36  ;;  %v5959_v4 = vpop.f32.mrb[207].mxu0 }
 0x6fc   : > { %v6169_v44 = vcombine.high %v6168_v35, %v6168_v35 }
 0x6fd   : > { %v6158_v56 = vcombine.high %v6157_v25, %v6157_v25 }
 0x6fe   : > { %v6176_v57 = vrot.slane %v6169_v44, %v10099_v36 }
 0x6ff   : > { %v6160_v41 = vadd.f32 %v6158_v56, %v6142_v22 }
 0x700   : > { %v6177_v60 = vcombine.high %v6176_v57, %v6176_v57 }
 0x702   : > { %v6179_v10 = vadd.f32 %v6177_v60, %v6160_v41 }
 0x704   : > { %v6197_v1 = vadd.f32 %v6195_v26, %v6179_v10 }
 0x706   : > { %v6216_v15 = vadd.f32 %v6214_v12, %v6197_v1 }
 0x718   : > { %v7098_v16 = vpop.f32.mrb[208].mxu0 }
 0x719   : > { %v7099_v21 = vpop.f32.mrb[209].mxu0 }
 0x71a   : > { %v7100_v29 = vadd.f32 %v7099_v21, %v7098_v16  ;;  %v7101_v30 = vpop.f32.mrb[210].mxu0 }
 0x71b   : > { %v7102_v37 = vpop.f32.mrb[211].mxu0 }
 0x71c   : > { %v6118_v48 = vadd.f32 %v7100_v29, %v6117_v28 }
 0x71e   : > { %v6218_v49 = vcombine.high %v6118_v48, %v6118_v48 }
 0x720   : > { %v6225_v50 = vrot.slane %v6218_v49, %v10099_v36 }
 0x722   : > { %v6232_v42 = vrot.slane %v6225_v50, %v10099_v36 }
 0x724   : > { %v6233_v52 = vcombine.high %v6232_v42, %v6232_v42 }
 0x726   : > { %v6235_v45 = vadd.f32 %v6233_v52, %v6216_v15 }
 0x728   : > { %v6236_v54 = vmax.f32 %v6235_v45, 0.0 }
 0x72a   : > { %7640 = vmatmul.mubr.f32.vlgmr.msra.gmra.mrb[212].mxu0 %v6236_v54 }
 0x7fd   : > { %v6320_v53 = vpop.f32.mrb[212].mxu0 }
 0x7fe   : > { %v6321_v58 = vadd.f32 %v6320_v53, %v6253_v55  ;;  %v7641_v61 = vpop.f32.mrb[213].mxu0 }
 0x800   : > { %6324 = vst [vmem:[%s324_s21] sm:$0x1] %v6321_v58 }
 0x801   : > { %8310 = shalt.err (!%p8307_p3)
}
 0x802   : > { %s8311_s29 = scalar_lea.hbm %s10162_s25, 16  ;;  %s8315_s21 = scalar_lea.hbm %s10213_s9, 32 }
 0x803   : > { %p8312_p4 = scmp.ne.s32.totalorder %s10162_s25, %s8311_s29  ;;  %p8316_p9 = scmp.lt.u32.totalorder %s10162_s25, %s10213_s9 }
 0x804   : > { %p8317_p10 = scmp.lt.u32.totalorder %s8315_s21, %s8311_s29  ;;  %p8319_p12 = scmp.lt.u32.totalorder %s8311_s29, %s10162_s25 }
 0x805   : > { %p8313_p7 = pnand %p8312_p4, %p8456_p5 }
 0x806   : > { %p8318_p11 = por %p8317_p10, %p8316_p9 }
 0x807   : > { %p8314_p8 = pneg %p8313_p7 }
 0x808   : > { %p8320_p13 = por %p8319_p12, %p8318_p11 }
 0x80a   : > { %p8321_p0 = pnand %p8320_p13, %p8314_p8 }
 0x80c   : > { %8324 = shalt.err (!%p8321_p0)
}
 0x80d   : > { %7899 = dma.vmem_to_hbm [thread:$0]  (%p8456_p5), %s10164_s23, 16, %s10162_s25, %s6326_s26  }
 0x80e PF: > { %p7905_p1 = scmp.ge.s32.totalorder %s8359_s12, 2  ;;  %s6350_s27 = sand.u32 1, %s8347_s30  }
 0x80f   : > { %s6351_s13 = scalar_lea.sflag [#allocation7], %s6350_s27 }
 0x810   : > { %p7902_p2 = pnand %p7905_p1, %p8460_p6 }
 0x812   : > { %8342 = dma.done.wait (!%p7902_p2), %s6351_s13, 16  }
 0x813   : > { %8344 = vsyncadd (!%p7902_p2), %s6351_s13, 4294967280  ;;  %p19_p3 = scmp.ge.s32.totalorder %s8443_s15, 4   ;;  %s10216_s30 = smov %s8351_s10 }
 0x814   : > { %s10217_s10 = smov %s8355_s11  ;;  %s10218_s11 = smov %s8454_s18 }
 0x815   : > { %s10219_s12 = smov %s8443_s15  ;;  %21 = sbr.rel (!%p19_p3) target bundleno = 3 (0x3), region = 223 }
 0x81c   :  { %6355 = vsyncpa [#allocation7], 1 }
 0x81d   :  { %6357 = vsyncpa [#allocation7 + $0x1], 1 }

</bundles_post_ra>
